<compile_context>
chip_gen: v6e
topology: v6e:2x2x1
jax: 0.10.0
libtpu: 0.0.40
codegen_flags: <defaults>
</compile_context>

<pallas_src>
import functools

import jax
import jax.numpy as jnp
from jax import lax
from jax.experimental import pallas as pl
from jax.experimental.pallas import tpu as pltpu

DILS = (1, 2, 4, 8)

# rows of the packed per-lane vector table `vec` (shape (16, W*C), float32)
_B3X3, _B3X1, _B1X3 = 0, 4, 8      # biases of the three dilated chains (4 each)
_BD = 12                           # dconv bias (conv1/2/3 biases folded through)
_BNH_T, _BNW_T = 13, 14            # folded BatchNorm shifts (scales live in mh/mw)
_GAMMA = 15
_NVEC = 16


# ----------------------------------------------------------------------------------
# fused kernel: the whole forward in one invocation, activations live as (N*H, W*C)
# ----------------------------------------------------------------------------------
def _msce_kernel(x_ref, wa_ref, wb_ref, w13_ref, wd_ref, mh_ref, mw_ref,
                 vec_ref, o_ref, *, N, H, L):
    NH = N * H
    f32 = jnp.float32
    cdt = wa_ref.dtype                       # bf16 (deployed) or f32 (validation path)

    x = x_ref[...]                           # (NH, L) float32, lane-dense
    xc = x.astype(cdt)

    def mm(a, b):                            # MXU matmul, f32 accumulate
        return jnp.dot(a, b, preferred_element_type=f32)

    def vrow(i):                             # (1, L) f32 row, broadcasts over M
        return vec_ref[i:i + 1, :]

    # local row index within each image (the batch is folded into the M dimension)
    hrow = lax.broadcasted_iota(jnp.int32, (NH, L), 0) % H

    def shift_down(y, d):                    # out[r] = y[r-d]; top-of-image rows -> 0
        rolled = jnp.concatenate([y[NH - d:], y[:NH - d]], axis=0)
        return jnp.where(hrow >= d, rolled, 0.0)

    def shift_up(y, d):                      # out[r] = y[r+d]; bottom-of-image rows -> 0
        rolled = jnp.concatenate([y[d:], y[:d]], axis=0)
        return jnp.where(hrow < H - d, rolled, 0.0)

    def chain_hw(w_ref, bias0):
        """Four chained dilated convs whose taps span H (3x3 / 3x1 kernels).

        The three kh taps of conv i are fused into one (L, 3L) RHS so each conv is a
        single wide-N matmul; the H shifts are applied to the *output* slices
        ((S @ h) @ W == S @ (h @ W)) with sublane shifts + boundary masks."""
        h = xc
        s = None
        for i, d in enumerate(DILS):
            y = mm(h, w_ref[i])                                   # (NH, 3L) f32
            y = (shift_down(y[:, 0 * L:1 * L], d)
                 + y[:, 1 * L:2 * L]
                 + shift_up(y[:, 2 * L:3 * L], d))
            a = jnp.maximum(y + vrow(bias0 + i), 0.0)             # bias + ReLU in f32
            s = a if s is None else s + a                         # incremental accum
            h = a.astype(cdt)
        return s

    # ---- branch 1: dilated 3x3 chain --------------------------------------------
    s1 = chain_hw(wa_ref, _B3X3)
    # ---- branch 2: dilated 3x1 chain --------------------------------------------
    s2 = chain_hw(wb_ref, _B3X1)

    # ---- branch 3: dilated 1x3 chain (W taps only -> one banded matmul per conv) -
    h = xc
    s3 = None
    for i in range(4):
        a = jnp.maximum(mm(h, w13_ref[i]) + vrow(_B1X3 + i), 0.0)
        s3 = a if s3 is None else s3 + a
        h = a.astype(cdt)

    # ---- ASPPPoolingH: mean over W + 1x1 conv + broadcast over W folded into mh --
    #      (BN scale folded into mh's columns; BN shift + ReLU applied here)
    yh = jnp.maximum(mm(xc, mh_ref[...]) + vrow(_BNH_T), 0.0)

    # ---- ASPPPoolingW: per-image mean over H (sublane reduce), broadcast back,
    #      then block-diagonal 1x1 conv + BN shift + ReLU (scale folded into mw) ----
    pooled = jnp.concatenate(
        [jnp.broadcast_to(
            jnp.mean(x[n * H:(n + 1) * H, :], axis=0, keepdims=True), (H, L))
         for n in range(N)], axis=0)                              # (NH, L)
    yw = jnp.maximum(mm(pooled.astype(cdt), mw_ref[...]) + vrow(_BNW_T), 0.0)

    # ---- conv1/2/3 + dconv, all folded into a single K-fused matmul ---------------
    cat = jnp.concatenate([s1, s2, s3, yh, yw], axis=1).astype(cdt)   # (NH, 5L)
    out = mm(cat, wd_ref[...]) + vrow(_BD)

    # ---- gamma residual blend ------------------------------------------------------
    g = vrow(_GAMMA)
    o_ref[...] = (g * out + (1.0 - g) * x).astype(o_ref.dtype)


# ----------------------------------------------------------------------------------
# one-time host-side weight packing into lane-dense operators
# ----------------------------------------------------------------------------------
def pack_params(p, *, H, W, C, dtype=jnp.bfloat16):
    f32 = jnp.float32
    L = W * C
    eye_w = jnp.eye(W, dtype=f32)

    def band_w(s):       # input column w contributes to output column w - s (0 at borders)
        return jnp.eye(W, W, k=-s, dtype=f32)

    def blockdiag(m):                                     # (C,C) -> (L,L)
        return jnp.kron(eye_w, m.astype(f32))

    wa, wb, w13 = [], [], []
    for i, d in zip(range(1, 5), DILS):
        k33 = p[f'w3x3_{i}_w'].astype(f32)                # (3,3,Cin,Cout) HWIO
        wa.append(jnp.concatenate(
            [sum(jnp.kron(band_w((kw - 1) * d), k33[kh, kw]) for kw in range(3))
             for kh in range(3)], axis=1))                # (L, 3L): kh taps fused along N
        k31 = p[f'w3x1_{i}_w'].astype(f32)                # (3,1,Cin,Cout)
        wb.append(jnp.concatenate(
            [blockdiag(k31[kh, 0]) for kh in range(3)], axis=1))       # (L, 3L)
        k13 = p[f'w1x3_{i}_w'].astype(f32)                # (1,3,Cin,Cout)
        w13.append(sum(jnp.kron(band_w((kw - 1) * d), k13[0, kw]) for kw in range(3)))

    # conv1/2/3 (1x1, biased) fold through dconv:  (s @ C + b) @ D == s @ (C@D) + b@D
    dw = p['dconv_w'].astype(f32)                         # (5C, C), [cin, cout]
    dblk = [dw[j * C:(j + 1) * C, :] for j in range(5)]
    cmix = [p['conv1_w'].astype(f32) @ dblk[0],
            p['conv2_w'].astype(f32) @ dblk[1],
            p['conv3_w'].astype(f32) @ dblk[2],
            dblk[3], dblk[4]]
    wd = jnp.concatenate([blockdiag(m) for m in cmix], axis=0)         # (5L, L)
    dbias = (p['dconv_b'].reshape(-1).astype(f32)
             + p['conv1_b'].reshape(-1).astype(f32) @ dblk[0]
             + p['conv2_b'].reshape(-1).astype(f32) @ dblk[1]
             + p['conv3_b'].reshape(-1).astype(f32) @ dblk[2])

    def bn_affine(bn):
        g, beta, mu, var = bn
        s = g.reshape(-1).astype(f32) / jnp.sqrt(var.reshape(-1).astype(f32) + 1e-5)
        t = beta.reshape(-1).astype(f32) - mu.reshape(-1).astype(f32) * s
        return s, t

    sh_, th_ = bn_affine(p['bn_h'])
    sw_, tw_ = bn_affine(p['bn_w'])

    # ASPPPoolingH: mean over W + 1x1 conv + broadcast back over W in one matrix,
    # with the BN scale folded into the output columns.
    mh = jnp.kron(jnp.ones((W, W), f32) / W, p['aspph_w'].astype(f32) * sh_[None, :])
    # ASPPPoolingW: block-diagonal 1x1 conv with BN scale folded in (H-mean in-kernel).
    mw = blockdiag(p['asppw_w'].astype(f32) * sw_[None, :])

    def lanes(v):                                         # (C,) -> (L,) tiled per W group
        return jnp.tile(v.reshape(-1).astype(f32), W)

    rows = []
    rows += [lanes(p[f'w3x3_{i}_b']) for i in range(1, 5)]
    rows += [lanes(p[f'w3x1_{i}_b']) for i in range(1, 5)]
    rows += [lanes(p[f'w1x3_{i}_b']) for i in range(1, 5)]
    rows += [lanes(dbias), lanes(th_), lanes(tw_)]
    rows.append(jnp.full((L,), p['gamma'].reshape(-1)[0], f32))
    vec = jnp.stack(rows)                                 # (16, L) float32
    assert vec.shape[0] == _NVEC

    cast = lambda a: a.astype(dtype)
    return dict(wa=cast(jnp.stack(wa)), wb=cast(jnp.stack(wb)),
                w13=cast(jnp.stack(w13)), wd=cast(wd),
                mh=cast(mh), mw=cast(mw), vec=vec)


# ----------------------------------------------------------------------------------
# forward = a single pallas_call, single grid step (batch folded into M)
# ----------------------------------------------------------------------------------
def msce_forward(x, packed):
    N, H, W, C = x.shape
    assert H == 32 and W == 32, "AdaptiveAvgPool2d((32,1))/((1,32)) exactness requires H=W=32"
    L = W * C
    assert L == 128, "lane-dense packing assumes W*C == 128"
    NH = N * H
    xp = x.reshape(NH, L)        # free row-major reshape: batch folded into matmul M

    consts = (packed['wa'], packed['wb'], packed['w13'], packed['wd'],
              packed['mh'], packed['mw'], packed['vec'])

    def whole(shape):            # one block == the whole array
        nd = len(shape)
        return pl.BlockSpec(shape, lambda i, _nd=nd: (0,) * _nd)

    # Single TensorCore step: weights are not replicated.  On v7x one could instead
    # split the folded rows over grid=(2,) "parallel", but at this size the duplicated
    # weight DMA outweighs the compute saved (see review).
    out = pl.pallas_call(
        functools.partial(_msce_kernel, N=N, H=H, L=L),
        grid=(1,),
        in_specs=[whole(xp.shape)] + [whole(a.shape) for a in consts],
        out_specs=whole(xp.shape),
        out_shape=jax.ShapeDtypeStruct((NH, L), x.dtype),
        compiler_params=pltpu.CompilerParams(dimension_semantics=("arbitrary",)),
    )(xp, *consts)
    return out.reshape(N, H, W, C)


# ----------------------------------------------------------------------------------
# pure-JAX reference (same math, lax.conv for the dilated convs)
# ----------------------------------------------------------------------------------
def msce_reference(x, p):
    def conv(xx, w, b, dil, relu):
        KH, KW = w.shape[0], w.shape[1]
        ph = dil if KH == 3 else 0
        pw = dil if KW == 3 else 0
        y = jax.lax.conv_general_dilated(
            xx, w, (1, 1), ((ph, ph), (pw, pw)),
            rhs_dilation=(dil, dil),
            dimension_numbers=('NHWC', 'HWIO', 'NHWC'))
        y = y + b.reshape(1, 1, 1, -1)
        return jnp.maximum(y, 0.0) if relu else y

    def conv1x1(xx, w, b):
        return jnp.einsum('nhwc,co->nhwo', xx, w) + b.reshape(1, 1, 1, -1)

    def chain(prefix):
        feats, h = [], x
        for i, d in enumerate(DILS, start=1):
            h = conv(h, p[f'{prefix}_{i}_w'], p[f'{prefix}_{i}_b'], d, True)
            feats.append(h)
        return feats

    def aspp(xx, w, bn, axis):
        g, beta, mu, var = bn
        pooled = jnp.mean(xx, axis=axis, keepdims=True)
        y = jnp.einsum('nhwc,co->nhwo', pooled, w)
        y = ((y - mu.reshape(1, 1, 1, -1)) / jnp.sqrt(var.reshape(1, 1, 1, -1) + 1e-5)
             * g.reshape(1, 1, 1, -1) + beta.reshape(1, 1, 1, -1))
        return jnp.broadcast_to(jnp.maximum(y, 0.0), xx.shape)

    b1 = conv1x1(sum(chain('w3x3')), p['conv1_w'], p['conv1_b'])
    b2 = conv1x1(sum(chain('w3x1')), p['conv2_w'], p['conv2_b'])
    b3 = conv1x1(sum(chain('w1x3')), p['conv3_w'], p['conv3_b'])
    bh = aspp(x, p['aspph_w'], p['bn_h'], axis=2)
    bw = aspp(x, p['asppw_w'], p['bn_w'], axis=1)

    cat = jnp.concatenate([b1, b2, b3, bh, bw], axis=-1)
    out = jnp.einsum('nhwc,co->nhwo', cat, p['dconv_w']) + p['dconv_b'].reshape(1, 1, 1, -1)
    g = p['gamma'][0, 0]
    return g * out + (1.0 - g) * x


# ----------------------------------------------------------------------------------
if __name__ == "__main__":
    N, C, H, W = 2, 4, 32, 32
    key = jax.random.PRNGKey(0)
    keys = iter(jax.random.split(key, 40))

    def rnd(shape, scale=0.2):
        return scale * jax.random.normal(next(keys), shape, jnp.float32)

    p = {}
    for i, _d in enumerate(DILS, start=1):
        p[f'w3x3_{i}_w'] = rnd((3, 3, C, C)); p[f'w3x3_{i}_b'] = jnp.zeros((1, C), jnp.float32)
        p[f'w3x1_{i}_w'] = rnd((3, 1, C, C)); p[f'w3x1_{i}_b'] = jnp.zeros((1, C), jnp.float32)
        p[f'w1x3_{i}_w'] = rnd((1, 3, C, C)); p[f'w1x3_{i}_b'] = jnp.zeros((1, C), jnp.float32)
    for name in ('conv1', 'conv2', 'conv3'):
        p[f'{name}_w'] = rnd((C, C)); p[f'{name}_b'] = jnp.zeros((1, C), jnp.float32)
    p['aspph_w'] = rnd((C, C))
    p['asppw_w'] = rnd((C, C))
    p['bn_h'] = (1.0 + 0.1 * rnd((1, C)), rnd((1, C)), rnd((1, C)),
                 1.0 + jnp.abs(rnd((1, C))))
    p['bn_w'] = (1.0 + 0.1 * rnd((1, C)), rnd((1, C)), rnd((1, C)),
                 1.0 + jnp.abs(rnd((1, C))))
    p['dconv_w'] = rnd((5 * C, C)); p['dconv_b'] = jnp.zeros((1, C), jnp.float32)
    # module __init__ sets gamma = 0 (out == x); use 0.3 so the fused path is exercised.
    p['gamma'] = jnp.full((1, 1), 0.3, jnp.float32)

    x = jax.random.normal(next(keys), (N, H, W, C), jnp.float32)
    ref = jax.block_until_ready(msce_reference(x, p))

    # 1) structural validation: f32 packed weights -> same math as the reference
    packed_f32 = pack_params(p, H=H, W=W, C=C, dtype=jnp.float32)
    out_f32 = jax.block_until_ready(msce_forward(x, packed_f32))
    assert out_f32.shape == (N, H, W, C)
    err32 = float(jnp.max(jnp.abs(out_f32 - ref)))
    assert jnp.allclose(out_f32, ref, atol=3e-3, rtol=3e-3), ("f32 path", err32)

    # 2) deployed configuration: bf16 packed weights / bf16 MXU operands.
    #    Tolerance budget reflects only bf16 quantization of weights + matmul inputs
    #    relative to the all-f32 reference (structure is already verified above).
    packed = pack_params(p, H=H, W=W, C=C, dtype=jnp.bfloat16)
    out = jax.block_until_ready(msce_forward(x, packed))
    err = float(jnp.max(jnp.abs(out - ref)))
    rel = float(jnp.linalg.norm(out - ref) / jnp.linalg.norm(ref))
    assert err < 5e-2 and rel < 2e-2, ("bf16 path", err, rel)

    print("KERNEL_OK")
</pallas_src>

<mosaic_0001>
module attributes {stable_mosaic.version = 11 : i64} {
  func.func @_msce_kernel(%arg0: i32, %arg1: memref<64x128xf32, #tpu.memory_space<vmem>>, %arg2: memref<4x128x384xf32, #tpu.memory_space<vmem>>, %arg3: memref<4x128x384xf32, #tpu.memory_space<vmem>>, %arg4: memref<4x128x128xf32, #tpu.memory_space<vmem>>, %arg5: memref<640x128xf32, #tpu.memory_space<vmem>>, %arg6: memref<128x128xf32, #tpu.memory_space<vmem>>, %arg7: memref<128x128xf32, #tpu.memory_space<vmem>>, %arg8: memref<16x128xf32, #tpu.memory_space<vmem>>, %arg9: memref<64x128xf32, #tpu.memory_space<vmem>>) attributes {dimension_semantics = [#tpu.dimension_semantics<arbitrary>], iteration_bounds = array<i64: 1>, scalar_prefetch = 0 : i64, scratch_operands = 0 : i64, tpu.core_type = #tpu.core_type<tc>, window_params = [{pipeline_mode = #tpu.pipeline_mode<synchronous>, transform_indices = @transform_0, window_bounds = array<i64: 64, 128>}, {pipeline_mode = #tpu.pipeline_mode<synchronous>, transform_indices = @transform_1, window_bounds = array<i64: 4, 128, 384>}, {pipeline_mode = #tpu.pipeline_mode<synchronous>, transform_indices = @transform_2, window_bounds = array<i64: 4, 128, 384>}, {pipeline_mode = #tpu.pipeline_mode<synchronous>, transform_indices = @transform_3, window_bounds = array<i64: 4, 128, 128>}, {pipeline_mode = #tpu.pipeline_mode<synchronous>, transform_indices = @transform_4, window_bounds = array<i64: 640, 128>}, {pipeline_mode = #tpu.pipeline_mode<synchronous>, transform_indices = @transform_5, window_bounds = array<i64: 128, 128>}, {pipeline_mode = #tpu.pipeline_mode<synchronous>, transform_indices = @transform_6, window_bounds = array<i64: 128, 128>}, {pipeline_mode = #tpu.pipeline_mode<synchronous>, transform_indices = @transform_7, window_bounds = array<i64: 16, 128>}, {pipeline_mode = #tpu.pipeline_mode<synchronous>, transform_indices = @transform_8, window_bounds = array<i64: 64, 128>}]} {
    %c0 = arith.constant 0 : index
    %c0_0 = arith.constant 0 : index
    %0 = vector.load %arg1[%c0, %c0_0] : memref<64x128xf32, #tpu.memory_space<vmem>>, vector<64x128xf32>
    %1 = tpu.iota {dimensions = array<i32: 0>} : vector<64x128xi32>
    %c32_i32 = arith.constant 32 : i32
    %c0_i32 = arith.constant 0 : i32
    %2 = arith.cmpi eq, %c32_i32, %c0_i32 : i32
    %c1_i32 = arith.constant 1 : i32
    %3 = arith.select %2, %c1_i32, %c32_i32 : i32
    %4 = vector.broadcast %3 : i32 to vector<64x128xi32>
    %5 = arith.remsi %1, %4 : vector<64x128xi32>
    %c0_i32_1 = arith.constant 0 : i32
    %6 = vector.broadcast %c0_i32_1 : i32 to vector<64x128xi32>
    %7 = arith.cmpi ne, %5, %6 : vector<64x128xi32>
    %c0_i32_2 = arith.constant 0 : i32
    %8 = vector.broadcast %c0_i32_2 : i32 to vector<64x128xi32>
    %9 = arith.cmpi slt, %5, %8 : vector<64x128xi32>
    %c0_i32_3 = arith.constant 0 : i32
    %10 = arith.cmpi slt, %3, %c0_i32_3 : i32
    %11 = vector.broadcast %10 : i1 to vector<64x128xi1>
    %12 = vector.broadcast %11 : vector<64x128xi1> to vector<64x128xi1>
    %13 = arith.xori %9, %12 : vector<64x128xi1>
    %14 = arith.andi %13, %7 : vector<64x128xi1>
    %15 = vector.broadcast %3 : i32 to vector<64x128xi32>
    %16 = arith.addi %5, %15 : vector<64x128xi32>
    %17 = arith.select %14, %16, %5 : vector<64x128xi1>, vector<64x128xi32>
    %c0_4 = arith.constant 0 : index
    %c0_5 = arith.constant 0 : index
    %c0_6 = arith.constant 0 : index
    %18 = vector.load %arg2[%c0_4, %c0_5, %c0_6] : memref<4x128x384xf32, #tpu.memory_space<vmem>>, vector<1x128x384xf32>
    %19 = vector.shape_cast %18 : vector<1x128x384xf32> to vector<128x384xf32>
    %cst = arith.constant dense<0.000000e+00> : vector<64x384xf32>
    %20 = tpu.matmul %0, %19, %cst {dimension_numbers = #tpu.dot_dimension_numbers<[1], [0], [0], [1], [0, 0, 1, 1], [], []>} : vector<64x128xf32>, vector<128x384xf32>, vector<64x384xf32> -> vector<64x384xf32>
    %21 = vector.extract_strided_slice %20 {offsets = [0, 0], sizes = [64, 128], strides = [1, 1]} : vector<64x384xf32> to vector<64x128xf32>
    %22 = vector.extract_strided_slice %21 {offsets = [63, 0], sizes = [1, 128], strides = [1, 1]} : vector<64x128xf32> to vector<1x128xf32>
    %23 = vector.extract_strided_slice %21 {offsets = [0, 0], sizes = [63, 128], strides = [1, 1]} : vector<64x128xf32> to vector<63x128xf32>
    %24 = tpu.concatenate %22, %23 in 0 : vector<1x128xf32>, vector<63x128xf32> -> vector<64x128xf32>
    %c1_i32_7 = arith.constant 1 : i32
    %25 = vector.broadcast %c1_i32_7 : i32 to vector<64x128xi32>
    %26 = arith.cmpi sge, %17, %25 : vector<64x128xi32>
    %cst_8 = arith.constant 0.000000e+00 : f32
    %27 = vector.broadcast %cst_8 : f32 to vector<64x128xf32>
    %28 = arith.select %26, %24, %27 : vector<64x128xi1>, vector<64x128xf32>
    %29 = vector.extract_strided_slice %20 {offsets = [0, 128], sizes = [64, 128], strides = [1, 1]} : vector<64x384xf32> to vector<64x128xf32>
    %30 = arith.addf %28, %29 : vector<64x128xf32>
    %31 = vector.extract_strided_slice %20 {offsets = [0, 256], sizes = [64, 128], strides = [1, 1]} : vector<64x384xf32> to vector<64x128xf32>
    %32 = vector.extract_strided_slice %31 {offsets = [1, 0], sizes = [63, 128], strides = [1, 1]} : vector<64x128xf32> to vector<63x128xf32>
    %33 = vector.extract_strided_slice %31 {offsets = [0, 0], sizes = [1, 128], strides = [1, 1]} : vector<64x128xf32> to vector<1x128xf32>
    %34 = tpu.concatenate %32, %33 in 0 : vector<63x128xf32>, vector<1x128xf32> -> vector<64x128xf32>
    %c31_i32 = arith.constant 31 : i32
    %35 = vector.broadcast %c31_i32 : i32 to vector<64x128xi32>
    %36 = arith.cmpi slt, %17, %35 : vector<64x128xi32>
    %cst_9 = arith.constant 0.000000e+00 : f32
    %37 = vector.broadcast %cst_9 : f32 to vector<64x128xf32>
    %38 = arith.select %36, %34, %37 : vector<64x128xi1>, vector<64x128xf32>
    %39 = arith.addf %30, %38 : vector<64x128xf32>
    %c0_10 = arith.constant 0 : index
    %c0_11 = arith.constant 0 : index
    %40 = vector.load %arg8[%c0_10, %c0_11] : memref<16x128xf32, #tpu.memory_space<vmem>>, vector<1x128xf32>
    %41 = vector.broadcast %40 : vector<1x128xf32> to vector<64x128xf32>
    %42 = arith.addf %39, %41 : vector<64x128xf32>
    %cst_12 = arith.constant 0.000000e+00 : f32
    %43 = vector.broadcast %cst_12 : f32 to vector<64x128xf32>
    %44 = arith.maximumf %42, %43 : vector<64x128xf32>
    %c1 = arith.constant 1 : index
    %c0_13 = arith.constant 0 : index
    %c0_14 = arith.constant 0 : index
    %45 = vector.load %arg2[%c1, %c0_13, %c0_14] : memref<4x128x384xf32, #tpu.memory_space<vmem>>, vector<1x128x384xf32>
    %46 = vector.shape_cast %45 : vector<1x128x384xf32> to vector<128x384xf32>
    %cst_15 = arith.constant dense<0.000000e+00> : vector<64x384xf32>
    %47 = tpu.matmul %44, %46, %cst_15 {dimension_numbers = #tpu.dot_dimension_numbers<[1], [0], [0], [1], [0, 0, 1, 1], [], []>} : vector<64x128xf32>, vector<128x384xf32>, vector<64x384xf32> -> vector<64x384xf32>
    %48 = vector.extract_strided_slice %47 {offsets = [0, 0], sizes = [64, 128], strides = [1, 1]} : vector<64x384xf32> to vector<64x128xf32>
    %49 = vector.extract_strided_slice %48 {offsets = [62, 0], sizes = [2, 128], strides = [1, 1]} : vector<64x128xf32> to vector<2x128xf32>
    %50 = vector.extract_strided_slice %48 {offsets = [0, 0], sizes = [62, 128], strides = [1, 1]} : vector<64x128xf32> to vector<62x128xf32>
    %51 = tpu.concatenate %49, %50 in 0 : vector<2x128xf32>, vector<62x128xf32> -> vector<64x128xf32>
    %c2_i32 = arith.constant 2 : i32
    %52 = vector.broadcast %c2_i32 : i32 to vector<64x128xi32>
    %53 = arith.cmpi sge, %17, %52 : vector<64x128xi32>
    %cst_16 = arith.constant 0.000000e+00 : f32
    %54 = vector.broadcast %cst_16 : f32 to vector<64x128xf32>
    %55 = arith.select %53, %51, %54 : vector<64x128xi1>, vector<64x128xf32>
    %56 = vector.extract_strided_slice %47 {offsets = [0, 128], sizes = [64, 128], strides = [1, 1]} : vector<64x384xf32> to vector<64x128xf32>
    %57 = arith.addf %55, %56 : vector<64x128xf32>
    %58 = vector.extract_strided_slice %47 {offsets = [0, 256], sizes = [64, 128], strides = [1, 1]} : vector<64x384xf32> to vector<64x128xf32>
    %59 = vector.extract_strided_slice %58 {offsets = [2, 0], sizes = [62, 128], strides = [1, 1]} : vector<64x128xf32> to vector<62x128xf32>
    %60 = vector.extract_strided_slice %58 {offsets = [0, 0], sizes = [2, 128], strides = [1, 1]} : vector<64x128xf32> to vector<2x128xf32>
    %61 = tpu.concatenate %59, %60 in 0 : vector<62x128xf32>, vector<2x128xf32> -> vector<64x128xf32>
    %c30_i32 = arith.constant 30 : i32
    %62 = vector.broadcast %c30_i32 : i32 to vector<64x128xi32>
    %63 = arith.cmpi slt, %17, %62 : vector<64x128xi32>
    %cst_17 = arith.constant 0.000000e+00 : f32
    %64 = vector.broadcast %cst_17 : f32 to vector<64x128xf32>
    %65 = arith.select %63, %61, %64 : vector<64x128xi1>, vector<64x128xf32>
    %66 = arith.addf %57, %65 : vector<64x128xf32>
    %c1_18 = arith.constant 1 : index
    %c0_19 = arith.constant 0 : index
    %67 = vector.load %arg8[%c1_18, %c0_19] : memref<16x128xf32, #tpu.memory_space<vmem>>, vector<1x128xf32>
    %68 = vector.broadcast %67 : vector<1x128xf32> to vector<64x128xf32>
    %69 = arith.addf %66, %68 : vector<64x128xf32>
    %cst_20 = arith.constant 0.000000e+00 : f32
    %70 = vector.broadcast %cst_20 : f32 to vector<64x128xf32>
    %71 = arith.maximumf %69, %70 : vector<64x128xf32>
    %72 = arith.addf %44, %71 : vector<64x128xf32>
    %c2 = arith.constant 2 : index
    %c0_21 = arith.constant 0 : index
    %c0_22 = arith.constant 0 : index
    %73 = vector.load %arg2[%c2, %c0_21, %c0_22] : memref<4x128x384xf32, #tpu.memory_space<vmem>>, vector<1x128x384xf32>
    %74 = vector.shape_cast %73 : vector<1x128x384xf32> to vector<128x384xf32>
    %cst_23 = arith.constant dense<0.000000e+00> : vector<64x384xf32>
    %75 = tpu.matmul %71, %74, %cst_23 {dimension_numbers = #tpu.dot_dimension_numbers<[1], [0], [0], [1], [0, 0, 1, 1], [], []>} : vector<64x128xf32>, vector<128x384xf32>, vector<64x384xf32> -> vector<64x384xf32>
    %76 = vector.extract_strided_slice %75 {offsets = [0, 0], sizes = [64, 128], strides = [1, 1]} : vector<64x384xf32> to vector<64x128xf32>
    %77 = vector.extract_strided_slice %76 {offsets = [60, 0], sizes = [4, 128], strides = [1, 1]} : vector<64x128xf32> to vector<4x128xf32>
    %78 = vector.extract_strided_slice %76 {offsets = [0, 0], sizes = [60, 128], strides = [1, 1]} : vector<64x128xf32> to vector<60x128xf32>
    %79 = tpu.concatenate %77, %78 in 0 : vector<4x128xf32>, vector<60x128xf32> -> vector<64x128xf32>
    %c4_i32 = arith.constant 4 : i32
    %80 = vector.broadcast %c4_i32 : i32 to vector<64x128xi32>
    %81 = arith.cmpi sge, %17, %80 : vector<64x128xi32>
    %cst_24 = arith.constant 0.000000e+00 : f32
    %82 = vector.broadcast %cst_24 : f32 to vector<64x128xf32>
    %83 = arith.select %81, %79, %82 : vector<64x128xi1>, vector<64x128xf32>
    %84 = vector.extract_strided_slice %75 {offsets = [0, 128], sizes = [64, 128], strides = [1, 1]} : vector<64x384xf32> to vector<64x128xf32>
    %85 = arith.addf %83, %84 : vector<64x128xf32>
    %86 = vector.extract_strided_slice %75 {offsets = [0, 256], sizes = [64, 128], strides = [1, 1]} : vector<64x384xf32> to vector<64x128xf32>
    %87 = vector.extract_strided_slice %86 {offsets = [4, 0], sizes = [60, 128], strides = [1, 1]} : vector<64x128xf32> to vector<60x128xf32>
    %88 = vector.extract_strided_slice %86 {offsets = [0, 0], sizes = [4, 128], strides = [1, 1]} : vector<64x128xf32> to vector<4x128xf32>
    %89 = tpu.concatenate %87, %88 in 0 : vector<60x128xf32>, vector<4x128xf32> -> vector<64x128xf32>
    %c28_i32 = arith.constant 28 : i32
    %90 = vector.broadcast %c28_i32 : i32 to vector<64x128xi32>
    %91 = arith.cmpi slt, %17, %90 : vector<64x128xi32>
    %cst_25 = arith.constant 0.000000e+00 : f32
    %92 = vector.broadcast %cst_25 : f32 to vector<64x128xf32>
    %93 = arith.select %91, %89, %92 : vector<64x128xi1>, vector<64x128xf32>
    %94 = arith.addf %85, %93 : vector<64x128xf32>
    %c2_26 = arith.constant 2 : index
    %c0_27 = arith.constant 0 : index
    %95 = vector.load %arg8[%c2_26, %c0_27] : memref<16x128xf32, #tpu.memory_space<vmem>>, vector<1x128xf32>
    %96 = vector.broadcast %95 : vector<1x128xf32> to vector<64x128xf32>
    %97 = arith.addf %94, %96 : vector<64x128xf32>
    %cst_28 = arith.constant 0.000000e+00 : f32
    %98 = vector.broadcast %cst_28 : f32 to vector<64x128xf32>
    %99 = arith.maximumf %97, %98 : vector<64x128xf32>
    %100 = arith.addf %72, %99 : vector<64x128xf32>
    %c3 = arith.constant 3 : index
    %c0_29 = arith.constant 0 : index
    %c0_30 = arith.constant 0 : index
    %101 = vector.load %arg2[%c3, %c0_29, %c0_30] : memref<4x128x384xf32, #tpu.memory_space<vmem>>, vector<1x128x384xf32>
    %102 = vector.shape_cast %101 : vector<1x128x384xf32> to vector<128x384xf32>
    %cst_31 = arith.constant dense<0.000000e+00> : vector<64x384xf32>
    %103 = tpu.matmul %99, %102, %cst_31 {dimension_numbers = #tpu.dot_dimension_numbers<[1], [0], [0], [1], [0, 0, 1, 1], [], []>} : vector<64x128xf32>, vector<128x384xf32>, vector<64x384xf32> -> vector<64x384xf32>
    %104 = vector.extract_strided_slice %103 {offsets = [0, 0], sizes = [64, 128], strides = [1, 1]} : vector<64x384xf32> to vector<64x128xf32>
    %105 = vector.extract_strided_slice %104 {offsets = [56, 0], sizes = [8, 128], strides = [1, 1]} : vector<64x128xf32> to vector<8x128xf32>
    %106 = vector.extract_strided_slice %104 {offsets = [0, 0], sizes = [56, 128], strides = [1, 1]} : vector<64x128xf32> to vector<56x128xf32>
    %107 = tpu.concatenate %105, %106 in 0 : vector<8x128xf32>, vector<56x128xf32> -> vector<64x128xf32>
    %c8_i32 = arith.constant 8 : i32
    %108 = vector.broadcast %c8_i32 : i32 to vector<64x128xi32>
    %109 = arith.cmpi sge, %17, %108 : vector<64x128xi32>
    %cst_32 = arith.constant 0.000000e+00 : f32
    %110 = vector.broadcast %cst_32 : f32 to vector<64x128xf32>
    %111 = arith.select %109, %107, %110 : vector<64x128xi1>, vector<64x128xf32>
    %112 = vector.extract_strided_slice %103 {offsets = [0, 128], sizes = [64, 128], strides = [1, 1]} : vector<64x384xf32> to vector<64x128xf32>
    %113 = arith.addf %111, %112 : vector<64x128xf32>
    %114 = vector.extract_strided_slice %103 {offsets = [0, 256], sizes = [64, 128], strides = [1, 1]} : vector<64x384xf32> to vector<64x128xf32>
    %115 = vector.extract_strided_slice %114 {offsets = [8, 0], sizes = [56, 128], strides = [1, 1]} : vector<64x128xf32> to vector<56x128xf32>
    %116 = vector.extract_strided_slice %114 {offsets = [0, 0], sizes = [8, 128], strides = [1, 1]} : vector<64x128xf32> to vector<8x128xf32>
    %117 = tpu.concatenate %115, %116 in 0 : vector<56x128xf32>, vector<8x128xf32> -> vector<64x128xf32>
    %c24_i32 = arith.constant 24 : i32
    %118 = vector.broadcast %c24_i32 : i32 to vector<64x128xi32>
    %119 = arith.cmpi slt, %17, %118 : vector<64x128xi32>
    %cst_33 = arith.constant 0.000000e+00 : f32
    %120 = vector.broadcast %cst_33 : f32 to vector<64x128xf32>
    %121 = arith.select %119, %117, %120 : vector<64x128xi1>, vector<64x128xf32>
    %122 = arith.addf %113, %121 : vector<64x128xf32>
    %c3_34 = arith.constant 3 : index
    %c0_35 = arith.constant 0 : index
    %123 = vector.load %arg8[%c3_34, %c0_35] : memref<16x128xf32, #tpu.memory_space<vmem>>, vector<1x128xf32>
    %124 = vector.broadcast %123 : vector<1x128xf32> to vector<64x128xf32>
    %125 = arith.addf %122, %124 : vector<64x128xf32>
    %cst_36 = arith.constant 0.000000e+00 : f32
    %126 = vector.broadcast %cst_36 : f32 to vector<64x128xf32>
    %127 = arith.maximumf %125, %126 : vector<64x128xf32>
    %128 = arith.addf %100, %127 : vector<64x128xf32>
    %c0_37 = arith.constant 0 : index
    %c0_38 = arith.constant 0 : index
    %c0_39 = arith.constant 0 : index
    %129 = vector.load %arg3[%c0_37, %c0_38, %c0_39] : memref<4x128x384xf32, #tpu.memory_space<vmem>>, vector<1x128x384xf32>
    %130 = vector.shape_cast %129 : vector<1x128x384xf32> to vector<128x384xf32>
    %cst_40 = arith.constant dense<0.000000e+00> : vector<64x384xf32>
    %131 = tpu.matmul %0, %130, %cst_40 {dimension_numbers = #tpu.dot_dimension_numbers<[1], [0], [0], [1], [0, 0, 1, 1], [], []>} : vector<64x128xf32>, vector<128x384xf32>, vector<64x384xf32> -> vector<64x384xf32>
    %132 = vector.extract_strided_slice %131 {offsets = [0, 0], sizes = [64, 128], strides = [1, 1]} : vector<64x384xf32> to vector<64x128xf32>
    %133 = vector.extract_strided_slice %132 {offsets = [63, 0], sizes = [1, 128], strides = [1, 1]} : vector<64x128xf32> to vector<1x128xf32>
    %134 = vector.extract_strided_slice %132 {offsets = [0, 0], sizes = [63, 128], strides = [1, 1]} : vector<64x128xf32> to vector<63x128xf32>
    %135 = tpu.concatenate %133, %134 in 0 : vector<1x128xf32>, vector<63x128xf32> -> vector<64x128xf32>
    %c1_i32_41 = arith.constant 1 : i32
    %136 = vector.broadcast %c1_i32_41 : i32 to vector<64x128xi32>
    %137 = arith.cmpi sge, %17, %136 : vector<64x128xi32>
    %cst_42 = arith.constant 0.000000e+00 : f32
    %138 = vector.broadcast %cst_42 : f32 to vector<64x128xf32>
    %139 = arith.select %137, %135, %138 : vector<64x128xi1>, vector<64x128xf32>
    %140 = vector.extract_strided_slice %131 {offsets = [0, 128], sizes = [64, 128], strides = [1, 1]} : vector<64x384xf32> to vector<64x128xf32>
    %141 = arith.addf %139, %140 : vector<64x128xf32>
    %142 = vector.extract_strided_slice %131 {offsets = [0, 256], sizes = [64, 128], strides = [1, 1]} : vector<64x384xf32> to vector<64x128xf32>
    %143 = vector.extract_strided_slice %142 {offsets = [1, 0], sizes = [63, 128], strides = [1, 1]} : vector<64x128xf32> to vector<63x128xf32>
    %144 = vector.extract_strided_slice %142 {offsets = [0, 0], sizes = [1, 128], strides = [1, 1]} : vector<64x128xf32> to vector<1x128xf32>
    %145 = tpu.concatenate %143, %144 in 0 : vector<63x128xf32>, vector<1x128xf32> -> vector<64x128xf32>
    %c31_i32_43 = arith.constant 31 : i32
    %146 = vector.broadcast %c31_i32_43 : i32 to vector<64x128xi32>
    %147 = arith.cmpi slt, %17, %146 : vector<64x128xi32>
    %cst_44 = arith.constant 0.000000e+00 : f32
    %148 = vector.broadcast %cst_44 : f32 to vector<64x128xf32>
    %149 = arith.select %147, %145, %148 : vector<64x128xi1>, vector<64x128xf32>
    %150 = arith.addf %141, %149 : vector<64x128xf32>
    %c4 = arith.constant 4 : index
    %c0_45 = arith.constant 0 : index
    %151 = vector.load %arg8[%c4, %c0_45] : memref<16x128xf32, #tpu.memory_space<vmem>>, vector<1x128xf32>
    %152 = vector.broadcast %151 : vector<1x128xf32> to vector<64x128xf32>
    %153 = arith.addf %150, %152 : vector<64x128xf32>
    %cst_46 = arith.constant 0.000000e+00 : f32
    %154 = vector.broadcast %cst_46 : f32 to vector<64x128xf32>
    %155 = arith.maximumf %153, %154 : vector<64x128xf32>
    %c1_47 = arith.constant 1 : index
    %c0_48 = arith.constant 0 : index
    %c0_49 = arith.constant 0 : index
    %156 = vector.load %arg3[%c1_47, %c0_48, %c0_49] : memref<4x128x384xf32, #tpu.memory_space<vmem>>, vector<1x128x384xf32>
    %157 = vector.shape_cast %156 : vector<1x128x384xf32> to vector<128x384xf32>
    %cst_50 = arith.constant dense<0.000000e+00> : vector<64x384xf32>
    %158 = tpu.matmul %155, %157, %cst_50 {dimension_numbers = #tpu.dot_dimension_numbers<[1], [0], [0], [1], [0, 0, 1, 1], [], []>} : vector<64x128xf32>, vector<128x384xf32>, vector<64x384xf32> -> vector<64x384xf32>
    %159 = vector.extract_strided_slice %158 {offsets = [0, 0], sizes = [64, 128], strides = [1, 1]} : vector<64x384xf32> to vector<64x128xf32>
    %160 = vector.extract_strided_slice %159 {offsets = [62, 0], sizes = [2, 128], strides = [1, 1]} : vector<64x128xf32> to vector<2x128xf32>
    %161 = vector.extract_strided_slice %159 {offsets = [0, 0], sizes = [62, 128], strides = [1, 1]} : vector<64x128xf32> to vector<62x128xf32>
    %162 = tpu.concatenate %160, %161 in 0 : vector<2x128xf32>, vector<62x128xf32> -> vector<64x128xf32>
    %c2_i32_51 = arith.constant 2 : i32
    %163 = vector.broadcast %c2_i32_51 : i32 to vector<64x128xi32>
    %164 = arith.cmpi sge, %17, %163 : vector<64x128xi32>
    %cst_52 = arith.constant 0.000000e+00 : f32
    %165 = vector.broadcast %cst_52 : f32 to vector<64x128xf32>
    %166 = arith.select %164, %162, %165 : vector<64x128xi1>, vector<64x128xf32>
    %167 = vector.extract_strided_slice %158 {offsets = [0, 128], sizes = [64, 128], strides = [1, 1]} : vector<64x384xf32> to vector<64x128xf32>
    %168 = arith.addf %166, %167 : vector<64x128xf32>
    %169 = vector.extract_strided_slice %158 {offsets = [0, 256], sizes = [64, 128], strides = [1, 1]} : vector<64x384xf32> to vector<64x128xf32>
    %170 = vector.extract_strided_slice %169 {offsets = [2, 0], sizes = [62, 128], strides = [1, 1]} : vector<64x128xf32> to vector<62x128xf32>
    %171 = vector.extract_strided_slice %169 {offsets = [0, 0], sizes = [2, 128], strides = [1, 1]} : vector<64x128xf32> to vector<2x128xf32>
    %172 = tpu.concatenate %170, %171 in 0 : vector<62x128xf32>, vector<2x128xf32> -> vector<64x128xf32>
    %c30_i32_53 = arith.constant 30 : i32
    %173 = vector.broadcast %c30_i32_53 : i32 to vector<64x128xi32>
    %174 = arith.cmpi slt, %17, %173 : vector<64x128xi32>
    %cst_54 = arith.constant 0.000000e+00 : f32
    %175 = vector.broadcast %cst_54 : f32 to vector<64x128xf32>
    %176 = arith.select %174, %172, %175 : vector<64x128xi1>, vector<64x128xf32>
    %177 = arith.addf %168, %176 : vector<64x128xf32>
    %c5 = arith.constant 5 : index
    %c0_55 = arith.constant 0 : index
    %178 = vector.load %arg8[%c5, %c0_55] : memref<16x128xf32, #tpu.memory_space<vmem>>, vector<1x128xf32>
    %179 = vector.broadcast %178 : vector<1x128xf32> to vector<64x128xf32>
    %180 = arith.addf %177, %179 : vector<64x128xf32>
    %cst_56 = arith.constant 0.000000e+00 : f32
    %181 = vector.broadcast %cst_56 : f32 to vector<64x128xf32>
    %182 = arith.maximumf %180, %181 : vector<64x128xf32>
    %183 = arith.addf %155, %182 : vector<64x128xf32>
    %c2_57 = arith.constant 2 : index
    %c0_58 = arith.constant 0 : index
    %c0_59 = arith.constant 0 : index
    %184 = vector.load %arg3[%c2_57, %c0_58, %c0_59] : memref<4x128x384xf32, #tpu.memory_space<vmem>>, vector<1x128x384xf32>
    %185 = vector.shape_cast %184 : vector<1x128x384xf32> to vector<128x384xf32>
    %cst_60 = arith.constant dense<0.000000e+00> : vector<64x384xf32>
    %186 = tpu.matmul %182, %185, %cst_60 {dimension_numbers = #tpu.dot_dimension_numbers<[1], [0], [0], [1], [0, 0, 1, 1], [], []>} : vector<64x128xf32>, vector<128x384xf32>, vector<64x384xf32> -> vector<64x384xf32>
    %187 = vector.extract_strided_slice %186 {offsets = [0, 0], sizes = [64, 128], strides = [1, 1]} : vector<64x384xf32> to vector<64x128xf32>
    %188 = vector.extract_strided_slice %187 {offsets = [60, 0], sizes = [4, 128], strides = [1, 1]} : vector<64x128xf32> to vector<4x128xf32>
    %189 = vector.extract_strided_slice %187 {offsets = [0, 0], sizes = [60, 128], strides = [1, 1]} : vector<64x128xf32> to vector<60x128xf32>
    %190 = tpu.concatenate %188, %189 in 0 : vector<4x128xf32>, vector<60x128xf32> -> vector<64x128xf32>
    %c4_i32_61 = arith.constant 4 : i32
    %191 = vector.broadcast %c4_i32_61 : i32 to vector<64x128xi32>
    %192 = arith.cmpi sge, %17, %191 : vector<64x128xi32>
    %cst_62 = arith.constant 0.000000e+00 : f32
    %193 = vector.broadcast %cst_62 : f32 to vector<64x128xf32>
    %194 = arith.select %192, %190, %193 : vector<64x128xi1>, vector<64x128xf32>
    %195 = vector.extract_strided_slice %186 {offsets = [0, 128], sizes = [64, 128], strides = [1, 1]} : vector<64x384xf32> to vector<64x128xf32>
    %196 = arith.addf %194, %195 : vector<64x128xf32>
    %197 = vector.extract_strided_slice %186 {offsets = [0, 256], sizes = [64, 128], strides = [1, 1]} : vector<64x384xf32> to vector<64x128xf32>
    %198 = vector.extract_strided_slice %197 {offsets = [4, 0], sizes = [60, 128], strides = [1, 1]} : vector<64x128xf32> to vector<60x128xf32>
    %199 = vector.extract_strided_slice %197 {offsets = [0, 0], sizes = [4, 128], strides = [1, 1]} : vector<64x128xf32> to vector<4x128xf32>
    %200 = tpu.concatenate %198, %199 in 0 : vector<60x128xf32>, vector<4x128xf32> -> vector<64x128xf32>
    %c28_i32_63 = arith.constant 28 : i32
    %201 = vector.broadcast %c28_i32_63 : i32 to vector<64x128xi32>
    %202 = arith.cmpi slt, %17, %201 : vector<64x128xi32>
    %cst_64 = arith.constant 0.000000e+00 : f32
    %203 = vector.broadcast %cst_64 : f32 to vector<64x128xf32>
    %204 = arith.select %202, %200, %203 : vector<64x128xi1>, vector<64x128xf32>
    %205 = arith.addf %196, %204 : vector<64x128xf32>
    %c6 = arith.constant 6 : index
    %c0_65 = arith.constant 0 : index
    %206 = vector.load %arg8[%c6, %c0_65] : memref<16x128xf32, #tpu.memory_space<vmem>>, vector<1x128xf32>
    %207 = vector.broadcast %206 : vector<1x128xf32> to vector<64x128xf32>
    %208 = arith.addf %205, %207 : vector<64x128xf32>
    %cst_66 = arith.constant 0.000000e+00 : f32
    %209 = vector.broadcast %cst_66 : f32 to vector<64x128xf32>
    %210 = arith.maximumf %208, %209 : vector<64x128xf32>
    %211 = arith.addf %183, %210 : vector<64x128xf32>
    %c3_67 = arith.constant 3 : index
    %c0_68 = arith.constant 0 : index
    %c0_69 = arith.constant 0 : index
    %212 = vector.load %arg3[%c3_67, %c0_68, %c0_69] : memref<4x128x384xf32, #tpu.memory_space<vmem>>, vector<1x128x384xf32>
    %213 = vector.shape_cast %212 : vector<1x128x384xf32> to vector<128x384xf32>
    %cst_70 = arith.constant dense<0.000000e+00> : vector<64x384xf32>
    %214 = tpu.matmul %210, %213, %cst_70 {dimension_numbers = #tpu.dot_dimension_numbers<[1], [0], [0], [1], [0, 0, 1, 1], [], []>} : vector<64x128xf32>, vector<128x384xf32>, vector<64x384xf32> -> vector<64x384xf32>
    %215 = vector.extract_strided_slice %214 {offsets = [0, 0], sizes = [64, 128], strides = [1, 1]} : vector<64x384xf32> to vector<64x128xf32>
    %216 = vector.extract_strided_slice %215 {offsets = [56, 0], sizes = [8, 128], strides = [1, 1]} : vector<64x128xf32> to vector<8x128xf32>
    %217 = vector.extract_strided_slice %215 {offsets = [0, 0], sizes = [56, 128], strides = [1, 1]} : vector<64x128xf32> to vector<56x128xf32>
    %218 = tpu.concatenate %216, %217 in 0 : vector<8x128xf32>, vector<56x128xf32> -> vector<64x128xf32>
    %c8_i32_71 = arith.constant 8 : i32
    %219 = vector.broadcast %c8_i32_71 : i32 to vector<64x128xi32>
    %220 = arith.cmpi sge, %17, %219 : vector<64x128xi32>
    %cst_72 = arith.constant 0.000000e+00 : f32
    %221 = vector.broadcast %cst_72 : f32 to vector<64x128xf32>
    %222 = arith.select %220, %218, %221 : vector<64x128xi1>, vector<64x128xf32>
    %223 = vector.extract_strided_slice %214 {offsets = [0, 128], sizes = [64, 128], strides = [1, 1]} : vector<64x384xf32> to vector<64x128xf32>
    %224 = arith.addf %222, %223 : vector<64x128xf32>
    %225 = vector.extract_strided_slice %214 {offsets = [0, 256], sizes = [64, 128], strides = [1, 1]} : vector<64x384xf32> to vector<64x128xf32>
    %226 = vector.extract_strided_slice %225 {offsets = [8, 0], sizes = [56, 128], strides = [1, 1]} : vector<64x128xf32> to vector<56x128xf32>
    %227 = vector.extract_strided_slice %225 {offsets = [0, 0], sizes = [8, 128], strides = [1, 1]} : vector<64x128xf32> to vector<8x128xf32>
    %228 = tpu.concatenate %226, %227 in 0 : vector<56x128xf32>, vector<8x128xf32> -> vector<64x128xf32>
    %c24_i32_73 = arith.constant 24 : i32
    %229 = vector.broadcast %c24_i32_73 : i32 to vector<64x128xi32>
    %230 = arith.cmpi slt, %17, %229 : vector<64x128xi32>
    %cst_74 = arith.constant 0.000000e+00 : f32
    %231 = vector.broadcast %cst_74 : f32 to vector<64x128xf32>
    %232 = arith.select %230, %228, %231 : vector<64x128xi1>, vector<64x128xf32>
    %233 = arith.addf %224, %232 : vector<64x128xf32>
    %c7 = arith.constant 7 : index
    %c0_75 = arith.constant 0 : index
    %234 = vector.load %arg8[%c7, %c0_75] : memref<16x128xf32, #tpu.memory_space<vmem>>, vector<1x128xf32>
    %235 = vector.broadcast %234 : vector<1x128xf32> to vector<64x128xf32>
    %236 = arith.addf %233, %235 : vector<64x128xf32>
    %cst_76 = arith.constant 0.000000e+00 : f32
    %237 = vector.broadcast %cst_76 : f32 to vector<64x128xf32>
    %238 = arith.maximumf %236, %237 : vector<64x128xf32>
    %239 = arith.addf %211, %238 : vector<64x128xf32>
    %c0_77 = arith.constant 0 : index
    %c0_78 = arith.constant 0 : index
    %c0_79 = arith.constant 0 : index
    %240 = vector.load %arg4[%c0_77, %c0_78, %c0_79] : memref<4x128x128xf32, #tpu.memory_space<vmem>>, vector<1x128x128xf32>
    %241 = vector.shape_cast %240 : vector<1x128x128xf32> to vector<128x128xf32>
    %cst_80 = arith.constant dense<0.000000e+00> : vector<64x128xf32>
    %242 = tpu.matmul %0, %241, %cst_80 {dimension_numbers = #tpu.dot_dimension_numbers<[1], [0], [0], [1], [0, 0, 1, 1], [], []>} : vector<64x128xf32>, vector<128x128xf32>, vector<64x128xf32> -> vector<64x128xf32>
    %c8 = arith.constant 8 : index
    %c0_81 = arith.constant 0 : index
    %243 = vector.load %arg8[%c8, %c0_81] : memref<16x128xf32, #tpu.memory_space<vmem>>, vector<1x128xf32>
    %244 = vector.broadcast %243 : vector<1x128xf32> to vector<64x128xf32>
    %245 = arith.addf %242, %244 : vector<64x128xf32>
    %cst_82 = arith.constant 0.000000e+00 : f32
    %246 = vector.broadcast %cst_82 : f32 to vector<64x128xf32>
    %247 = arith.maximumf %245, %246 : vector<64x128xf32>
    %c1_83 = arith.constant 1 : index
    %c0_84 = arith.constant 0 : index
    %c0_85 = arith.constant 0 : index
    %248 = vector.load %arg4[%c1_83, %c0_84, %c0_85] : memref<4x128x128xf32, #tpu.memory_space<vmem>>, vector<1x128x128xf32>
    %249 = vector.shape_cast %248 : vector<1x128x128xf32> to vector<128x128xf32>
    %cst_86 = arith.constant dense<0.000000e+00> : vector<64x128xf32>
    %250 = tpu.matmul %247, %249, %cst_86 {dimension_numbers = #tpu.dot_dimension_numbers<[1], [0], [0], [1], [0, 0, 1, 1], [], []>} : vector<64x128xf32>, vector<128x128xf32>, vector<64x128xf32> -> vector<64x128xf32>
    %c9 = arith.constant 9 : index
    %c0_87 = arith.constant 0 : index
    %251 = vector.load %arg8[%c9, %c0_87] : memref<16x128xf32, #tpu.memory_space<vmem>>, vector<1x128xf32>
    %252 = vector.broadcast %251 : vector<1x128xf32> to vector<64x128xf32>
    %253 = arith.addf %250, %252 : vector<64x128xf32>
    %cst_88 = arith.constant 0.000000e+00 : f32
    %254 = vector.broadcast %cst_88 : f32 to vector<64x128xf32>
    %255 = arith.maximumf %253, %254 : vector<64x128xf32>
    %256 = arith.addf %247, %255 : vector<64x128xf32>
    %c2_89 = arith.constant 2 : index
    %c0_90 = arith.constant 0 : index
    %c0_91 = arith.constant 0 : index
    %257 = vector.load %arg4[%c2_89, %c0_90, %c0_91] : memref<4x128x128xf32, #tpu.memory_space<vmem>>, vector<1x128x128xf32>
    %258 = vector.shape_cast %257 : vector<1x128x128xf32> to vector<128x128xf32>
    %cst_92 = arith.constant dense<0.000000e+00> : vector<64x128xf32>
    %259 = tpu.matmul %255, %258, %cst_92 {dimension_numbers = #tpu.dot_dimension_numbers<[1], [0], [0], [1], [0, 0, 1, 1], [], []>} : vector<64x128xf32>, vector<128x128xf32>, vector<64x128xf32> -> vector<64x128xf32>
    %c10 = arith.constant 10 : index
    %c0_93 = arith.constant 0 : index
    %260 = vector.load %arg8[%c10, %c0_93] : memref<16x128xf32, #tpu.memory_space<vmem>>, vector<1x128xf32>
    %261 = vector.broadcast %260 : vector<1x128xf32> to vector<64x128xf32>
    %262 = arith.addf %259, %261 : vector<64x128xf32>
    %cst_94 = arith.constant 0.000000e+00 : f32
    %263 = vector.broadcast %cst_94 : f32 to vector<64x128xf32>
    %264 = arith.maximumf %262, %263 : vector<64x128xf32>
    %265 = arith.addf %256, %264 : vector<64x128xf32>
    %c3_95 = arith.constant 3 : index
    %c0_96 = arith.constant 0 : index
    %c0_97 = arith.constant 0 : index
    %266 = vector.load %arg4[%c3_95, %c0_96, %c0_97] : memref<4x128x128xf32, #tpu.memory_space<vmem>>, vector<1x128x128xf32>
    %267 = vector.shape_cast %266 : vector<1x128x128xf32> to vector<128x128xf32>
    %cst_98 = arith.constant dense<0.000000e+00> : vector<64x128xf32>
    %268 = tpu.matmul %264, %267, %cst_98 {dimension_numbers = #tpu.dot_dimension_numbers<[1], [0], [0], [1], [0, 0, 1, 1], [], []>} : vector<64x128xf32>, vector<128x128xf32>, vector<64x128xf32> -> vector<64x128xf32>
    %c11 = arith.constant 11 : index
    %c0_99 = arith.constant 0 : index
    %269 = vector.load %arg8[%c11, %c0_99] : memref<16x128xf32, #tpu.memory_space<vmem>>, vector<1x128xf32>
    %270 = vector.broadcast %269 : vector<1x128xf32> to vector<64x128xf32>
    %271 = arith.addf %268, %270 : vector<64x128xf32>
    %cst_100 = arith.constant 0.000000e+00 : f32
    %272 = vector.broadcast %cst_100 : f32 to vector<64x128xf32>
    %273 = arith.maximumf %271, %272 : vector<64x128xf32>
    %274 = arith.addf %265, %273 : vector<64x128xf32>
    %c0_101 = arith.constant 0 : index
    %c0_102 = arith.constant 0 : index
    %275 = vector.load %arg6[%c0_101, %c0_102] : memref<128x128xf32, #tpu.memory_space<vmem>>, vector<128x128xf32>
    %cst_103 = arith.constant dense<0.000000e+00> : vector<64x128xf32>
    %276 = tpu.matmul %0, %275, %cst_103 {dimension_numbers = #tpu.dot_dimension_numbers<[1], [0], [0], [1], [0, 0, 1, 1], [], []>} : vector<64x128xf32>, vector<128x128xf32>, vector<64x128xf32> -> vector<64x128xf32>
    %c13 = arith.constant 13 : index
    %c0_104 = arith.constant 0 : index
    %277 = vector.load %arg8[%c13, %c0_104] : memref<16x128xf32, #tpu.memory_space<vmem>>, vector<1x128xf32>
    %278 = vector.broadcast %277 : vector<1x128xf32> to vector<64x128xf32>
    %279 = arith.addf %276, %278 : vector<64x128xf32>
    %cst_105 = arith.constant 0.000000e+00 : f32
    %280 = vector.broadcast %cst_105 : f32 to vector<64x128xf32>
    %281 = arith.maximumf %279, %280 : vector<64x128xf32>
    %282 = vector.extract_strided_slice %0 {offsets = [0, 0], sizes = [32, 128], strides = [1, 1]} : vector<64x128xf32> to vector<32x128xf32>
    %cst_106 = arith.constant dense<0.000000e+00> : vector<128xf32>
    %283 = vector.multi_reduction <add>, %282, %cst_106 [0] : vector<32x128xf32> to vector<128xf32>
    %284 = vector.shape_cast %283 : vector<128xf32> to vector<1x128xf32>
    %cst_107 = arith.constant 3.200000e+01 : f32
    %285 = vector.broadcast %cst_107 : f32 to vector<1x128xf32>
    %286 = arith.divf %284, %285 : vector<1x128xf32>
    %287 = vector.shape_cast %286 : vector<1x128xf32> to vector<1x128xf32>
    %288 = vector.broadcast %287 : vector<1x128xf32> to vector<32x128xf32>
    %289 = vector.extract_strided_slice %0 {offsets = [32, 0], sizes = [32, 128], strides = [1, 1]} : vector<64x128xf32> to vector<32x128xf32>
    %cst_108 = arith.constant dense<0.000000e+00> : vector<128xf32>
    %290 = vector.multi_reduction <add>, %289, %cst_108 [0] : vector<32x128xf32> to vector<128xf32>
    %291 = vector.shape_cast %290 : vector<128xf32> to vector<1x128xf32>
    %cst_109 = arith.constant 3.200000e+01 : f32
    %292 = vector.broadcast %cst_109 : f32 to vector<1x128xf32>
    %293 = arith.divf %291, %292 : vector<1x128xf32>
    %294 = vector.shape_cast %293 : vector<1x128xf32> to vector<1x128xf32>
    %295 = vector.broadcast %294 : vector<1x128xf32> to vector<32x128xf32>
    %296 = tpu.concatenate %288, %295 in 0 : vector<32x128xf32>, vector<32x128xf32> -> vector<64x128xf32>
    %c0_110 = arith.constant 0 : index
    %c0_111 = arith.constant 0 : index
    %297 = vector.load %arg7[%c0_110, %c0_111] : memref<128x128xf32, #tpu.memory_space<vmem>>, vector<128x128xf32>
    %cst_112 = arith.constant dense<0.000000e+00> : vector<64x128xf32>
    %298 = tpu.matmul %296, %297, %cst_112 {dimension_numbers = #tpu.dot_dimension_numbers<[1], [0], [0], [1], [0, 0, 1, 1], [], []>} : vector<64x128xf32>, vector<128x128xf32>, vector<64x128xf32> -> vector<64x128xf32>
    %c14 = arith.constant 14 : index
    %c0_113 = arith.constant 0 : index
    %299 = vector.load %arg8[%c14, %c0_113] : memref<16x128xf32, #tpu.memory_space<vmem>>, vector<1x128xf32>
    %300 = vector.broadcast %299 : vector<1x128xf32> to vector<64x128xf32>
    %301 = arith.addf %298, %300 : vector<64x128xf32>
    %cst_114 = arith.constant 0.000000e+00 : f32
    %302 = vector.broadcast %cst_114 : f32 to vector<64x128xf32>
    %303 = arith.maximumf %301, %302 : vector<64x128xf32>
    %304 = tpu.concatenate %128, %239, %274, %281, %303 in 1 : vector<64x128xf32>, vector<64x128xf32>, vector<64x128xf32>, vector<64x128xf32>, vector<64x128xf32> -> vector<64x640xf32>
    %c0_115 = arith.constant 0 : index
    %c0_116 = arith.constant 0 : index
    %305 = vector.load %arg5[%c0_115, %c0_116] : memref<640x128xf32, #tpu.memory_space<vmem>>, vector<640x128xf32>
    %cst_117 = arith.constant dense<0.000000e+00> : vector<64x128xf32>
    %306 = tpu.matmul %304, %305, %cst_117 {dimension_numbers = #tpu.dot_dimension_numbers<[1], [0], [0], [1], [0, 0, 1, 1], [], []>} : vector<64x640xf32>, vector<640x128xf32>, vector<64x128xf32> -> vector<64x128xf32>
    %c12 = arith.constant 12 : index
    %c0_118 = arith.constant 0 : index
    %307 = vector.load %arg8[%c12, %c0_118] : memref<16x128xf32, #tpu.memory_space<vmem>>, vector<1x128xf32>
    %308 = vector.broadcast %307 : vector<1x128xf32> to vector<64x128xf32>
    %309 = arith.addf %306, %308 : vector<64x128xf32>
    %c15 = arith.constant 15 : index
    %c0_119 = arith.constant 0 : index
    %310 = vector.load %arg8[%c15, %c0_119] : memref<16x128xf32, #tpu.memory_space<vmem>>, vector<1x128xf32>
    %311 = vector.broadcast %310 : vector<1x128xf32> to vector<64x128xf32>
    %312 = arith.mulf %311, %309 : vector<64x128xf32>
    %cst_120 = arith.constant 1.000000e+00 : f32
    %313 = vector.broadcast %cst_120 : f32 to vector<1x128xf32>
    %314 = arith.subf %313, %310 : vector<1x128xf32>
    %315 = vector.broadcast %314 : vector<1x128xf32> to vector<64x128xf32>
    %316 = arith.mulf %315, %0 : vector<64x128xf32>
    %317 = arith.addf %312, %316 : vector<64x128xf32>
    %c0_121 = arith.constant 0 : index
    %c0_122 = arith.constant 0 : index
    %318 = vector.load %arg9[%c0_121, %c0_122] : memref<64x128xf32, #tpu.memory_space<vmem>>, vector<64x128xf32>
    tpu.vector_store %arg9[%c0_121, %c0_122], %317 {strides = array<i32>} : memref<64x128xf32, #tpu.memory_space<vmem>>, vector<64x128xf32>,
    return
  }
  func.func @transform_0(%arg0: i32) -> (i32, i32) {
    %c0_i32 = arith.constant 0 : i32
    %c0_i32_0 = arith.constant 0 : i32
    %c0_i32_1 = arith.constant 0 : i32
    return %c0_i32, %c0_i32_0 : i32, i32
  }
  func.func @transform_1(%arg0: i32) -> (i32, i32, i32) {
    %c0_i32 = arith.constant 0 : i32
    %c0_i32_0 = arith.constant 0 : i32
    %c0_i32_1 = arith.constant 0 : i32
    %c0_i32_2 = arith.constant 0 : i32
    return %c0_i32, %c0_i32_0, %c0_i32_1 : i32, i32, i32
  }
  func.func @transform_2(%arg0: i32) -> (i32, i32, i32) {
    %c0_i32 = arith.constant 0 : i32
    %c0_i32_0 = arith.constant 0 : i32
    %c0_i32_1 = arith.constant 0 : i32
    %c0_i32_2 = arith.constant 0 : i32
    return %c0_i32, %c0_i32_0, %c0_i32_1 : i32, i32, i32
  }
  func.func @transform_3(%arg0: i32) -> (i32, i32, i32) {
    %c0_i32 = arith.constant 0 : i32
    %c0_i32_0 = arith.constant 0 : i32
    %c0_i32_1 = arith.constant 0 : i32
    %c0_i32_2 = arith.constant 0 : i32
    return %c0_i32, %c0_i32_0, %c0_i32_1 : i32, i32, i32
  }
  func.func @transform_4(%arg0: i32) -> (i32, i32) {
    %c0_i32 = arith.constant 0 : i32
    %c0_i32_0 = arith.constant 0 : i32
    %c0_i32_1 = arith.constant 0 : i32
    return %c0_i32, %c0_i32_0 : i32, i32
  }
  func.func @transform_5(%arg0: i32) -> (i32, i32) {
    %c0_i32 = arith.constant 0 : i32
    %c0_i32_0 = arith.constant 0 : i32
    %c0_i32_1 = arith.constant 0 : i32
    return %c0_i32, %c0_i32_0 : i32, i32
  }
  func.func @transform_6(%arg0: i32) -> (i32, i32) {
    %c0_i32 = arith.constant 0 : i32
    %c0_i32_0 = arith.constant 0 : i32
    %c0_i32_1 = arith.constant 0 : i32
    return %c0_i32, %c0_i32_0 : i32, i32
  }
  func.func @transform_7(%arg0: i32) -> (i32, i32) {
    %c0_i32 = arith.constant 0 : i32
    %c0_i32_0 = arith.constant 0 : i32
    %c0_i32_1 = arith.constant 0 : i32
    return %c0_i32, %c0_i32_0 : i32, i32
  }
  func.func @transform_8(%arg0: i32) -> (i32, i32) {
    %c0_i32 = arith.constant 0 : i32
    %c0_i32_0 = arith.constant 0 : i32
    %c0_i32_1 = arith.constant 0 : i32
    return %c0_i32, %c0_i32_0 : i32, i32
  }
}

</mosaic_0001>

<bundles_post_ra>
// kernel: tpu_custom_call.1
= control target key start
LH: loop header
LB: loop body
LE: loop exit
PB: predicated region body
PF: predicated region fallthrough
CT: control target
= control target key end

     0   :  { %13 = vsyncpa [#allocation3], 0  ;;  %s7131_s0 = inlined_call_operand.hbm [shape: f32[64,128], index: 0, kind: input, shape index: {}]   ;;  %s7132_s1 = inlined_call_operand.hbm [shape: f32[4,128,384], index: 1, kind: input, shape index: {}]   ;;  %s7133_s2 = inlined_call_operand.hbm [shape: f32[4,128,384], index: 2, kind: input, shape index: {}]   ;;  %s7134_s3 = inlined_call_operand.hbm [shape: f32[4,128,128], index: 3, kind: input, shape index: {}]   ;;  %s7135_s4 = inlined_call_operand.hbm [shape: f32[640,128], index: 4, kind: input, shape index: {}]   ;;  %s7136_s5 = inlined_call_operand.hbm [shape: f32[128,128], index: 5, kind: input, shape index: {}]   ;;  %s7137_s6 = inlined_call_operand.hbm [shape: f32[128,128], index: 6, kind: input, shape index: {}]   ;;  %s7138_s7 = inlined_call_operand.hbm [shape: f32[16,128], index: 7, kind: input, shape index: {}]   ;;  %s7139_s8 = inlined_call_operand.hbm [shape: f32[64,128], index: 8, kind: output, shape index: {}]  }
   0x1   :  { %14 = vsyncpa [#allocation6], 0 }
   0x2   :  { %15 = vsyncpa [#allocation9], 0 }
   0x3   :  { %16 = vsyncpa [#allocation12], 0 }
   0x4   :  { %17 = vsyncpa [#allocation15], 0 }
   0x5   :  { %18 = vsyncpa [#allocation4], 0  ;;  %s6047_s27 = smov [#allocation5]  }
   0x6   :  { %s36_s28 = sshll.u32 %s6047_s27, 4  ;;  %s37_s28 = int_to_ptr.vmem [resolvable:$true] %s36_s28 }
   0x7   :  { %s5863_s29 = scalar_lea.vmem %s37_s28, 24576  ;;  %p5868_p1 = scmp.lt.s32.totalorder %s37_s28, %s37_s28 }
   0x8   :  { %p5864_p0 = scmp.ne.s32.totalorder %s37_s28, %s5863_s29  ;;  %p5869_p2 = scmp.lt.s32.totalorder %s5863_s29, %s5863_s29 }
   0xa   :  { %p5870_p3 = por %p5869_p2, %p5868_p1 }
   0xc   :  { %p5871_p4 = pnand %p5870_p3, %p5864_p0 }
   0xe   :  { %5874 = shalt.err (!%p5871_p4)
}
   0xf   :  { %s6048_s30 = smov 384   ;;  %s6049_s9 = smov 24  }
  0x10   :  { %42 = dma.hbm_to_vmem [thread:$0]  %s7132_s1, 24576, %s37_s28, [#allocation6], %s6048_s30, %s6048_s30, %s6049_s9  }
  0x11   :  { %s6050_s12 = smov [#allocation8]   ;;  %s6051_s14 = smov [#allocation11]  }
  0x12   :  { %s60_s13 = sshll.u32 %s6050_s12, 4  ;;  %s84_s15 = sshll.u32 %s6051_s14, 4  ;;  %s61_s13 = int_to_ptr.vmem [resolvable:$true] %s60_s13  ;;  %s85_s15 = int_to_ptr.vmem [resolvable:$true] %s84_s15 }
  0x13   :  { %s5883_s16 = scalar_lea.vmem %s61_s13, 8192  ;;  %p5888_p6 = scmp.lt.s32.totalorder %s61_s13, %s61_s13 }
  0x14   :  { %p5884_p5 = scmp.ne.s32.totalorder %s61_s13, %s5883_s16  ;;  %p5889_p7 = scmp.lt.s32.totalorder %s5883_s16, %s5883_s16 }
  0x16   :  { %p5890_p8 = por %p5889_p7, %p5888_p6 }
  0x18   :  { %p5891_p9 = pnand %p5890_p8, %p5884_p5 }
  0x1a   :  { %5894 = shalt.err (!%p5891_p9)
}
  0x1b   :  { %s6052_s17 = smov 128   ;;  %s6053_s18 = smov 8  }
  0x1c   :  { %66 = dma.hbm_to_vmem [thread:$0]  %s7134_s3, 8192, %s61_s13, [#allocation9], %s6052_s17, %s6052_s17, %s6053_s18  }
  0x1d   :  { %s5903_s1 = scalar_lea.vmem %s85_s15, 2048  ;;  %p5908_p11 = scmp.lt.s32.totalorder %s85_s15, %s85_s15 }
  0x1e   :  { %p5904_p10 = scmp.ne.s32.totalorder %s85_s15, %s5903_s1  ;;  %p5909_p12 = scmp.lt.s32.totalorder %s5903_s1, %s5903_s1 }
  0x20   :  { %p5910_p13 = por %p5909_p12, %p5908_p11 }
  0x22   :  { %p5911_p0 = pnand %p5910_p13, %p5904_p10 }
  0x24   :  { %5914 = shalt.err (!%p5911_p0)
}
  0x25   :  { %90 = dma.hbm_to_vmem [thread:$0]  %s7136_s5, 2048, %s85_s15, [#allocation12], %s6052_s17, %s6052_s17, %s6053_s18  }
  0x26   :  { %s6054_s23 = smov [#allocation2]   ;;  %s6055_s25 = smov [#allocation7]  }
  0x27   :  { %s24_s24 = sshll.u32 %s6054_s23, 4  ;;  %s48_s3 = sshll.u32 %s6055_s25, 4  ;;  %s25_s24 = int_to_ptr.vmem [resolvable:$true] %s24_s24  ;;  %s49_s3 = int_to_ptr.vmem [resolvable:$true] %s48_s3 }
  0x28   :  { %s5923_s26 = scalar_lea.vmem %s25_s24, 1024  ;;  %p5928_p2 = scmp.lt.s32.totalorder %s25_s24, %s25_s24 }
  0x29   :  { %p5924_p1 = scmp.ne.s32.totalorder %s25_s24, %s5923_s26  ;;  %p5929_p3 = scmp.lt.s32.totalorder %s5923_s26, %s5923_s26 }
  0x2b   :  { %p5930_p4 = por %p5929_p3, %p5928_p2 }
  0x2d   :  { %p5931_p5 = pnand %p5930_p4, %p5924_p1 }
  0x2f   :  { %5934 = shalt.err (!%p5931_p5)
}
  0x30   :  { %30 = dma.hbm_to_vmem [thread:$0]  %s7131_s0, 1024, %s25_s24, [#allocation3], %s6052_s17, %s6052_s17, %s6053_s18  }
  0x31   :  { %s5943_s5 = scalar_lea.vmem %s49_s3, 24576  ;;  %p5948_p7 = scmp.lt.s32.totalorder %s49_s3, %s49_s3 }
  0x32   :  { %p5944_p6 = scmp.ne.s32.totalorder %s49_s3, %s5943_s5  ;;  %p5949_p8 = scmp.lt.s32.totalorder %s5943_s5, %s5943_s5 }
  0x34   :  { %p5950_p9 = por %p5949_p8, %p5948_p7 }
  0x36   :  { %p5951_p10 = pnand %p5950_p9, %p5944_p6 }
  0x38   :  { %5954 = shalt.err (!%p5951_p10)
}
  0x39   :  { %54 = dma.hbm_to_vmem [thread:$0]  %s7133_s2, 24576, %s49_s3, [#allocation6], %s6048_s30, %s6048_s30, %s6049_s9  }
  0x3a   :  { %s6056_s11 = smov [#allocation10]   ;;  %s6057_s13 = smov [#allocation13]  }
  0x3b   :  { %s72_s12 = sshll.u32 %s6056_s11, 4  ;;  %s96_s0 = sshll.u32 %s6057_s13, 4  ;;  %s73_s12 = int_to_ptr.vmem [resolvable:$true] %s72_s12  ;;  %s97_s0 = int_to_ptr.vmem [resolvable:$true] %s96_s0 }
  0x3c   :  { %s5963_s14 = scalar_lea.vmem %s73_s12, 10240  ;;  %p5968_p12 = scmp.lt.s32.totalorder %s73_s12, %s73_s12 }
  0x3d   :  { %p5964_p11 = scmp.ne.s32.totalorder %s73_s12, %s5963_s14  ;;  %p5969_p13 = scmp.lt.s32.totalorder %s5963_s14, %s5963_s14 }
  0x3f   :  { %p5970_p0 = por %p5969_p13, %p5968_p12 }
  0x41   :  { %p5971_p1 = pnand %p5970_p0, %p5964_p11 }
  0x43   :  { %5974 = shalt.err (!%p5971_p1)
}
  0x44   :  { %78 = dma.hbm_to_vmem [thread:$0]  %s7135_s4, 10240, %s73_s12, [#allocation9], %s6052_s17, %s6052_s17, %s6053_s18  }
  0x45   :  { %s5983_s2 = scalar_lea.vmem %s97_s0, 2048  ;;  %p5988_p3 = scmp.lt.s32.totalorder %s97_s0, %s97_s0 }
  0x46   :  { %p5984_p2 = scmp.ne.s32.totalorder %s97_s0, %s5983_s2  ;;  %p5989_p4 = scmp.lt.s32.totalorder %s5983_s2, %s5983_s2 }
  0x48   :  { %p5990_p5 = por %p5989_p4, %p5988_p3 }
  0x4a   :  { %p5991_p6 = pnand %p5990_p5, %p5984_p2 }
  0x4c   :  { %5994 = shalt.err (!%p5991_p6)
}
  0x4d   :  { %102 = dma.hbm_to_vmem [thread:$0]  %s7137_s6, 2048, %s97_s0, [#allocation12], %s6052_s17, %s6052_s17, %s6053_s18  }
  0x4e   :  { %s6058_s19 = smov [#allocation14]  }
  0x4f   :  { %s108_s20 = sshll.u32 %s6058_s19, 4  ;;  %s109_s20 = int_to_ptr.vmem [resolvable:$true] %s108_s20 }
  0x50   :  { %s6003_s1 = scalar_lea.vmem %s109_s20, 256  ;;  %p6008_p8 = scmp.lt.s32.totalorder %s109_s20, %s109_s20 }
  0x51   :  { %p6004_p7 = scmp.ne.s32.totalorder %s109_s20, %s6003_s1  ;;  %p6009_p9 = scmp.lt.s32.totalorder %s6003_s1, %s6003_s1 }
  0x53   :  { %p6010_p10 = por %p6009_p9, %p6008_p8 }
  0x55   :  { %p6011_p11 = pnand %p6010_p10, %p6004_p7 }
  0x57   :  { %6014 = shalt.err (!%p6011_p11)
}
  0x58   :  { %114 = dma.hbm_to_vmem [thread:$0]  %s7138_s7, 256, %s109_s20, [#allocation15], %s6052_s17, %s6052_s17, %s6053_s18  }
  0x59   :  { %6035 = dma.done.wait [#allocation3], 1024  }
  0x5a   :  { %6036 = vsyncadd [#allocation3], 4294966272 }
  0x5b   :  { %6037 = dma.done.wait [#allocation6], 49152  }
  0x5c   :  { %6038 = vsyncadd [#allocation6], 4294918144 }
  0x5d   :  { %6039 = dma.done.wait [#allocation9], 18432  }
  0x5e   :  { %6040 = vsyncadd [#allocation9], 4294948864 }
  0x5f   :  { %6041 = dma.done.wait [#allocation12], 4096  }
  0x60   :  { %6042 = vsyncadd [#allocation12], 4294963200 }
  0x61   :  { %6043 = dma.done.wait [#allocation15], 256  }
  0x62   :  { %6044 = vsyncadd [#allocation15], 4294967040  ;;  %v6059_v0 = vmov 0.0   ;;  %v298_v1 = vld [vmem:[#allocation5 + $0x170] sm:$0xff]  ;;  %v299_v2 = vld [vmem:[#allocation5 + $0x178] sm:$0xff]  ;;  %vm528_vm0 = vcmask 1040384  }
  0x63   :  { %364 = vmatprep.mubr.f32.mxu0 %v6059_v0  ;;  %v297_v3 = vld [vmem:[#allocation5 + $0x168] sm:$0xff]  ;;  %300 = vmatprep.subr.mxu0 %v298_v1  ;;  %v295_v4 = vld [vmem:[#allocation5 + $0x158] sm:$0xff]  ;;  %v296_v5 = vld [vmem:[#allocation5 + $0x160] sm:$0xff]  ;;  %vm584_vm1 = vcmask 1046528   ;;  %vm932_vm6 = vcmask 1041408   ;;  %vm988_vm7 = vcmask 1045504  }
  0x64   :  { %5125 = vmatprep.subr.mxu1 %v299_v2  ;;  %v294_v6 = vld [vmem:[#allocation5 + $0x150] sm:$0xff]  ;;  %301 = vmatpush1.msra.mxu0 %v297_v3  ;;  %v292_v7 = vld [vmem:[#allocation5 + $0x140] sm:$0xff]  ;;  %v293_v8 = vld [vmem:[#allocation5 + $0x148] sm:$0xff]  ;;  %vm1344_vm12 = vcmask 1043456   ;;  %s6060_s6 = smov [#allocation16]  }
  0x65   :  { %5126 = vmatpush3.msra.mxu1 %v299_v2  ;;  %302 = vmatprep.subr.mxu0 %v295_v4  ;;  %v291_v9 = vld [vmem:[#allocation5 + $0x138] sm:$0xff]  ;;  %v289_v10 = vld [vmem:[#allocation5 + $0x128] sm:$0xff]  ;;  %v290_v11 = vld [vmem:[#allocation5 + $0x130] sm:$0xff]  ;;  %s4622_s7 = sshll.u32 %s6060_s6, 4  ;;  %s4623_s7 = int_to_ptr.vmem [resolvable:$true] %s4622_s7 }
  0x66   :  { %5127 = vmatprep.subr.mxu1 %v296_v5  ;;  %303 = vmatpush1.msra.mxu0 %v294_v6  ;;  %v288_v12 = vld [vmem:[#allocation5 + $0x120] sm:$0xff]  ;;  %v286_v13 = vld [vmem:[#allocation5 + $0x110] sm:$0xff]  ;;  %v287_v14 = vld [vmem:[#allocation5 + $0x118] sm:$0xff]  ;;  %s6015_s22 = scalar_lea.vmem %s4623_s7, 1024  ;;  %p6020_p13 = scmp.lt.s32.totalorder %s4623_s7, %s4623_s7 }
  0x67   :  { %5128 = vmatpush3.msra.mxu1 %v296_v5  ;;  %304 = vmatprep.subr.mxu0 %v292_v7  ;;  %v285_v15 = vld [vmem:[#allocation5 + $0x108] sm:$0xff]  ;;  %v283_v16 = vld [vmem:[#allocation5 + $0xf8] sm:$0xff]  ;;  %v284_v17 = vld [vmem:[#allocation5 + $0x100] sm:$0xff]  ;;  %p6016_p12 = scmp.ne.s32.totalorder %s4623_s7, %s6015_s22  ;;  %p6021_p0 = scmp.lt.s32.totalorder %s6015_s22, %s6015_s22 }
  0x68   :  { %5129 = vmatprep.subr.mxu1 %v293_v8  ;;  %305 = vmatpush1.msra.mxu0 %v291_v9  ;;  %v282_v18 = vld [vmem:[#allocation5 + $0xf0] sm:$0xff]  ;;  %v280_v19 = vld [vmem:[#allocation5 + $0xe0] sm:$0xff]  ;;  %v281_v20 = vld [vmem:[#allocation5 + $0xe8] sm:$0xff] }
  0x69   :  { %5130 = vmatpush3.msra.mxu1 %v293_v8  ;;  %306 = vmatprep.subr.mxu0 %v289_v10  ;;  %v279_v21 = vld [vmem:[#allocation5 + $0xd8] sm:$0xff]  ;;  %v277_v22 = vld [vmem:[#allocation5 + $0xc8] sm:$0xff]  ;;  %v278_v23 = vld [vmem:[#allocation5 + $0xd0] sm:$0xff]  ;;  %p6022_p1 = por %p6021_p0, %p6020_p13 }
  0x6a   :  { %5131 = vmatprep.subr.mxu1 %v290_v11  ;;  %307 = vmatpush1.msra.mxu0 %v288_v12  ;;  %v276_v24 = vld [vmem:[#allocation5 + $0xc0] sm:$0xff]  ;;  %v274_v25 = vld [vmem:[#allocation5 + $0xb0] sm:$0xff]  ;;  %v275_v26 = vld [vmem:[#allocation5 + $0xb8] sm:$0xff] }
  0x6b   :  { %5132 = vmatpush3.msra.mxu1 %v290_v11  ;;  %308 = vmatprep.subr.mxu0 %v286_v13  ;;  %v273_v27 = vld [vmem:[#allocation5 + $0xa8] sm:$0xff]  ;;  %v271_v28 = vld [vmem:[#allocation5 + $0x98] sm:$0xff]  ;;  %v272_v29 = vld [vmem:[#allocation5 + $0xa0] sm:$0xff]  ;;  %p6023_p2 = pnand %p6022_p1, %p6016_p12 }
  0x6c   :  { %5133 = vmatprep.subr.mxu1 %v287_v14  ;;  %309 = vmatpush1.msra.mxu0 %v285_v15  ;;  %v270_v30 = vld [vmem:[#allocation5 + $0x90] sm:$0xff]  ;;  %v268_v31 = vld [vmem:[#allocation5 + $0x80] sm:$0xff]  ;;  %v269_v32 = vld [vmem:[#allocation5 + $0x88] sm:$0xff] }
  0x6d   :  { %5134 = vmatpush3.msra.mxu1 %v287_v14  ;;  %310 = vmatprep.subr.mxu0 %v283_v16  ;;  %v267_v33 = vld [vmem:[#allocation5 + $0x78] sm:$0xff]  ;;  %v265_v34 = vld [vmem:[#allocation5 + $0x68] sm:$0xff]  ;;  %v266_v35 = vld [vmem:[#allocation5 + $0x70] sm:$0xff] }
  0x6e   :  { %5135 = vmatprep.subr.mxu1 %v284_v17  ;;  %311 = vmatpush1.msra.mxu0 %v282_v18  ;;  %v264_v36 = vld [vmem:[#allocation5 + $0x60] sm:$0xff]  ;;  %v262_v37 = vld [vmem:[#allocation5 + $0x50] sm:$0xff]  ;;  %v263_v38 = vld [vmem:[#allocation5 + $0x58] sm:$0xff] }
  0x6f   :  { %5136 = vmatpush3.msra.mxu1 %v284_v17  ;;  %312 = vmatprep.subr.mxu0 %v280_v19  ;;  %v261_v39 = vld [vmem:[#allocation5 + $0x48] sm:$0xff]  ;;  %v259_v40 = vld [vmem:[#allocation5 + $0x38] sm:$0xff]  ;;  %v260_v41 = vld [vmem:[#allocation5 + $0x40] sm:$0xff] }
  0x70   :  { %5137 = vmatprep.subr.mxu1 %v281_v20  ;;  %313 = vmatpush1.msra.mxu0 %v279_v21  ;;  %v258_v42 = vld [vmem:[#allocation5 + $0x30] sm:$0xff]  ;;  %v256_v43 = vld [vmem:[#allocation5 + $0x20] sm:$0xff]  ;;  %v257_v44 = vld [vmem:[#allocation5 + $0x28] sm:$0xff] }
  0x71   :  { %5138 = vmatpush3.msra.mxu1 %v281_v20  ;;  %314 = vmatprep.subr.mxu0 %v277_v22  ;;  %v255_v45 = vld [vmem:[#allocation5 + $0x18] sm:$0xff]  ;;  %v253_v46 = vld [vmem:[#allocation5 + $0x8] sm:$0xff]  ;;  %v254_v47 = vld [vmem:[#allocation5 + $0x10] sm:$0xff] }
  0x72   :  { %5139 = vmatprep.subr.mxu1 %v278_v23  ;;  %315 = vmatpush1.msra.mxu0 %v276_v24  ;;  %v252_v48 = vld [vmem:[#allocation5] sm:$0xff]  ;;  %v140_v50 = vld [vmem:[#allocation2 + $0x8] sm:$0xff]  ;;  %v141_v51 = vld [vmem:[#allocation2 + $0x10] sm:$0xff] }
  0x73   :  { %5140 = vmatpush3.msra.mxu1 %v278_v23  ;;  %316 = vmatprep.subr.mxu0 %v274_v25  ;;  %v139_v49 = vld [vmem:[#allocation2] sm:$0xff]  ;;  %v142_v52 = vld [vmem:[#allocation2 + $0x18] sm:$0xff]  ;;  %v144_v54 = vld [vmem:[#allocation2 + $0x28] sm:$0xff] }
  0x74   :  { %5141 = vmatprep.subr.mxu1 %v275_v26  ;;  %317 = vmatpush1.msra.mxu0 %v273_v27  ;;  %v143_v53 = vld [vmem:[#allocation2 + $0x20] sm:$0xff]  ;;  %v145_v55 = vld [vmem:[#allocation2 + $0x30] sm:$0xff]  ;;  %v146_v56 = vld [vmem:[#allocation2 + $0x38] sm:$0xff] }
  0x75   :  { %5142 = vmatpush3.msra.mxu1 %v275_v26  ;;  %318 = vmatprep.subr.mxu0 %v271_v28  ;;  %v702_v57 = vld [vmem:[#allocation5 + $0x2f0] sm:$0xff]  ;;  %v701_v58 = vld [vmem:[#allocation5 + $0x2e8] sm:$0xff]  ;;  %v703_v59 = vld [vmem:[#allocation5 + $0x2f8] sm:$0xff] }
  0x76   :  { %5143 = vmatprep.subr.mxu1 %v272_v29  ;;  %319 = vmatpush1.msra.mxu0 %v270_v30  ;;  %v699_v60 = vld [vmem:[#allocation5 + $0x2d8] sm:$0xff]  ;;  %v698_v61 = vld [vmem:[#allocation5 + $0x2d0] sm:$0xff]  ;;  %v700_v62 = vld [vmem:[#allocation5 + $0x2e0] sm:$0xff] }
  0x77   :  { %5144 = vmatpush3.msra.mxu1 %v272_v29  ;;  %320 = vmatprep.subr.mxu0 %v268_v31  ;;  %v696_v63 = vld [vmem:[#allocation5 + $0x2c0] sm:$0xff]  ;;  %v695_v1 = vld [vmem:[#allocation5 + $0x2b8] sm:$0xff]  ;;  %v697_v2 = vld [vmem:[#allocation5 + $0x2c8] sm:$0xff] }
  0x78   :  { %5145 = vmatprep.subr.mxu1 %v269_v32  ;;  %321 = vmatpush1.msra.mxu0 %v267_v33  ;;  %v693_v3 = vld [vmem:[#allocation5 + $0x2a8] sm:$0xff]  ;;  %v692_v4 = vld [vmem:[#allocation5 + $0x2a0] sm:$0xff]  ;;  %v694_v5 = vld [vmem:[#allocation5 + $0x2b0] sm:$0xff] }
  0x79   :  { %5146 = vmatpush3.msra.mxu1 %v269_v32  ;;  %322 = vmatprep.subr.mxu0 %v265_v34  ;;  %v690_v6 = vld [vmem:[#allocation5 + $0x290] sm:$0xff]  ;;  %v689_v7 = vld [vmem:[#allocation5 + $0x288] sm:$0xff]  ;;  %v691_v8 = vld [vmem:[#allocation5 + $0x298] sm:$0xff] }
  0x7a   :  { %5147 = vmatprep.subr.mxu1 %v266_v35  ;;  %323 = vmatpush1.msra.mxu0 %v264_v36  ;;  %v687_v9 = vld [vmem:[#allocation5 + $0x278] sm:$0xff]  ;;  %v686_v10 = vld [vmem:[#allocation5 + $0x270] sm:$0xff]  ;;  %v688_v11 = vld [vmem:[#allocation5 + $0x280] sm:$0xff] }
  0x7b   :  { %5148 = vmatpush3.msra.mxu1 %v266_v35  ;;  %324 = vmatprep.subr.mxu0 %v262_v37  ;;  %v684_v12 = vld [vmem:[#allocation5 + $0x260] sm:$0xff]  ;;  %v683_v13 = vld [vmem:[#allocation5 + $0x258] sm:$0xff]  ;;  %v685_v14 = vld [vmem:[#allocation5 + $0x268] sm:$0xff] }
  0x7c   :  { %5149 = vmatprep.subr.mxu1 %v263_v38  ;;  %325 = vmatpush1.msra.mxu0 %v261_v39  ;;  %v681_v15 = vld [vmem:[#allocation5 + $0x248] sm:$0xff]  ;;  %v680_v16 = vld [vmem:[#allocation5 + $0x240] sm:$0xff]  ;;  %v682_v17 = vld [vmem:[#allocation5 + $0x250] sm:$0xff] }
  0x7d   :  { %5150 = vmatpush3.msra.mxu1 %v263_v38  ;;  %326 = vmatprep.subr.mxu0 %v259_v40  ;;  %v678_v18 = vld [vmem:[#allocation5 + $0x230] sm:$0xff]  ;;  %v677_v19 = vld [vmem:[#allocation5 + $0x228] sm:$0xff]  ;;  %v679_v20 = vld [vmem:[#allocation5 + $0x238] sm:$0xff] }
  0x7e   :  { %5151 = vmatprep.subr.mxu1 %v260_v41  ;;  %327 = vmatpush1.msra.mxu0 %v258_v42  ;;  %v675_v21 = vld [vmem:[#allocation5 + $0x218] sm:$0xff]  ;;  %v674_v22 = vld [vmem:[#allocation5 + $0x210] sm:$0xff]  ;;  %v676_v23 = vld [vmem:[#allocation5 + $0x220] sm:$0xff] }
  0x7f   :  { %5152 = vmatpush3.msra.mxu1 %v260_v41  ;;  %328 = vmatprep.subr.mxu0 %v256_v43  ;;  %v672_v24 = vld [vmem:[#allocation5 + $0x200] sm:$0xff]  ;;  %v671_v25 = vld [vmem:[#allocation5 + $0x1f8] sm:$0xff]  ;;  %v673_v26 = vld [vmem:[#allocation5 + $0x208] sm:$0xff] }
  0x80   :  { %5153 = vmatprep.subr.mxu1 %v257_v44  ;;  %329 = vmatpush1.msra.mxu0 %v255_v45  ;;  %v669_v27 = vld [vmem:[#allocation5 + $0x1e8] sm:$0xff]  ;;  %v668_v28 = vld [vmem:[#allocation5 + $0x1e0] sm:$0xff]  ;;  %v670_v29 = vld [vmem:[#allocation5 + $0x1f0] sm:$0xff] }
  0x81   :  { %5154 = vmatpush3.msra.mxu1 %v257_v44  ;;  %330 = vmatprep.subr.mxu0 %v253_v46  ;;  %v666_v30 = vld [vmem:[#allocation5 + $0x1d0] sm:$0xff]  ;;  %v665_v31 = vld [vmem:[#allocation5 + $0x1c8] sm:$0xff]  ;;  %v667_v32 = vld [vmem:[#allocation5 + $0x1d8] sm:$0xff] }
  0x82   :  { %5155 = vmatprep.subr.mxu1 %v254_v47  ;;  %331 = vmatpush1.msra.mxu0 %v252_v48  ;;  %v663_v33 = vld [vmem:[#allocation5 + $0x1b8] sm:$0xff]  ;;  %v662_v34 = vld [vmem:[#allocation5 + $0x1b0] sm:$0xff]  ;;  %v664_v35 = vld [vmem:[#allocation5 + $0x1c0] sm:$0xff] }
  0x83   :  { %5156 = vmatpush3.msra.mxu1 %v254_v47  ;;  %5157 = vmatprep.mubr.f32.mxu1 %v139_v49  ;;  %v660_v36 = vld [vmem:[#allocation5 + $0x1a0] sm:$0xff]  ;;  %v659_v37 = vld [vmem:[#allocation5 + $0x198] sm:$0xff]  ;;  %v661_v38 = vld [vmem:[#allocation5 + $0x1a8] sm:$0xff] }
  0x84   :  { %365 = vmatmul.mubr.f32.vlgmr.msra.gmra.mxu0 %v139_v49  ;;  %5158 = vmatmul.mubr.f32.vlgmr.msra.gmra.mxu1 %v140_v50  ;;  %v657_v39 = vld [vmem:[#allocation5 + $0x188] sm:$0xff]  ;;  %v656_v40 = vld [vmem:[#allocation5 + $0x180] sm:$0xff]  ;;  %v658_v41 = vld [vmem:[#allocation5 + $0x190] sm:$0xff] }
  0x85   :  { %370 = vmatprep.mubr.f32.mxu0 %v6059_v0  ;;  %5160 = vmatprep.mubr.f32.mxu1 %v141_v51 }
  0x86   :  { %704 = vmatprep.subr.mxu0 %v702_v57  ;;  %5169 = vmatprep.subr.mxu1 %v703_v59 }
  0x87   :  { %705 = vmatpush1.msra.mxu0 %v701_v58  ;;  %5170 = vmatpush3.msra.mxu1 %v703_v59 }
  0x88   :  { %371 = vmatmul.mubr.f32.gmra.mxu0 %v140_v50  ;;  %5161 = vmatmul.mubr.f32.gmra.mxu1 %v142_v52  ;;  %v147_v50 = vlaneseq }
  0x89   :  { %376 = vmatprep.mubr.f32.mxu0 %v6059_v0  ;;  %5163 = vmatprep.mubr.f32.mxu1 %v143_v53 }
  0x8a   :  { %706 = vmatprep.subr.mxu0 %v699_v60  ;;  %5171 = vmatprep.subr.mxu1 %v700_v62 }
  0x8b   :  { %707 = vmatpush1.msra.mxu0 %v698_v61  ;;  %5172 = vmatpush3.msra.mxu1 %v700_v62 }
  0x8c   :  { %377 = vmatmul.mubr.f32.gmra.mxu0 %v141_v51  ;;  %5164 = vmatmul.mubr.f32.gmra.mxu1 %v144_v54 }
  0x8d   :  { %382 = vmatprep.mubr.f32.mxu0 %v6059_v0  ;;  %5166 = vmatprep.mubr.f32.mxu1 %v145_v55 }
  0x8e   :  { %708 = vmatprep.subr.mxu0 %v696_v63  ;;  %5173 = vmatprep.subr.mxu1 %v697_v2 }
  0x8f   :  { %709 = vmatpush1.msra.mxu0 %v695_v1  ;;  %5174 = vmatpush3.msra.mxu1 %v697_v2 }
  0x90   :  { %383 = vmatmul.mubr.f32.gmra.mxu0 %v142_v52  ;;  %5167 = vmatmul.mubr.f32.gmra.mxu1 %v146_v56 }
  0x91   :  { %388 = vmatprep.mubr.f32.mxu0 %v6059_v0  ;;  %710 = vmatprep.subr.mxu0 %v693_v3 }
  0x92   :  { %711 = vmatpush1.msra.mxu0 %v692_v4  ;;  %5175 = vmatprep.subr.mxu1 %v694_v5 }
  0x93   :  { %712 = vmatprep.subr.mxu0 %v690_v6  ;;  %5176 = vmatpush3.msra.mxu1 %v694_v5 }
  0x94   :  { %389 = vmatmul.mubr.f32.gmra.mxu0 %v143_v53  ;;  %5177 = vmatprep.subr.mxu1 %v691_v8  ;;  %v6171_v53 = vshrl.u32 %v147_v50, 7 }
  0x95   :  { %394 = vmatprep.mubr.f32.mxu0 %v6059_v0  ;;  %713 = vmatpush1.msra.mxu0 %v689_v7 }
  0x96   :  { %714 = vmatprep.subr.mxu0 %v687_v9  ;;  %5178 = vmatpush3.msra.mxu1 %v691_v8  ;;  %v151_v57 = vadd.s32 24, %v6171_v53  ;;  %v152_v60 = vadd.s32 32, %v6171_v53 }
  0x97   :  { %715 = vmatpush1.msra.mxu0 %v686_v10  ;;  %5179 = vmatprep.subr.mxu1 %v688_v11 }
  0x98   :  { %395 = vmatmul.mubr.f32.gmra.mxu0 %v144_v54  ;;  %716 = vmatprep.subr.mxu0 %v684_v12  ;;  %v6178_v2 = vand.u32 31, %v151_v57  ;;  %v6180_v6 = vand.u32 31, %v152_v60 }
  0x99   :  { %400 = vmatprep.mubr.f32.mxu0 %v6059_v0  ;;  %5180 = vmatpush3.msra.mxu1 %v688_v11  ;;  %v6185_v11 = vand.u32 31, %v6171_v53 }
  0x9a   :  { %717 = vmatpush1.msra.mxu0 %v683_v13  ;;  %5181 = vmatprep.subr.mxu1 %v685_v14  ;;  %vm613_vm2 = vcmp.lt.s32.totalorder %v6178_v2, 31  ;;  %vm556_vm3 = vcmp.ge.s32.totalorder %v6180_v6, 1  ;;  %vm960_vm8 = vcmp.ge.s32.totalorder %v6180_v6, 2  ;;  %vm1017_vm10 = vcmp.lt.s32.totalorder %v6178_v2, 30 }
  0x9b   :  { %718 = vmatprep.subr.mxu0 %v681_v15  ;;  %5182 = vmatpush3.msra.mxu1 %v685_v14  ;;  %vm552_vm4 = vcmp.ge.s32.totalorder %v6185_v11, 1  ;;  %vm956_vm9 = vcmp.ge.s32.totalorder %v6185_v11, 2  ;;  %vm1428_vm13 = vcmp.lt.s32.totalorder %v6178_v2, 28  ;;  %vm7140_vm14 = vcmp.ge.s32.totalorder %v6180_v6, 4 }
  0x9c   :  { %401 = vmatmul.mubr.f32.gmra.mxu0 %v145_v55  ;;  %5183 = vmatprep.subr.mxu1 %v682_v17  ;;  %vm1368_vm15 = vcmp.ge.s32.totalorder %v6185_v11, 4 }
  0x9d   :  { %406 = vmatprep.mubr.f32.mxu0 %v6059_v0  ;;  %719 = vmatpush1.msra.mxu0 %v680_v16 }
  0x9e   :  { %720 = vmatprep.subr.mxu0 %v678_v18  ;;  %5184 = vmatpush3.msra.mxu1 %v682_v17 }
  0x9f   :  { %721 = vmatpush1.msra.mxu0 %v677_v19  ;;  %5185 = vmatprep.subr.mxu1 %v679_v20 }
  0xa0   :  { %407 = vmatmul.mubr.f32.gmra.mxu0 %v146_v56  ;;  %722 = vmatprep.subr.mxu0 %v675_v21 }
  0xa1   :  { %768 = vmatprep.mubr.f32.mxu0 %v6059_v0  ;;  %5186 = vmatpush3.msra.mxu1 %v679_v20  ;;  %v155_v20 = vadd.s32 56, %v6171_v53 }
  0xa2   :  { %723 = vmatpush1.msra.mxu0 %v674_v22  ;;  %5187 = vmatprep.subr.mxu1 %v676_v23 }
  0xa3   :  { %724 = vmatprep.subr.mxu0 %v672_v24  ;;  %5188 = vmatpush3.msra.mxu1 %v676_v23 }
  0xa4   :  { %725 = vmatpush1.msra.mxu0 %v671_v25  ;;  %5189 = vmatprep.subr.mxu1 %v673_v26 }
  0xa5   :  { %726 = vmatprep.subr.mxu0 %v669_v27  ;;  %5190 = vmatpush3.msra.mxu1 %v673_v26 }
  0xa6   :  { %727 = vmatpush1.msra.mxu0 %v668_v28  ;;  %5191 = vmatprep.subr.mxu1 %v670_v29 }
  0xa7   :  { %728 = vmatprep.subr.mxu0 %v666_v30  ;;  %5192 = vmatpush3.msra.mxu1 %v670_v29 }
  0xa8   :  { %729 = vmatpush1.msra.mxu0 %v665_v31  ;;  %5193 = vmatprep.subr.mxu1 %v667_v32 }
  0xa9   :  { %730 = vmatprep.subr.mxu0 %v663_v33  ;;  %5194 = vmatpush3.msra.mxu1 %v667_v32 }
  0xaa   :  { %731 = vmatpush1.msra.mxu0 %v662_v34  ;;  %5195 = vmatprep.subr.mxu1 %v664_v35 }
  0xab   :  { %732 = vmatprep.subr.mxu0 %v660_v36  ;;  %5196 = vmatpush3.msra.mxu1 %v664_v35  ;;  %v6202_v36 = vand.u32 31, %v155_v20 }
  0xac   :  { %733 = vmatpush1.msra.mxu0 %v659_v37  ;;  %5197 = vmatprep.subr.mxu1 %v661_v38  ;;  %v4638_v37 = vld [vmem:[#allocation14] ss:$0 sm:$0xff] }
  0xad   :  { %734 = vmatprep.subr.mxu0 %v657_v39  ;;  %5198 = vmatpush3.msra.mxu1 %v661_v38  ;;  %vm617_vm5 = vcmp.lt.s32.totalorder %v6202_v36, 31  ;;  %vm1021_vm11 = vcmp.lt.s32.totalorder %v6202_v36, 30 }
  0xae   :  { %735 = vmatpush1.msra.mxu0 %v656_v40  ;;  %5199 = vmatprep.subr.mxu1 %v658_v41 }
  0xaf   :  { %5200 = vmatpush3.msra.mxu1 %v658_v41 }
 0x144   :  { %v6163_v42 = vpop.f32.mrf.mxu0  ;;  %v6167_v45 = vpop.f32.mrf.mxu1 }
 0x145   :  { %v529_v1 = vrot.slane %v6163_v42, 7  ;;  %v586_v7 = vrot.slane %v6167_v45, 1 }
 0x146   :  { %v6165_v43 = vpop.f32.mrf.mxu0  ;;  %v6169_v48 = vpop.f32.mrf.mxu1 }
 0x147   :  { %v585_v21 = vrot.slane %v6169_v48, 1 }
 0x148   :  { %v372_v44 = vpop.f32.mrf.mxu0  ;;  %v5162_v52 = vpop.f32.mrf.mxu1 }
 0x149   :  { %v530_v61 = vrot.slane %v372_v44, 7  ;;  %v590_v12 = vrot.slane %v5162_v52, 1 }
 0x14a   :  { %v374_v46 = vpop.f32.mrf.mxu0  ;;  %v489_v56 = vpop.f32.mrf.mxu1 }
 0x14b   :  { %v531_v8 = vsel %vm528_vm0, %v529_v1, %v530_v61  ;;  %v588_v9 = vrot.slane %v489_v56, 1 }
 0x14c   :  { %v378_v47 = vpop.f32.mrf.mxu0  ;;  %v6174_v59 = vpop.f32.mrf.mxu1  ;;  %v569_v18 = vadd.f32 %v531_v8, %v374_v46 }
 0x14d   :  { %v532_v63 = vrot.slane %v378_v47, 7  ;;  %v589_v22 = vsel %vm584_vm1, %v586_v7, %v588_v9  ;;  %v591_v25 = vsel %vm584_vm1, %v588_v9, %v590_v12  ;;  %v594_v30 = vrot.slane %v6174_v59, 1 }
 0x14e   :  { %v380_v49 = vpop.f32.mrf.mxu0  ;;  %v499_v4 = vpop.f32.mrf.mxu1  ;;  %v627_v34 = vadd.f32 %v589_v22, %v569_v18  ;;  %v587_v47 = vsel %vm584_vm1, %v585_v21, %v586_v7  ;;  %v1114_v22 = vld [vmem:[#allocation5 + $0x470] sm:$0xff] }
 0x14f   :  { %v533_v13 = vsel %vm528_vm0, %v530_v61, %v532_v63  ;;  %v592_v16 = vrot.slane %v499_v4, 1  ;;  %1116 = vmatprep.subr.mxu0 %v1114_v22 }
 0x150   :  { %v384_v51 = vpop.f32.mrf.mxu0  ;;  %v5168_v15 = vpop.f32.mrf.mxu1  ;;  %v570_v23 = vadd.f32 %v533_v13, %v380_v49 }
 0x151   :  { %v534_v14 = vrot.slane %v384_v51, 7  ;;  %v593_v31 = vsel %vm584_vm1, %v590_v12, %v592_v16  ;;  %v595_v48 = vsel %vm584_vm1, %v592_v16, %v594_v30  ;;  %v598_v49 = vrot.slane %v5168_v15, 1 }
 0x152   :  { %v386_v54 = vpop.f32.mrf.mxu0  ;;  %v509_v28 = vpop.f32.mrf.mxu1  ;;  %v628_v38 = vadd.f32 %v591_v25, %v570_v23  ;;  %v621_v42 = vsel %vm613_vm2, %v593_v31, 0.0  ;;  %v640_v51 = vadd.f32 %v4638_v37, %v627_v34  ;;  %v1113_v23 = vld [vmem:[#allocation5 + $0x468] sm:$0xff]  ;;  %v1111_v25 = vld [vmem:[#allocation5 + $0x458] sm:$0xff]  ;;  %v1102_v34 = vld [vmem:[#allocation5 + $0x410] sm:$0xff] }
 0x153   :  { %v535_v26 = vsel %vm528_vm0, %v532_v63, %v534_v14  ;;  %v596_v40 = vrot.slane %v509_v28, 1  ;;  %v1108_v28 = vld [vmem:[#allocation5 + $0x440] sm:$0xff]  ;;  %v1105_v31 = vld [vmem:[#allocation5 + $0x428] sm:$0xff] }
 0x154   :  { %v390_v55 = vpop.f32.mrf.mxu0  ;;  %v571_v39 = vadd.f32 %v535_v26, %v386_v54  ;;  %v641_v57 = vadd.f32 %v4638_v37, %v628_v38  ;;  %v6220_v4 = vmax.f32 %v640_v51, 0.0  ;;  %v1110_v26 = vld [vmem:[#allocation5 + $0x450] sm:$0xff]  ;;  %v1099_v38 = vld [vmem:[#allocation5 + $0x3f8] sm:$0xff] }
 0x155   :  { %v536_v5 = vrot.slane %v390_v55, 7  ;;  %v597_v56 = vsel %vm584_vm1, %v594_v30, %v596_v40  ;;  %v599_v63 = vsel %vm584_vm1, %v596_v40, %v598_v49  ;;  %v1109_v30 = vld [vmem:[#allocation5 + $0x448] sm:$0xff]  ;;  %v1100_v40 = vld [vmem:[#allocation5 + $0x400] sm:$0xff]  ;;  %v1087_v51 = vld [vmem:[#allocation5 + $0x398] sm:$0xff] }
 0x156   :  { %v392_v58 = vpop.f32.mrf.mxu0  ;;  %v629_v54 = vadd.f32 %v621_v42, %v571_v39  ;;  %v1098_v39 = vld [vmem:[#allocation5 + $0x3f0] sm:$0xff]  ;;  %v1095_v42 = vld [vmem:[#allocation5 + $0x3d8] sm:$0xff] }
 0x157   :  { %v537_v19 = vsel %vm528_vm0, %v534_v14, %v536_v5 }
 0x158   :  { %v396_v62 = vpop.f32.mrf.mxu0  ;;  %v564_v32 = vsel %vm556_vm3, %v537_v19, 0.0  ;;  %v642_v7 = vadd.f32 %v4638_v37, %v629_v54  ;;  %v1088_v54 = vld [vmem:[#allocation5 + $0x3a0] sm:$0xff] }
 0x159   :  { %v538_v27 = vrot.slane %v396_v62, 7  ;;  %v572_v44 = vadd.f32 %v564_v32, %v392_v58  ;;  %v609_v62 = vsel %vm584_vm1, %v598_v49, %v585_v21  ;;  %v1104_v32 = vld [vmem:[#allocation5 + $0x420] sm:$0xff]  ;;  %v1089_v49 = vld [vmem:[#allocation5 + $0x3a8] sm:$0xff] }
 0x15a   :  { %v398_v3 = vpop.f32.mrf.mxu0  ;;  %v625_v9 = vsel %vm617_vm5, %v609_v62, 0.0  ;;  %v6231_v14 = vmax.f32 %v642_v7, 0.0  ;;  %v1079_v62 = vld [vmem:[#allocation5 + $0x358] sm:$0xff]  ;;  %v1072_v7 = vld [vmem:[#allocation5 + $0x320] sm:$0xff] }
 0x15b   :  { %v539_v45 = vsel %vm528_vm0, %v536_v5, %v538_v27  ;;  %v630_v59 = vadd.f32 %v595_v48, %v572_v44  ;;  %v1097_v44 = vld [vmem:[#allocation5 + $0x3e8] sm:$0xff]  ;;  %v1090_v48 = vld [vmem:[#allocation5 + $0x3b0] sm:$0xff] }
 0x15c   :  { %v402_v10 = vpop.f32.mrf.mxu0  ;;  %v573_v55 = vadd.f32 %v539_v45, %v398_v3  ;;  %v1093_v45 = vld [vmem:[#allocation5 + $0x3c8] sm:$0xff] }
 0x15d   :  { %v540_v33 = vrot.slane %v402_v10, 7  ;;  %v6226_v10 = vmax.f32 %v641_v57, 0.0  ;;  %v643_v12 = vadd.f32 %v4638_v37, %v630_v59  ;;  %v1085_v57 = vld [vmem:[#allocation5 + $0x388] sm:$0xff] }
 0x15e   :  { %v404_v17 = vpop.f32.mrf.mxu0  ;;  %v631_v3 = vadd.f32 %v597_v56, %v573_v55  ;;  %v1084_v55 = vld [vmem:[#allocation5 + $0x380] sm:$0xff]  ;;  %v1083_v56 = vld [vmem:[#allocation5 + $0x378] sm:$0xff]  ;;  %v1081_v59 = vld [vmem:[#allocation5 + $0x368] sm:$0xff] }
 0x15f   :  { %v541_v50 = vsel %vm528_vm0, %v538_v27, %v540_v33  ;;  %v6234_v16 = vmax.f32 %v643_v12, 0.0  ;;  %v1112_v27 = vld [vmem:[#allocation5 + $0x460] sm:$0xff]  ;;  %v1069_v12 = vld [vmem:[#allocation5 + $0x308] sm:$0xff] }
 0x160   :  { %v408_v24 = vpop.f32.mrf.mxu0  ;;  %v574_v58 = vadd.f32 %v541_v50, %v404_v17  ;;  %v644_v15 = vadd.f32 %v4638_v37, %v631_v3  ;;  %v1091_v50 = vld [vmem:[#allocation5 + $0x3b8] sm:$0xff]  ;;  %v1074_v3 = vld [vmem:[#allocation5 + $0x330] sm:$0xff] }
 0x161   :  { %v519_v29 = vrot.slane %v408_v24, 7  ;;  %v1115_v24 = vld [vmem:[#allocation5 + $0x478] sm:$0xff] }
 0x162   :  { %v410_v61 = vpop.f32.mrf.mxu0  ;;  %v632_v8 = vadd.f32 %v599_v63, %v574_v58  ;;  %v6239_v18 = vmax.f32 %v644_v15, 0.0  ;;  %5213 = vmatprep.subr.mxu1 %v1115_v24  ;;  %v1080_v58 = vld [vmem:[#allocation5 + $0x360] sm:$0xff]  ;;  %v1075_v63 = vld [vmem:[#allocation5 + $0x338] sm:$0xff]  ;;  %v1070_v15 = vld [vmem:[#allocation5 + $0x310] sm:$0xff] }
 0x163   :  { %v551_v35 = vsel %vm528_vm0, %v519_v29, %v529_v1 }
 0x164   :  { %v560_v41 = vsel %vm552_vm4, %v551_v35, 0.0  ;;  %v645_v17 = vadd.f32 %v4638_v37, %v632_v8  ;;  %v1101_v35 = vld [vmem:[#allocation5 + $0x408] sm:$0xff]  ;;  %v1071_v8 = vld [vmem:[#allocation5 + $0x318] sm:$0xff] }
 0x165   :  { %v568_v46 = vadd.f32 %v560_v41, %v6165_v43  ;;  %v542_v43 = vsel %vm528_vm0, %v540_v33, %v519_v29  ;;  %v1107_v29 = vld [vmem:[#allocation5 + $0x438] sm:$0xff]  ;;  %v1106_v33 = vld [vmem:[#allocation5 + $0x430] sm:$0xff]  ;;  %v1096_v41 = vld [vmem:[#allocation5 + $0x3e0] sm:$0xff] }
 0x166   :  { %v575_v5 = vadd.f32 %v542_v43, %v410_v61  ;;  %v6242_v20 = vmax.f32 %v645_v17, 0.0  ;;  %v1078_v61 = vld [vmem:[#allocation5 + $0x350] sm:$0xff]  ;;  %v1077_v43 = vld [vmem:[#allocation5 + $0x348] sm:$0xff] }
 0x167   :  { %v626_v52 = vadd.f32 %v587_v47, %v568_v46  ;;  %v1092_v46 = vld [vmem:[#allocation5 + $0x3c0] sm:$0xff]  ;;  %v1094_v47 = vld [vmem:[#allocation5 + $0x3d0] sm:$0xff] }
 0x168   :  { %v633_v13 = vadd.f32 %v625_v9, %v575_v5  ;;  %v1076_v5 = vld [vmem:[#allocation5 + $0x340] sm:$0xff]  ;;  %v1073_v9 = vld [vmem:[#allocation5 + $0x328] sm:$0xff] }
 0x169   :  { %v639_v60 = vadd.f32 %v4638_v37, %v626_v52  ;;  %v1086_v52 = vld [vmem:[#allocation5 + $0x390] sm:$0xff] }
 0x16a   :  { %v646_v19 = vadd.f32 %v4638_v37, %v633_v13  ;;  %v1103_v37 = vld [vmem:[#allocation5 + $0x418] sm:$0xff]  ;;  %v1068_v13 = vld [vmem:[#allocation5 + $0x300] sm:$0xff] }
 0x16b   :  { %v6218_v1 = vmax.f32 %v639_v60, 0.0  ;;  %v1082_v60 = vld [vmem:[#allocation5 + $0x370] sm:$0xff] }
 0x16c   :  { %v6247_v21 = vmax.f32 %v646_v19, 0.0 }
 0x16d   :  { %769 = vmatmul.mubr.f32.vlgmr.msra.gmra.mxu0 %v6218_v1  ;;  %5201 = vmatprep.mubr.f32.mxu1 %v6218_v1 }
 0x16e   :  { %5202 = vmatmul.mubr.f32.vlgmr.msra.gmra.mxu1 %v6220_v4  ;;  %774 = vmatprep.mubr.f32.mxu0 %v6059_v0 }
 0x16f   :  { %5204 = vmatprep.mubr.f32.mxu1 %v6226_v10  ;;  %1117 = vmatpush1.msra.mxu0 %v1113_v23 }
 0x170   :  { %1118 = vmatprep.subr.mxu0 %v1111_v25  ;;  %5214 = vmatpush3.msra.mxu1 %v1115_v24 }
 0x171   :  { %775 = vmatmul.mubr.f32.gmra.mxu0 %v6220_v4  ;;  %5215 = vmatprep.subr.mxu1 %v1112_v27 }
 0x172   :  { %5205 = vmatmul.mubr.f32.gmra.mxu1 %v6231_v14  ;;  %780 = vmatprep.mubr.f32.mxu0 %v6059_v0 }
 0x173   :  { %5207 = vmatprep.mubr.f32.mxu1 %v6234_v16  ;;  %1119 = vmatpush1.msra.mxu0 %v1110_v26 }
 0x174   :  { %1120 = vmatprep.subr.mxu0 %v1108_v28  ;;  %5216 = vmatpush3.msra.mxu1 %v1112_v27 }
 0x175   :  { %781 = vmatmul.mubr.f32.gmra.mxu0 %v6226_v10  ;;  %5217 = vmatprep.subr.mxu1 %v1109_v30 }
 0x176   :  { %5208 = vmatmul.mubr.f32.gmra.mxu1 %v6239_v18  ;;  %786 = vmatprep.mubr.f32.mxu0 %v6059_v0 }
 0x177   :  { %5210 = vmatprep.mubr.f32.mxu1 %v6242_v20  ;;  %1121 = vmatpush1.msra.mxu0 %v1107_v29 }
 0x178   :  { %1122 = vmatprep.subr.mxu0 %v1105_v31  ;;  %5218 = vmatpush3.msra.mxu1 %v1109_v30 }
 0x179   :  { %787 = vmatmul.mubr.f32.gmra.mxu0 %v6231_v14  ;;  %5219 = vmatprep.subr.mxu1 %v1106_v33 }
 0x17a   :  { %5211 = vmatmul.mubr.f32.gmra.mxu1 %v6247_v21  ;;  %792 = vmatprep.mubr.f32.mxu0 %v6059_v0 }
 0x17b   :  { %1123 = vmatpush1.msra.mxu0 %v1104_v32  ;;  %5220 = vmatpush3.msra.mxu1 %v1106_v33 }
 0x17c   :  { %1124 = vmatprep.subr.mxu0 %v1102_v34  ;;  %5221 = vmatprep.subr.mxu1 %v1103_v37 }
 0x17d   :  { %793 = vmatmul.mubr.f32.gmra.mxu0 %v6234_v16  ;;  %5222 = vmatpush3.msra.mxu1 %v1103_v37 }
 0x17e   :  { %798 = vmatprep.mubr.f32.mxu0 %v6059_v0  ;;  %1125 = vmatpush1.msra.mxu0 %v1101_v35 }
 0x17f   :  { %1126 = vmatprep.subr.mxu0 %v1099_v38  ;;  %5223 = vmatprep.subr.mxu1 %v1100_v40 }
 0x180   :  { %1127 = vmatpush1.msra.mxu0 %v1098_v39  ;;  %5224 = vmatpush3.msra.mxu1 %v1100_v40 }
 0x181   :  { %799 = vmatmul.mubr.f32.gmra.mxu0 %v6239_v18  ;;  %1128 = vmatprep.subr.mxu0 %v1096_v41 }
 0x182   :  { %804 = vmatprep.mubr.f32.mxu0 %v6059_v0  ;;  %1129 = vmatpush1.msra.mxu0 %v1095_v42 }
 0x183   :  { %5225 = vmatprep.subr.mxu1 %v1097_v44  ;;  %1130 = vmatprep.subr.mxu0 %v1093_v45 }
 0x184   :  { %5226 = vmatpush3.msra.mxu1 %v1097_v44  ;;  %1131 = vmatpush1.msra.mxu0 %v1092_v46 }
 0x185   :  { %805 = vmatmul.mubr.f32.gmra.mxu0 %v6242_v20  ;;  %5227 = vmatprep.subr.mxu1 %v1094_v47 }
 0x186   :  { %810 = vmatprep.mubr.f32.mxu0 %v6059_v0  ;;  %1132 = vmatprep.subr.mxu0 %v1090_v48 }
 0x187   :  { %5228 = vmatpush3.msra.mxu1 %v1094_v47  ;;  %1133 = vmatpush1.msra.mxu0 %v1089_v49 }
 0x188   :  { %5229 = vmatprep.subr.mxu1 %v1091_v50  ;;  %1134 = vmatprep.subr.mxu0 %v1087_v51 }
 0x189   :  { %811 = vmatmul.mubr.f32.gmra.mxu0 %v6247_v21  ;;  %5230 = vmatpush3.msra.mxu1 %v1091_v50 }
 0x18a   :  { %1180 = vmatprep.mubr.f32.mxu0 %v6059_v0  ;;  %1135 = vmatpush1.msra.mxu0 %v1086_v52 }
 0x18b   :  { %5231 = vmatprep.subr.mxu1 %v1088_v54  ;;  %1136 = vmatprep.subr.mxu0 %v1084_v55 }
 0x18c   :  { %5232 = vmatpush3.msra.mxu1 %v1088_v54  ;;  %1137 = vmatpush1.msra.mxu0 %v1083_v56 }
 0x18d   :  { %5233 = vmatprep.subr.mxu1 %v1085_v57  ;;  %1138 = vmatprep.subr.mxu0 %v1081_v59 }
 0x18e   :  { %5234 = vmatpush3.msra.mxu1 %v1085_v57  ;;  %1139 = vmatpush1.msra.mxu0 %v1080_v58 }
 0x18f   :  { %5235 = vmatprep.subr.mxu1 %v1082_v60  ;;  %1140 = vmatprep.subr.mxu0 %v1078_v61 }
 0x190   :  { %5236 = vmatpush3.msra.mxu1 %v1082_v60  ;;  %1141 = vmatpush1.msra.mxu0 %v1077_v43 }
 0x191   :  { %5237 = vmatprep.subr.mxu1 %v1079_v62  ;;  %1142 = vmatprep.subr.mxu0 %v1075_v63 }
 0x192   :  { %5238 = vmatpush3.msra.mxu1 %v1079_v62  ;;  %1143 = vmatpush1.msra.mxu0 %v1074_v3 }
 0x193   :  { %5239 = vmatprep.subr.mxu1 %v1076_v5  ;;  %1144 = vmatprep.subr.mxu0 %v1072_v7  ;;  %v4639_v7 = vld [vmem:[#allocation14 + $0x1] ss:$0 sm:$0xff] }
 0x194   :  { %5240 = vmatpush3.msra.mxu1 %v1076_v5  ;;  %1145 = vmatpush1.msra.mxu0 %v1071_v8 }
 0x195   :  { %5241 = vmatprep.subr.mxu1 %v1073_v9  ;;  %1146 = vmatprep.subr.mxu0 %v1069_v12 }
 0x196   :  { %5242 = vmatpush3.msra.mxu1 %v1073_v9  ;;  %1147 = vmatpush1.msra.mxu0 %v1068_v13 }
 0x197   :  { %5243 = vmatprep.subr.mxu1 %v1070_v15 }
 0x198   :  { %5244 = vmatpush3.msra.mxu1 %v1070_v15 }
 0x22d   :  { %v770_v17 = vpop.f32.mrf.mxu0 }
 0x22e   :  { %v5203_v22 = vpop.f32.mrf.mxu1  ;;  %v933_v38 = vrot.slane %v770_v17, 6 }
 0x22f   :  { %v772_v19 = vpop.f32.mrf.mxu0  ;;  %v990_v47 = vrot.slane %v5203_v22, 2 }
 0x230   :  { %v6260_v25 = vpop.f32.mrf.mxu1 }
 0x231   :  { %v776_v23 = vpop.f32.mrf.mxu0  ;;  %v989_v62 = vrot.slane %v6260_v25, 2 }
 0x232   :  { %v5206_v28 = vpop.f32.mrf.mxu1  ;;  %v934_v34 = vrot.slane %v776_v23, 6 }
 0x233   :  { %v778_v24 = vpop.f32.mrf.mxu0  ;;  %v994_v58 = vrot.slane %v5206_v28, 2 }
 0x234   :  { %v893_v31 = vpop.f32.mrf.mxu1  ;;  %v935_v41 = vsel %vm932_vm6, %v933_v38, %v934_v34 }
 0x235   :  { %v782_v26 = vpop.f32.mrf.mxu0  ;;  %v992_v42 = vrot.slane %v893_v31, 2  ;;  %v973_v50 = vadd.f32 %v935_v41, %v778_v24 }
 0x236   :  { %v6262_v35 = vpop.f32.mrf.mxu1  ;;  %v936_v39 = vrot.slane %v782_v26, 6  ;;  %v991_v26 = vsel %vm988_vm7, %v989_v62, %v990_v47 }
 0x237   :  { %v784_v27 = vpop.f32.mrf.mxu0  ;;  %v993_v52 = vsel %vm988_vm7, %v990_v47, %v992_v42  ;;  %v995_v8 = vsel %vm988_vm7, %v992_v42, %v994_v58  ;;  %v998_v28 = vrot.slane %v6262_v35, 2 }
 0x238   :  { %v903_v45 = vpop.f32.mrf.mxu1  ;;  %v937_v48 = vsel %vm932_vm6, %v934_v34, %v936_v39  ;;  %v1031_v63 = vadd.f32 %v993_v52, %v973_v50 }
 0x239   :  { %v788_v29 = vpop.f32.mrf.mxu0  ;;  %v974_v55 = vadd.f32 %v937_v48, %v784_v27  ;;  %v996_v56 = vrot.slane %v903_v45, 2 }
 0x23a   :  { %v938_v49 = vrot.slane %v788_v29, 6  ;;  %v5212_v57 = vpop.f32.mrf.mxu1  ;;  %v1044_v27 = vadd.f32 %v4639_v7, %v1031_v63 }
 0x23b   :  { %v790_v30 = vpop.f32.mrf.mxu0  ;;  %v1032_v12 = vadd.f32 %v995_v8, %v974_v55  ;;  %v997_v13 = vsel %vm988_vm7, %v994_v58, %v996_v56  ;;  %v1002_v31 = vrot.slane %v5212_v57, 2  ;;  %v1524_v8 = vld [vmem:[#allocation5 + $0x5e8] sm:$0xff] }
 0x23c   :  { %v939_v60 = vsel %vm932_vm6, %v936_v39, %v938_v49  ;;  %v913_v17 = vpop.f32.mrf.mxu1  ;;  %v6289_v35 = vmax.f32 %v1044_v27, 0.0  ;;  %v1514_v27 = vld [vmem:[#allocation5 + $0x598] sm:$0xff] }
 0x23d   :  { %v794_v32 = vpop.f32.mrf.mxu0  ;;  %v975_v15 = vadd.f32 %v939_v60, %v790_v30  ;;  %v1000_v30 = vrot.slane %v913_v17, 2  ;;  %v1045_v39 = vadd.f32 %v4639_v7, %v1032_v12  ;;  %v1523_v12 = vld [vmem:[#allocation5 + $0x5e0] sm:$0xff]  ;;  %v1520_v17 = vld [vmem:[#allocation5 + $0x5c8] sm:$0xff] }
 0x23e   :  { %v940_v44 = vrot.slane %v794_v32, 6  ;;  %v1025_v32 = vsel %vm1017_vm10, %v997_v13, 0.0  ;;  %v1521_v13 = vld [vmem:[#allocation5 + $0x5d0] sm:$0xff] }
 0x23f   :  { %v796_v33 = vpop.f32.mrf.mxu0  ;;  %v1001_v47 = vsel %vm988_vm7, %v998_v28, %v1000_v30 }
 0x240   :  { %v941_v54 = vsel %vm932_vm6, %v938_v49, %v940_v44 }
 0x241   :  { %v800_v37 = vpop.f32.mrf.mxu0  ;;  %v968_v3 = vsel %vm960_vm8, %v941_v54, 0.0  ;;  %v6298_v54 = vmax.f32 %v1045_v39, 0.0  ;;  %v1503_v39 = vld [vmem:[#allocation5 + $0x540] sm:$0xff] }
 0x242   :  { %v942_v61 = vrot.slane %v800_v37, 6  ;;  %v976_v23 = vadd.f32 %v968_v3, %v796_v33  ;;  %v1033_v37 = vadd.f32 %v1025_v32, %v975_v15  ;;  %v1519_v15 = vld [vmem:[#allocation5 + $0x5c0] sm:$0xff]  ;;  %v1509_v32 = vld [vmem:[#allocation5 + $0x570] sm:$0xff] }
 0x243   :  { %v802_v40 = vpop.f32.mrf.mxu0 }
 0x244   :  { %v943_v24 = vsel %vm932_vm6, %v940_v44, %v942_v61  ;;  %v1046_v52 = vadd.f32 %v4639_v7, %v1033_v37  ;;  %v1506_v37 = vld [vmem:[#allocation5 + $0x558] sm:$0xff] }
 0x245   :  { %v806_v46 = vpop.f32.mrf.mxu0  ;;  %v977_v33 = vadd.f32 %v943_v24, %v802_v40  ;;  %v1003_v40 = vsel %vm988_vm7, %v1000_v30, %v1002_v31  ;;  %v1517_v24 = vld [vmem:[#allocation5 + $0x5b0] sm:$0xff]  ;;  %v1507_v30 = vld [vmem:[#allocation5 + $0x560] sm:$0xff] }
 0x246   :  { %v944_v5 = vrot.slane %v806_v46, 6  ;;  %v1013_v46 = vsel %vm988_vm7, %v1002_v31, %v989_v62  ;;  %v1511_v31 = vld [vmem:[#allocation5 + $0x580] sm:$0xff] }
 0x247   :  { %v808_v51 = vpop.f32.mrf.mxu0  ;;  %v1035_v49 = vadd.f32 %v1001_v47, %v977_v33  ;;  %v1505_v33 = vld [vmem:[#allocation5 + $0x550] sm:$0xff]  ;;  %v1495_v47 = vld [vmem:[#allocation5 + $0x500] sm:$0xff] }
 0x248   :  { %v945_v29 = vsel %vm932_vm6, %v942_v61, %v944_v5 }
 0x249   :  { %v812_v59 = vpop.f32.mrf.mxu0  ;;  %v1048_v58 = vadd.f32 %v4639_v7, %v1035_v49  ;;  %v1496_v49 = vld [vmem:[#allocation5 + $0x508] sm:$0xff] }
 0x24a   :  { %v923_v43 = vrot.slane %v812_v59, 6  ;;  %v6305_v59 = vmax.f32 %v1046_v52, 0.0  ;;  %v1493_v52 = vld [vmem:[#allocation5 + $0x4f0] sm:$0xff] }
 0x24b   :  { %v814_v44 = vpop.f32.mrf.mxu0 }
 0x24c   :  { %v955_v9 = vsel %vm932_vm6, %v923_v43, %v933_v38  ;;  %v999_v38 = vsel %vm988_vm7, %v996_v56, %v998_v28  ;;  %v946_v45 = vsel %vm932_vm6, %v944_v5, %v923_v43  ;;  %v1029_v56 = vsel %vm1021_vm11, %v1013_v46, 0.0  ;;  %v1525_v5 = vld [vmem:[#allocation5 + $0x5f0] sm:$0xff]  ;;  %v1512_v28 = vld [vmem:[#allocation5 + $0x588] sm:$0xff] }
 0x24d   :  { %v964_v22 = vsel %vm956_vm9, %v955_v9, 0.0  ;;  %v1034_v41 = vadd.f32 %v999_v38, %v976_v23  ;;  %v979_v50 = vadd.f32 %v946_v45, %v814_v44  ;;  %v6313_v43 = vmax.f32 %v1048_v58, 0.0  ;;  %1527 = vmatprep.subr.mxu0 %v1525_v5  ;;  %v1522_v9 = vld [vmem:[#allocation5 + $0x5d8] sm:$0xff]  ;;  %v1516_v23 = vld [vmem:[#allocation5 + $0x5a8] sm:$0xff]  ;;  %v1499_v45 = vld [vmem:[#allocation5 + $0x520] sm:$0xff] }
 0x24e   :  { %v972_v25 = vadd.f32 %v964_v22, %v772_v19  ;;  %v978_v19 = vadd.f32 %v945_v29, %v808_v51  ;;  %v1518_v22 = vld [vmem:[#allocation5 + $0x5b8] sm:$0xff]  ;;  %v1504_v38 = vld [vmem:[#allocation5 + $0x548] sm:$0xff]  ;;  %v1497_v46 = vld [vmem:[#allocation5 + $0x510] sm:$0xff] }
 0x24f   :  { %v1047_v55 = vadd.f32 %v4639_v7, %v1034_v41  ;;  %v1037_v57 = vadd.f32 %v1029_v56, %v979_v50  ;;  %v1510_v29 = vld [vmem:[#allocation5 + $0x578] sm:$0xff]  ;;  %v1501_v41 = vld [vmem:[#allocation5 + $0x530] sm:$0xff]  ;;  %v1492_v50 = vld [vmem:[#allocation5 + $0x4e8] sm:$0xff] }
 0x250   :  { %v1030_v34 = vadd.f32 %v991_v26, %v972_v25  ;;  %v1036_v51 = vadd.f32 %v1003_v40, %v978_v19  ;;  %v1515_v25 = vld [vmem:[#allocation5 + $0x5a0] sm:$0xff]  ;;  %v1513_v26 = vld [vmem:[#allocation5 + $0x590] sm:$0xff]  ;;  %v1502_v19 = vld [vmem:[#allocation5 + $0x538] sm:$0xff] }
 0x251   :  { %v6308_v60 = vmax.f32 %v1047_v55, 0.0  ;;  %v1050_v62 = vadd.f32 %v4639_v7, %v1037_v57  ;;  %v1498_v44 = vld [vmem:[#allocation5 + $0x518] sm:$0xff]  ;;  %v1489_v55 = vld [vmem:[#allocation5 + $0x4d0] sm:$0xff]  ;;  %v1488_v57 = vld [vmem:[#allocation5 + $0x4c8] sm:$0xff] }
 0x252   :  { %v1043_v42 = vadd.f32 %v4639_v7, %v1030_v34  ;;  %v1049_v61 = vadd.f32 %v4639_v7, %v1036_v51  ;;  %v1526_v7 = vld [vmem:[#allocation5 + $0x5f8] sm:$0xff]  ;;  %v1508_v34 = vld [vmem:[#allocation5 + $0x568] sm:$0xff]  ;;  %v1491_v51 = vld [vmem:[#allocation5 + $0x4e0] sm:$0xff] }
 0x253   :  { %v6321_v3 = vmax.f32 %v1050_v62, 0.0  ;;  %5257 = vmatprep.subr.mxu1 %v1526_v7  ;;  %v1494_v40 = vld [vmem:[#allocation5 + $0x4f8] sm:$0xff]  ;;  %v1485_v62 = vld [vmem:[#allocation5 + $0x4b0] sm:$0xff]  ;;  %v1483_v5 = vld [vmem:[#allocation5 + $0x4a0] sm:$0xff] }
 0x254   :  { %v6293_v48 = vmax.f32 %v1043_v42, 0.0  ;;  %v6316_v63 = vmax.f32 %v1049_v61, 0.0  ;;  %v1500_v42 = vld [vmem:[#allocation5 + $0x528] sm:$0xff]  ;;  %v1490_v56 = vld [vmem:[#allocation5 + $0x4d8] sm:$0xff]  ;;  %v1487_v61 = vld [vmem:[#allocation5 + $0x4c0] sm:$0xff] }
 0x255   :  { %v1486_v58 = vld [vmem:[#allocation5 + $0x4b8] sm:$0xff] }
 0x256   :  { %1181 = vmatmul.mubr.f32.vlgmr.msra.gmra.mxu0 %v6293_v48  ;;  %5245 = vmatprep.mubr.f32.mxu1 %v6293_v48 }
 0x257   :  { %5246 = vmatmul.mubr.f32.vlgmr.msra.gmra.mxu1 %v6289_v35  ;;  %1186 = vmatprep.mubr.f32.mxu0 %v6059_v0 }
 0x258   :  { %5248 = vmatprep.mubr.f32.mxu1 %v6298_v54  ;;  %1528 = vmatpush1.msra.mxu0 %v1524_v8  ;;  %v1482_v8 = vld [vmem:[#allocation5 + $0x498] sm:$0xff] }
 0x259   :  { %5258 = vmatpush3.msra.mxu1 %v1526_v7  ;;  %1529 = vmatprep.subr.mxu0 %v1522_v9  ;;  %v1484_v7 = vld [vmem:[#allocation5 + $0x4a8] sm:$0xff] }
 0x25a   :  { %1187 = vmatmul.mubr.f32.gmra.mxu0 %v6289_v35  ;;  %5259 = vmatprep.subr.mxu1 %v1523_v12  ;;  %v1480_v9 = vld [vmem:[#allocation5 + $0x488] sm:$0xff] }
 0x25b   :  { %5249 = vmatmul.mubr.f32.gmra.mxu1 %v6305_v59  ;;  %1192 = vmatprep.mubr.f32.mxu0 %v6059_v0 }
 0x25c   :  { %5251 = vmatprep.mubr.f32.mxu1 %v6308_v60  ;;  %1530 = vmatpush1.msra.mxu0 %v1521_v13  ;;  %v1481_v13 = vld [vmem:[#allocation5 + $0x490] sm:$0xff] }
 0x25d   :  { %5260 = vmatpush3.msra.mxu1 %v1523_v12  ;;  %1531 = vmatprep.subr.mxu0 %v1519_v15  ;;  %v1479_v12 = vld [vmem:[#allocation5 + $0x480] sm:$0xff]  ;;  %v1868_v15 = vld [vmem:[#allocation7 + $0x170] sm:$0xff] }
 0x25e   :  { %1193 = vmatmul.mubr.f32.gmra.mxu0 %v6298_v54  ;;  %5261 = vmatprep.subr.mxu1 %v1520_v17 }
 0x25f   :  { %5252 = vmatmul.mubr.f32.gmra.mxu1 %v6313_v43  ;;  %1198 = vmatprep.mubr.f32.mxu0 %v6059_v0 }
 0x260   :  { %5254 = vmatprep.mubr.f32.mxu1 %v6316_v63  ;;  %1532 = vmatpush1.msra.mxu0 %v1518_v22 }
 0x261   :  { %5262 = vmatpush3.msra.mxu1 %v1520_v17  ;;  %1533 = vmatprep.subr.mxu0 %v1516_v23  ;;  %v6334_v17 = vld [vmem:[#allocation7 + $0x178] sm:$0xff] }
 0x262   :  { %1199 = vmatmul.mubr.f32.gmra.mxu0 %v6305_v59  ;;  %5263 = vmatprep.subr.mxu1 %v1517_v24 }
 0x263   :  { %5255 = vmatmul.mubr.f32.gmra.mxu1 %v6321_v3  ;;  %1204 = vmatprep.mubr.f32.mxu0 %v6059_v0 }
 0x264   :  { %1534 = vmatpush1.msra.mxu0 %v1515_v25  ;;  %5264 = vmatpush3.msra.mxu1 %v1517_v24 }
 0x265   :  { %1535 = vmatprep.subr.mxu0 %v1513_v26  ;;  %5265 = vmatprep.subr.mxu1 %v1514_v27 }
 0x266   :  { %1205 = vmatmul.mubr.f32.gmra.mxu0 %v6308_v60  ;;  %5266 = vmatpush3.msra.mxu1 %v1514_v27 }
 0x267   :  { %1210 = vmatprep.mubr.f32.mxu0 %v6059_v0  ;;  %1536 = vmatpush1.msra.mxu0 %v1512_v28 }
 0x268   :  { %1537 = vmatprep.subr.mxu0 %v1510_v29  ;;  %5267 = vmatprep.subr.mxu1 %v1511_v31 }
 0x269   :  { %1538 = vmatpush1.msra.mxu0 %v1509_v32  ;;  %5268 = vmatpush3.msra.mxu1 %v1511_v31 }
 0x26a   :  { %1211 = vmatmul.mubr.f32.gmra.mxu0 %v6313_v43  ;;  %1539 = vmatprep.subr.mxu0 %v1507_v30 }
 0x26b   :  { %1216 = vmatprep.mubr.f32.mxu0 %v6059_v0  ;;  %5269 = vmatprep.subr.mxu1 %v1508_v34 }
 0x26c   :  { %1540 = vmatpush1.msra.mxu0 %v1506_v37  ;;  %5270 = vmatpush3.msra.mxu1 %v1508_v34 }
 0x26d   :  { %1541 = vmatprep.subr.mxu0 %v1504_v38  ;;  %5271 = vmatprep.subr.mxu1 %v1505_v33 }
 0x26e   :  { %1217 = vmatmul.mubr.f32.gmra.mxu0 %v6316_v63  ;;  %5272 = vmatpush3.msra.mxu1 %v1505_v33 }
 0x26f   :  { %1222 = vmatprep.mubr.f32.mxu0 %v6059_v0  ;;  %1542 = vmatpush1.msra.mxu0 %v1503_v39 }
 0x270   :  { %1543 = vmatprep.subr.mxu0 %v1501_v41  ;;  %5273 = vmatprep.subr.mxu1 %v1502_v19 }
 0x271   :  { %1544 = vmatpush1.msra.mxu0 %v1500_v42  ;;  %5274 = vmatpush3.msra.mxu1 %v1502_v19  ;;  %v6353_v42 = vld [vmem:[#allocation14 + $0x2] ss:$0 sm:$0xff] }
 0x272   :  { %1223 = vmatmul.mubr.f32.gmra.mxu0 %v6321_v3  ;;  %1545 = vmatprep.subr.mxu0 %v1498_v44 }
 0x273   :  { %1591 = vmatprep.mubr.f32.mxu0 %v6059_v0  ;;  %5275 = vmatprep.subr.mxu1 %v1499_v45 }
 0x274   :  { %1546 = vmatpush1.msra.mxu0 %v1497_v46  ;;  %5276 = vmatpush3.msra.mxu1 %v1499_v45 }
 0x275   :  { %1547 = vmatprep.subr.mxu0 %v1495_v47  ;;  %5277 = vmatprep.subr.mxu1 %v1496_v49 }
 0x276   :  { %1548 = vmatpush1.msra.mxu0 %v1494_v40  ;;  %5278 = vmatpush3.msra.mxu1 %v1496_v49 }
 0x277   :  { %1549 = vmatprep.subr.mxu0 %v1492_v50  ;;  %5279 = vmatprep.subr.mxu1 %v1493_v52 }
 0x278   :  { %1550 = vmatpush1.msra.mxu0 %v1491_v51  ;;  %5280 = vmatpush3.msra.mxu1 %v1493_v52 }
 0x279   :  { %1551 = vmatprep.subr.mxu0 %v1489_v55  ;;  %5281 = vmatprep.subr.mxu1 %v1490_v56 }
 0x27a   :  { %1552 = vmatpush1.msra.mxu0 %v1488_v57  ;;  %5282 = vmatpush3.msra.mxu1 %v1490_v56 }
 0x27b   :  { %1553 = vmatprep.subr.mxu0 %v1486_v58  ;;  %5283 = vmatprep.subr.mxu1 %v1487_v61 }
 0x27c   :  { %1554 = vmatpush1.msra.mxu0 %v1485_v62  ;;  %5284 = vmatpush3.msra.mxu1 %v1487_v61 }
 0x27d   :  { %1555 = vmatprep.subr.mxu0 %v1483_v5  ;;  %5285 = vmatprep.subr.mxu1 %v1484_v7 }
 0x27e   :  { %1556 = vmatpush1.msra.mxu0 %v1482_v8  ;;  %5286 = vmatpush3.msra.mxu1 %v1484_v7  ;;  %v1060_v8 = vadd.f32 %v6289_v35, %v6220_v4 }
 0x27f   :  { %1557 = vmatprep.subr.mxu0 %v1480_v9  ;;  %5287 = vmatprep.subr.mxu1 %v1481_v13 }
 0x280   :  { %1558 = vmatpush1.msra.mxu0 %v1479_v12  ;;  %5288 = vmatpush3.msra.mxu1 %v1481_v13 }
 0x281   :  { %1870 = vmatprep.subr.mxu0 %v1868_v15  ;;  %5301 = vmatprep.subr.mxu1 %v6334_v17 }
 0x316   :  { %v6337_v22 = vpop.f32.mrf.mxu0 }
 0x317   :  { %v6339_v23 = vpop.f32.mrf.mxu1  ;;  %v1345_v27 = vrot.slane %v6337_v22, 4  ;;  %v1065_v22 = vadd.f32 %v6316_v63, %v6242_v20  ;;  %v1867_v63 = vld [vmem:[#allocation7 + $0x168] sm:$0xff] }
 0x318   :  { %v6341_v24 = vpop.f32.mrf.mxu0  ;;  %v1401_v34 = vrot.slane %v6339_v23, 4  ;;  %v1059_v23 = vadd.f32 %v6293_v48, %v6218_v1  ;;  %v1863_v1 = vld [vmem:[#allocation7 + $0x148] sm:$0xff]  ;;  %v1861_v48 = vld [vmem:[#allocation7 + $0x138] sm:$0xff] }
 0x319   :  { %v6343_v25 = vpop.f32.mrf.mxu1 }
 0x31a   :  { %v1188_v26 = vpop.f32.mrf.mxu0 }
 0x31b   :  { %v1346_v28 = vrot.slane %v1188_v26, 4  ;;  %v5250_v29 = vpop.f32.mrf.mxu1 }
 0x31c   :  { %v1190_v31 = vpop.f32.mrf.mxu0  ;;  %v1405_v45 = vrot.slane %v5250_v29, 4  ;;  %v1061_v29 = vadd.f32 %v6298_v54, %v6226_v10  ;;  %v1062_v54 = vadd.f32 %v6305_v59, %v6231_v14 }
 0x31d   :  { %v1347_v32 = vsel %vm1344_vm12, %v1345_v27, %v1346_v28  ;;  %v1305_v30 = vpop.f32.mrf.mxu1 }
 0x31e   :  { %v1385_v37 = vadd.f32 %v1347_v32, %v1190_v31  ;;  %v1403_v38 = vrot.slane %v1305_v30, 4  ;;  %v1194_v33 = vpop.f32.mrf.mxu0 }
 0x31f   :  { %v1348_v39 = vrot.slane %v1194_v33, 4  ;;  %v5253_v41 = vpop.f32.mrf.mxu1 }
 0x320   :  { %v1404_v19 = vsel %vm1344_vm12, %v1401_v34, %v1403_v38  ;;  %v1196_v44 = vpop.f32.mrf.mxu0  ;;  %v1406_v55 = vsel %vm1344_vm12, %v1403_v38, %v1405_v45 }
 0x321   :  { %v1442_v46 = vadd.f32 %v1404_v19, %v1385_v37  ;;  %v1349_v47 = vsel %vm1344_vm12, %v1346_v28, %v1348_v39  ;;  %v1315_v49 = vpop.f32.mrf.mxu1  ;;  %v1409_v37 = vrot.slane %v5253_v41, 4 }
 0x322   :  { %v1386_v40 = vadd.f32 %v1349_v47, %v1196_v44  ;;  %v1407_v50 = vrot.slane %v1315_v49, 4  ;;  %v1200_v52 = vpop.f32.mrf.mxu0 }
 0x323   :  { %v1455_v51 = vadd.f32 %v6353_v42, %v1442_v46  ;;  %v1350_v56 = vrot.slane %v1200_v52, 4  ;;  %v5256_v61 = vpop.f32.mrf.mxu1 }
 0x324   :  { %v1443_v57 = vadd.f32 %v1406_v55, %v1386_v40  ;;  %v1408_v58 = vsel %vm1344_vm12, %v1405_v45, %v1407_v50  ;;  %v1202_v62 = vpop.f32.mrf.mxu0  ;;  %v1410_v46 = vsel %vm1344_vm12, %v1407_v50, %v1409_v37  ;;  %v1063_v50 = vadd.f32 %v6308_v60, %v6234_v16 }
 0x325   :  { %v6360_v5 = vmax.f32 %v1455_v51, 0.0  ;;  %v1351_v7 = vsel %vm1344_vm12, %v1348_v39, %v1350_v56  ;;  %v1436_v15 = vsel %vm1428_vm13, %v1408_v58, 0.0  ;;  %v1325_v32 = vpop.f32.mrf.mxu1 }
 0x326   :  { %v1387_v9 = vadd.f32 %v1351_v7, %v1202_v62  ;;  %v1206_v12 = vpop.f32.mrf.mxu0  ;;  %v1456_v13 = vadd.f32 %v6353_v42, %v1443_v57  ;;  %v1411_v44 = vrot.slane %v1325_v32, 4  ;;  %v1413_v62 = vrot.slane %v5256_v61, 4 }
 0x327   :  { %v1352_v26 = vrot.slane %v1206_v12, 4  ;;  %v6370_v28 = vadd.f32 %v6360_v5, %v1060_v8  ;;  %v1400_v12 = vrot.slane %v6343_v25, 4 }
 0x328   :  { %v1444_v31 = vadd.f32 %v1436_v15, %v1387_v9  ;;  %v1208_v30 = vpop.f32.mrf.mxu0  ;;  %v6374_v4 = vmax.f32 %v1456_v13, 0.0  ;;  %v1064_v9 = vadd.f32 %v6313_v43, %v6239_v18  ;;  %v1414_v61 = vsel %vm1344_vm12, %v1411_v44, %v1413_v62 }
 0x329   :  { %v1353_v35 = vsel %vm1344_vm12, %v1350_v56, %v1352_v26  ;;  %v1412_v56 = vsel %vm1344_vm12, %v1409_v37, %v1411_v44  ;;  %v1424_v60 = vsel %vm1344_vm12, %v1413_v62, %v1400_v12  ;;  %v1855_v62 = vld [vmem:[#allocation7 + $0x108] sm:$0xff] }
 0x32a   :  { %v1380_v38 = vsel %vm7140_vm14, %v1353_v35, 0.0  ;;  %v1212_v33 = vpop.f32.mrf.mxu0  ;;  %v6380_v39 = vadd.f32 %v6374_v4, %v1061_v29  ;;  %v1457_v19 = vadd.f32 %v6353_v42, %v1444_v31  ;;  %vm1432_vm14 = vcmp.lt.s32.totalorder %v6202_v36, 28 }
 0x32b   :  { %v1388_v45 = vadd.f32 %v1380_v38, %v1208_v30  ;;  %v1354_v10 = vrot.slane %v1212_v33, 4 }
 0x32c   :  { %v1214_v47 = vpop.f32.mrf.mxu0  ;;  %v6386_v49 = vmax.f32 %v1457_v19, 0.0  ;;  %v1440_v19 = vsel %vm1432_vm14, %v1424_v60, 0.0  ;;  %v1842_v60 = vld [vmem:[#allocation7 + $0xa0] sm:$0xff] }
 0x32d   :  { %v1445_v41 = vadd.f32 %v1410_v46, %v1388_v45  ;;  %v1355_v40 = vsel %vm1344_vm12, %v1352_v26, %v1354_v10 }
 0x32e   :  { %v1389_v52 = vadd.f32 %v1355_v40, %v1214_v47  ;;  %v1218_v51 = vpop.f32.mrf.mxu0  ;;  %v6390_v55 = vadd.f32 %v6386_v49, %v1062_v54  ;;  %v1066_v47 = vadd.f32 %v6321_v3, %v6247_v21  ;;  %v1866_v21 = vld [vmem:[#allocation7 + $0x160] sm:$0xff] }
 0x32f   :  { %v1356_v57 = vrot.slane %v1218_v51, 4  ;;  %v1458_v58 = vadd.f32 %v6353_v42, %v1445_v41  ;;  %v1862_v3 = vld [vmem:[#allocation7 + $0x140] sm:$0xff] }
 0x330   :  { %v1446_v14 = vadd.f32 %v1412_v56, %v1389_v52  ;;  %v1220_v59 = vpop.f32.mrf.mxu0  ;;  %v1864_v52 = vld [vmem:[#allocation7 + $0x150] sm:$0xff]  ;;  %v1858_v56 = vld [vmem:[#allocation7 + $0x120] sm:$0xff] }
 0x331   :  { %v1357_v7 = vsel %vm1344_vm12, %v1354_v10, %v1356_v57  ;;  %v6397_v8 = vmax.f32 %v1458_v58, 0.0  ;;  %v1857_v58 = vld [vmem:[#allocation7 + $0x118] sm:$0xff] }
 0x332   :  { %v1390_v13 = vadd.f32 %v1357_v7, %v1220_v59  ;;  %v1224_v15 = vpop.f32.mrf.mxu0  ;;  %v1459_v26 = vadd.f32 %v6353_v42, %v1446_v14  ;;  %v1852_v14 = vld [vmem:[#allocation7 + $0xf0] sm:$0xff]  ;;  %v1854_v59 = vld [vmem:[#allocation7 + $0x100] sm:$0xff]  ;;  %v1851_v7 = vld [vmem:[#allocation7 + $0xe8] sm:$0xff] }
 0x333   :  { %v1335_v29 = vrot.slane %v1224_v15, 4  ;;  %v6406_v16 = vadd.f32 %v6397_v8, %v1063_v50  ;;  %v1850_v50 = vld [vmem:[#allocation7 + $0xe0] sm:$0xff]  ;;  %v1844_v15 = vld [vmem:[#allocation7 + $0xb0] sm:$0xff] }
 0x334   :  { %v1447_v31 = vadd.f32 %v1414_v61, %v1390_v13  ;;  %v1226_v32 = vpop.f32.mrf.mxu0  ;;  %v6410_v18 = vmax.f32 %v1459_v26, 0.0  ;;  %v1848_v13 = vld [vmem:[#allocation7 + $0xd0] sm:$0xff]  ;;  %v1843_v26 = vld [vmem:[#allocation7 + $0xa8] sm:$0xff]  ;;  %v1845_v61 = vld [vmem:[#allocation7 + $0xb8] sm:$0xff] }
 0x335   :  { %v1367_v43 = vsel %vm1344_vm12, %v1335_v29, %v1345_v27  ;;  %v1358_v25 = vsel %vm1344_vm12, %v1356_v57, %v1335_v29  ;;  %v1402_v27 = vsel %vm1344_vm12, %v1400_v12, %v1401_v34  ;;  %v1865_v34 = vld [vmem:[#allocation7 + $0x158] sm:$0xff]  ;;  %v1856_v57 = vld [vmem:[#allocation7 + $0x110] sm:$0xff]  ;;  %v1846_v12 = vld [vmem:[#allocation7 + $0xc0] sm:$0xff] }
 0x336   :  { %v1376_v30 = vsel %vm1368_vm15, %v1367_v43, 0.0  ;;  %v1391_v35 = vadd.f32 %v1358_v25, %v1226_v32  ;;  %v6419_v37 = vadd.f32 %v6410_v18, %v1064_v9  ;;  %v1460_v38 = vadd.f32 %v6353_v42, %v1447_v31  ;;  %v1849_v9 = vld [vmem:[#allocation7 + $0xd8] sm:$0xff]  ;;  %v1838_v31 = vld [vmem:[#allocation7 + $0x80] sm:$0xff]  ;;  %v1839_v43 = vld [vmem:[#allocation7 + $0x88] sm:$0xff] }
 0x337   :  { %v1384_v33 = vadd.f32 %v1376_v30, %v6341_v24  ;;  %v1841_v29 = vld [vmem:[#allocation7 + $0x98] sm:$0xff]  ;;  %v1835_v25 = vld [vmem:[#allocation7 + $0x68] sm:$0xff]  ;;  %v1834_v30 = vld [vmem:[#allocation7 + $0x60] sm:$0xff] }
 0x338   :  { %v1448_v44 = vadd.f32 %v1440_v19, %v1391_v35  ;;  %v6430_v45 = vmax.f32 %v1460_v38, 0.0  ;;  %v1837_v32 = vld [vmem:[#allocation7 + $0x78] sm:$0xff]  ;;  %v1832_v35 = vld [vmem:[#allocation7 + $0x50] sm:$0xff]  ;;  %v1831_v38 = vld [vmem:[#allocation7 + $0x48] sm:$0xff] }
 0x339   :  { %v1441_v10 = vadd.f32 %v1402_v27, %v1384_v33  ;;  %v1833_v33 = vld [vmem:[#allocation7 + $0x58] sm:$0xff]  ;;  %v1826_v27 = vld [vmem:[#allocation7 + $0x20] sm:$0xff] }
 0x33a   :  { %v6433_v54 = vadd.f32 %v6430_v45, %v1065_v22  ;;  %v1461_v46 = vadd.f32 %v6353_v42, %v1448_v44  ;;  %v1829_v19 = vld [vmem:[#allocation7 + $0x38] sm:$0xff]  ;;  %v1828_v22 = vld [vmem:[#allocation7 + $0x30] sm:$0xff] }
 0x33b   :  { %v1454_v24 = vadd.f32 %v6353_v42, %v1441_v10  ;;  %v1859_v42 = vld [vmem:[#allocation7 + $0x128] sm:$0xff]  ;;  %v1825_v44 = vld [vmem:[#allocation7 + $0x18] sm:$0xff] }
 0x33c   :  { %v6439_v41 = vmax.f32 %v1461_v46, 0.0  ;;  %v1827_v10 = vld [vmem:[#allocation7 + $0x28] sm:$0xff] }
 0x33d   :  { %v1462_v20 = vmax.f32 %v1454_v24, 0.0  ;;  %v1823_v46 = vld [vmem:[#allocation7 + $0x8] sm:$0xff]  ;;  %v1822_v24 = vld [vmem:[#allocation7] sm:$0xff] }
 0x33e   :  { %v6444_v40 = vadd.f32 %v6439_v41, %v1066_v47  ;;  %v5831_v47 = vld [vmem:[#allocation2] sm:$0xff] }
 0x33f   :  { %1592 = vmatmul.mubr.f32.vlgmr.msra.gmra.mxu0 %v1462_v20  ;;  %5289 = vmatprep.mubr.f32.mxu1 %v1462_v20  ;;  %v6446_v51 = vadd.f32 %v1462_v20, %v1059_v23  ;;  %v5832_v20 = vld [vmem:[#allocation2 + $0x8] sm:$0xff]  ;;  %v5835_v23 = vld [vmem:[#allocation2 + $0x20] sm:$0xff] }
 0x340   :  { %1871 = vmatpush1.msra.mxu0 %v1867_v63  ;;  %5290 = vmatmul.mubr.f32.vlgmr.msra.gmra.mxu1 %v6360_v5  ;;  %v5833_v63 = vld [vmem:[#allocation2 + $0x10] sm:$0xff] }
 0x341   :  { %1872 = vmatprep.subr.mxu0 %v1865_v34  ;;  %5302 = vmatpush3.msra.mxu1 %v6334_v17  ;;  %v1860_v17 = vld [vmem:[#allocation7 + $0x130] sm:$0xff]  ;;  %v5836_v34 = vld [vmem:[#allocation2 + $0x28] sm:$0xff] }
 0x342   :  { %5292 = vmatprep.mubr.f32.mxu1 %v6374_v4  ;;  %1873 = vmatpush1.msra.mxu0 %v1864_v52  ;;  %v5837_v52 = vld [vmem:[#allocation2 + $0x30] sm:$0xff] }
 0x343   :  { %5303 = vmatprep.subr.mxu1 %v1866_v21  ;;  %1597 = vmatprep.mubr.f32.mxu0 %v6059_v0 }
 0x344   :  { %1874 = vmatprep.subr.mxu0 %v1862_v3  ;;  %5304 = vmatpush3.msra.mxu1 %v1866_v21  ;;  %v5838_v21 = vld [vmem:[#allocation2 + $0x38] sm:$0xff]  ;;  %v2254_v3 = vld [vmem:[#allocation7 + $0x2f0] sm:$0xff] }
 0x345   :  { %1598 = vmatmul.mubr.f32.gmra.mxu0 %v6360_v5  ;;  %5305 = vmatprep.subr.mxu1 %v1863_v1  ;;  %v1853_v5 = vld [vmem:[#allocation7 + $0xf8] sm:$0xff] }
 0x346   :  { %1875 = vmatpush1.msra.mxu0 %v1861_v48  ;;  %5293 = vmatmul.mubr.f32.gmra.mxu1 %v6386_v49  ;;  %v2255_v48 = vld [vmem:[#allocation7 + $0x2f8] sm:$0xff] }
 0x347   :  { %1876 = vmatprep.subr.mxu0 %v1859_v42  ;;  %5306 = vmatpush3.msra.mxu1 %v1863_v1  ;;  %v2253_v1 = vld [vmem:[#allocation7 + $0x2e8] sm:$0xff]  ;;  %v2251_v42 = vld [vmem:[#allocation7 + $0x2d8] sm:$0xff] }
 0x348   :  { %5295 = vmatprep.mubr.f32.mxu1 %v6397_v8  ;;  %1877 = vmatpush1.msra.mxu0 %v1858_v56  ;;  %v2250_v56 = vld [vmem:[#allocation7 + $0x2d0] sm:$0xff] }
 0x349   :  { %5307 = vmatprep.subr.mxu1 %v1860_v17  ;;  %1603 = vmatprep.mubr.f32.mxu0 %v6059_v0 }
 0x34a   :  { %1878 = vmatprep.subr.mxu0 %v1856_v57  ;;  %5308 = vmatpush3.msra.mxu1 %v1860_v17  ;;  %v2252_v17 = vld [vmem:[#allocation7 + $0x2e0] sm:$0xff] }
 0x34b   :  { %1604 = vmatmul.mubr.f32.gmra.mxu0 %v6374_v4  ;;  %5309 = vmatprep.subr.mxu1 %v1857_v58  ;;  %v1847_v4 = vld [vmem:[#allocation7 + $0xc8] sm:$0xff]  ;;  %v2248_v57 = vld [vmem:[#allocation7 + $0x2c0] sm:$0xff] }
 0x34c   :  { %1879 = vmatpush1.msra.mxu0 %v1855_v62  ;;  %5296 = vmatmul.mubr.f32.gmra.mxu1 %v6410_v18  ;;  %v2249_v62 = vld [vmem:[#allocation7 + $0x2c8] sm:$0xff] }
 0x34d   :  { %1880 = vmatprep.subr.mxu0 %v1853_v5  ;;  %5310 = vmatpush3.msra.mxu1 %v1857_v58  ;;  %v2247_v58 = vld [vmem:[#allocation7 + $0x2b8] sm:$0xff]  ;;  %v2245_v5 = vld [vmem:[#allocation7 + $0x2a8] sm:$0xff] }
 0x34e   :  { %5298 = vmatprep.mubr.f32.mxu1 %v6430_v45  ;;  %1881 = vmatpush1.msra.mxu0 %v1852_v14  ;;  %v2244_v14 = vld [vmem:[#allocation7 + $0x2a0] sm:$0xff] }
 0x34f   :  { %5311 = vmatprep.subr.mxu1 %v1854_v59  ;;  %1609 = vmatprep.mubr.f32.mxu0 %v6059_v0 }
 0x350   :  { %1882 = vmatprep.subr.mxu0 %v1850_v50  ;;  %5312 = vmatpush3.msra.mxu1 %v1854_v59  ;;  %v2246_v59 = vld [vmem:[#allocation7 + $0x2b0] sm:$0xff] }
 0x351   :  { %1610 = vmatmul.mubr.f32.gmra.mxu0 %v6386_v49  ;;  %5313 = vmatprep.subr.mxu1 %v1851_v7  ;;  %v1840_v49 = vld [vmem:[#allocation7 + $0x90] sm:$0xff] }
 0x352   :  { %1883 = vmatpush1.msra.mxu0 %v1849_v9  ;;  %5299 = vmatmul.mubr.f32.gmra.mxu1 %v6439_v41  ;;  %v2242_v50 = vld [vmem:[#allocation7 + $0x290] sm:$0xff]  ;;  %v2243_v9 = vld [vmem:[#allocation7 + $0x298] sm:$0xff] }
 0x353   :  { %1884 = vmatprep.subr.mxu0 %v1847_v4  ;;  %5314 = vmatpush3.msra.mxu1 %v1851_v7  ;;  %v2241_v7 = vld [vmem:[#allocation7 + $0x288] sm:$0xff]  ;;  %v2239_v4 = vld [vmem:[#allocation7 + $0x278] sm:$0xff] }
 0x354   :  { %1885 = vmatpush1.msra.mxu0 %v1846_v12  ;;  %5315 = vmatprep.subr.mxu1 %v1848_v13  ;;  %v2238_v12 = vld [vmem:[#allocation7 + $0x270] sm:$0xff] }
 0x355   :  { %1615 = vmatprep.mubr.f32.mxu0 %v6059_v0  ;;  %1886 = vmatprep.subr.mxu0 %v1844_v15  ;;  %v2236_v15 = vld [vmem:[#allocation7 + $0x260] sm:$0xff] }
 0x356   :  { %5316 = vmatpush3.msra.mxu1 %v1848_v13  ;;  %1616 = vmatmul.mubr.f32.gmra.mxu0 %v6397_v8  ;;  %v1836_v8 = vld [vmem:[#allocation7 + $0x70] sm:$0xff]  ;;  %v2240_v13 = vld [vmem:[#allocation7 + $0x280] sm:$0xff] }
 0x357   :  { %1887 = vmatpush1.msra.mxu0 %v1843_v26  ;;  %5317 = vmatprep.subr.mxu1 %v1845_v61  ;;  %v2235_v26 = vld [vmem:[#allocation7 + $0x258] sm:$0xff] }
 0x358   :  { %1888 = vmatprep.subr.mxu0 %v1841_v29  ;;  %5318 = vmatpush3.msra.mxu1 %v1845_v61  ;;  %v2237_v61 = vld [vmem:[#allocation7 + $0x268] sm:$0xff] }
 0x359   :  { %1889 = vmatpush1.msra.mxu0 %v1840_v49  ;;  %5319 = vmatprep.subr.mxu1 %v1842_v60  ;;  %v2233_v29 = vld [vmem:[#allocation7 + $0x248] sm:$0xff]  ;;  %v2232_v49 = vld [vmem:[#allocation7 + $0x240] sm:$0xff] }
 0x35a   :  { %1621 = vmatprep.mubr.f32.mxu0 %v6059_v0  ;;  %1890 = vmatprep.subr.mxu0 %v1838_v31  ;;  %v2230_v31 = vld [vmem:[#allocation7 + $0x230] sm:$0xff] }
 0x35b   :  { %5320 = vmatpush3.msra.mxu1 %v1842_v60  ;;  %1622 = vmatmul.mubr.f32.gmra.mxu0 %v6410_v18  ;;  %v1830_v18 = vld [vmem:[#allocation7 + $0x40] sm:$0xff]  ;;  %v2234_v60 = vld [vmem:[#allocation7 + $0x250] sm:$0xff] }
 0x35c   :  { %1891 = vmatpush1.msra.mxu0 %v1837_v32  ;;  %5321 = vmatprep.subr.mxu1 %v1839_v43  ;;  %v2229_v32 = vld [vmem:[#allocation7 + $0x228] sm:$0xff] }
 0x35d   :  { %1892 = vmatprep.subr.mxu0 %v1835_v25  ;;  %5322 = vmatpush3.msra.mxu1 %v1839_v43  ;;  %v2231_v43 = vld [vmem:[#allocation7 + $0x238] sm:$0xff] }
 0x35e   :  { %1893 = vmatpush1.msra.mxu0 %v1834_v30  ;;  %5323 = vmatprep.subr.mxu1 %v1836_v8  ;;  %v2227_v25 = vld [vmem:[#allocation7 + $0x218] sm:$0xff]  ;;  %v2226_v30 = vld [vmem:[#allocation7 + $0x210] sm:$0xff] }
 0x35f   :  { %1627 = vmatprep.mubr.f32.mxu0 %v6059_v0  ;;  %1894 = vmatprep.subr.mxu0 %v1832_v35  ;;  %v2224_v35 = vld [vmem:[#allocation7 + $0x200] sm:$0xff] }
 0x360   :  { %5324 = vmatpush3.msra.mxu1 %v1836_v8  ;;  %1628 = vmatmul.mubr.f32.gmra.mxu0 %v6430_v45  ;;  %v1824_v45 = vld [vmem:[#allocation7 + $0x10] sm:$0xff]  ;;  %v2228_v8 = vld [vmem:[#allocation7 + $0x220] sm:$0xff] }
 0x361   :  { %1895 = vmatpush1.msra.mxu0 %v1831_v38  ;;  %5325 = vmatprep.subr.mxu1 %v1833_v33  ;;  %v2223_v38 = vld [vmem:[#allocation7 + $0x1f8] sm:$0xff] }
 0x362   :  { %1896 = vmatprep.subr.mxu0 %v1829_v19  ;;  %5326 = vmatpush3.msra.mxu1 %v1833_v33  ;;  %v2225_v33 = vld [vmem:[#allocation7 + $0x208] sm:$0xff] }
 0x363   :  { %1897 = vmatpush1.msra.mxu0 %v1828_v22  ;;  %5327 = vmatprep.subr.mxu1 %v1830_v18  ;;  %v2221_v19 = vld [vmem:[#allocation7 + $0x1e8] sm:$0xff]  ;;  %v2220_v22 = vld [vmem:[#allocation7 + $0x1e0] sm:$0xff] }
 0x364   :  { %1633 = vmatprep.mubr.f32.mxu0 %v6059_v0  ;;  %1898 = vmatprep.subr.mxu0 %v1826_v27  ;;  %v2218_v27 = vld [vmem:[#allocation7 + $0x1d0] sm:$0xff] }
 0x365   :  { %5328 = vmatpush3.msra.mxu1 %v1830_v18  ;;  %1634 = vmatmul.mubr.f32.gmra.mxu0 %v6439_v41  ;;  %v5834_v41 = vld [vmem:[#allocation2 + $0x18] sm:$0xff]  ;;  %v2222_v18 = vld [vmem:[#allocation7 + $0x1f0] sm:$0xff] }
 0x366   :  { %1899 = vmatpush1.msra.mxu0 %v1825_v44  ;;  %5329 = vmatprep.subr.mxu1 %v1827_v10  ;;  %v2217_v44 = vld [vmem:[#allocation7 + $0x1c8] sm:$0xff] }
 0x367   :  { %1900 = vmatprep.subr.mxu0 %v1823_v46  ;;  %5330 = vmatpush3.msra.mxu1 %v1827_v10  ;;  %v2219_v10 = vld [vmem:[#allocation7 + $0x1d8] sm:$0xff] }
 0x368   :  { %1901 = vmatpush1.msra.mxu0 %v1822_v24  ;;  %5331 = vmatprep.subr.mxu1 %v1824_v45  ;;  %v2215_v46 = vld [vmem:[#allocation7 + $0x1b8] sm:$0xff]  ;;  %v2214_v24 = vld [vmem:[#allocation7 + $0x1b0] sm:$0xff] }
 0x369   :  { %1934 = vmatprep.mubr.f32.mxu0 %v6059_v0  ;;  %5332 = vmatpush3.msra.mxu1 %v1824_v45  ;;  %v2216_v45 = vld [vmem:[#allocation7 + $0x1c0] sm:$0xff] }
 0x36a   :  { %5333 = vmatprep.mubr.f32.mxu1 %v5831_v47  ;;  %1935 = vmatmul.mubr.f32.vlgmr.msra.gmra.mxu0 %v5831_v47  ;;  %v2212_v47 = vld [vmem:[#allocation7 + $0x1a0] sm:$0xff] }
 0x36b   :  { %5334 = vmatmul.mubr.f32.vlgmr.msra.gmra.mxu1 %v5832_v20  ;;  %1940 = vmatprep.mubr.f32.mxu0 %v6059_v0 }
 0x36c   :  { %5336 = vmatprep.mubr.f32.mxu1 %v5833_v63  ;;  %2256 = vmatprep.subr.mxu0 %v2254_v3 }
 0x36d   :  { %2257 = vmatpush1.msra.mxu0 %v2253_v1  ;;  %5345 = vmatprep.subr.mxu1 %v2255_v48  ;;  %v4641_v1 = vld [vmem:[#allocation14 + $0x3] ss:$0 sm:$0xff] }
 0x36e   :  { %1941 = vmatmul.mubr.f32.gmra.mxu0 %v5832_v20  ;;  %2258 = vmatprep.subr.mxu0 %v2251_v42  ;;  %v2211_v20 = vld [vmem:[#allocation7 + $0x198] sm:$0xff] }
 0x36f   :  { %5337 = vmatmul.mubr.f32.gmra.mxu1 %v5834_v41  ;;  %1946 = vmatprep.mubr.f32.mxu0 %v6059_v0 }
 0x370   :  { %5339 = vmatprep.mubr.f32.mxu1 %v5835_v23  ;;  %5346 = vmatpush3.msra.mxu1 %v2255_v48 }
 0x371   :  { %2259 = vmatpush1.msra.mxu0 %v2250_v56  ;;  %5347 = vmatprep.subr.mxu1 %v2252_v17 }
 0x372   :  { %1947 = vmatmul.mubr.f32.gmra.mxu0 %v5833_v63  ;;  %2260 = vmatprep.subr.mxu0 %v2248_v57  ;;  %v2213_v63 = vld [vmem:[#allocation7 + $0x1a8] sm:$0xff] }
 0x373   :  { %1952 = vmatprep.mubr.f32.mxu0 %v6059_v0  ;;  %5340 = vmatmul.mubr.f32.gmra.mxu1 %v5836_v34 }
 0x374   :  { %5342 = vmatprep.mubr.f32.mxu1 %v5837_v52  ;;  %5348 = vmatpush3.msra.mxu1 %v2252_v17 }
 0x375   :  { %2261 = vmatpush1.msra.mxu0 %v2247_v58  ;;  %5349 = vmatprep.subr.mxu1 %v2249_v62 }
 0x376   :  { %1953 = vmatmul.mubr.f32.gmra.mxu0 %v5834_v41  ;;  %2262 = vmatprep.subr.mxu0 %v2245_v5  ;;  %v2209_v41 = vld [vmem:[#allocation7 + $0x188] sm:$0xff] }
 0x377   :  { %1958 = vmatprep.mubr.f32.mxu0 %v6059_v0  ;;  %5343 = vmatmul.mubr.f32.gmra.mxu1 %v5838_v21 }
 0x378   :  { %5350 = vmatpush3.msra.mxu1 %v2249_v62  ;;  %2263 = vmatpush1.msra.mxu0 %v2244_v14 }
 0x379   :  { %5351 = vmatprep.subr.mxu1 %v2246_v59  ;;  %2264 = vmatprep.subr.mxu0 %v2242_v50 }
 0x37a   :  { %1959 = vmatmul.mubr.f32.gmra.mxu0 %v5835_v23  ;;  %5352 = vmatpush3.msra.mxu1 %v2246_v59  ;;  %v2208_v23 = vld [vmem:[#allocation7 + $0x180] sm:$0xff] }
 0x37b   :  { %1964 = vmatprep.mubr.f32.mxu0 %v6059_v0  ;;  %2265 = vmatpush1.msra.mxu0 %v2241_v7 }
 0x37c   :  { %5353 = vmatprep.subr.mxu1 %v2243_v9  ;;  %2266 = vmatprep.subr.mxu0 %v2239_v4 }
 0x37d   :  { %5354 = vmatpush3.msra.mxu1 %v2243_v9  ;;  %2267 = vmatpush1.msra.mxu0 %v2238_v12 }
 0x37e   :  { %1965 = vmatmul.mubr.f32.gmra.mxu0 %v5836_v34  ;;  %5355 = vmatprep.subr.mxu1 %v2240_v13  ;;  %v2210_v34 = vld [vmem:[#allocation7 + $0x190] sm:$0xff] }
 0x37f   :  { %1970 = vmatprep.mubr.f32.mxu0 %v6059_v0  ;;  %2268 = vmatprep.subr.mxu0 %v2236_v15 }
 0x380   :  { %5356 = vmatpush3.msra.mxu1 %v2240_v13  ;;  %2269 = vmatpush1.msra.mxu0 %v2235_v26 }
 0x381   :  { %5357 = vmatprep.subr.mxu1 %v2237_v61  ;;  %2270 = vmatprep.subr.mxu0 %v2233_v29 }
 0x382   :  { %1971 = vmatmul.mubr.f32.gmra.mxu0 %v5837_v52  ;;  %5358 = vmatpush3.msra.mxu1 %v2237_v61 }
 0x383   :  { %1976 = vmatprep.mubr.f32.mxu0 %v6059_v0  ;;  %2271 = vmatpush1.msra.mxu0 %v2232_v49 }
 0x384   :  { %5359 = vmatprep.subr.mxu1 %v2234_v60  ;;  %2272 = vmatprep.subr.mxu0 %v2230_v31 }
 0x385   :  { %5360 = vmatpush3.msra.mxu1 %v2234_v60  ;;  %2273 = vmatpush1.msra.mxu0 %v2229_v32 }
 0x386   :  { %1977 = vmatmul.mubr.f32.gmra.mxu0 %v5838_v21  ;;  %5361 = vmatprep.subr.mxu1 %v2231_v43 }
 0x387   :  { %2320 = vmatprep.mubr.f32.mxu0 %v6059_v0  ;;  %2274 = vmatprep.subr.mxu0 %v2227_v25 }
 0x388   :  { %5362 = vmatpush3.msra.mxu1 %v2231_v43  ;;  %2275 = vmatpush1.msra.mxu0 %v2226_v30 }
 0x389   :  { %5363 = vmatprep.subr.mxu1 %v2228_v8  ;;  %2276 = vmatprep.subr.mxu0 %v2224_v35 }
 0x38a   :  { %5364 = vmatpush3.msra.mxu1 %v2228_v8  ;;  %2277 = vmatpush1.msra.mxu0 %v2223_v38 }
 0x38b   :  { %5365 = vmatprep.subr.mxu1 %v2225_v33  ;;  %2278 = vmatprep.subr.mxu0 %v2221_v19 }
 0x38c   :  { %5366 = vmatpush3.msra.mxu1 %v2225_v33  ;;  %2279 = vmatpush1.msra.mxu0 %v2220_v22 }
 0x38d   :  { %5367 = vmatprep.subr.mxu1 %v2222_v18  ;;  %2280 = vmatprep.subr.mxu0 %v2218_v27 }
 0x38e   :  { %5368 = vmatpush3.msra.mxu1 %v2222_v18  ;;  %2281 = vmatpush1.msra.mxu0 %v2217_v44 }
 0x38f   :  { %5369 = vmatprep.subr.mxu1 %v2219_v10  ;;  %2282 = vmatprep.subr.mxu0 %v2215_v46 }
 0x390   :  { %5370 = vmatpush3.msra.mxu1 %v2219_v10  ;;  %2283 = vmatpush1.msra.mxu0 %v2214_v24 }
 0x391   :  { %5371 = vmatprep.subr.mxu1 %v2216_v45  ;;  %2284 = vmatprep.subr.mxu0 %v2212_v47 }
 0x392   :  { %5372 = vmatpush3.msra.mxu1 %v2216_v45  ;;  %2285 = vmatpush1.msra.mxu0 %v2211_v20 }
 0x393   :  { %5373 = vmatprep.subr.mxu1 %v2213_v63  ;;  %2286 = vmatprep.subr.mxu0 %v2209_v41 }
 0x394   :  { %5374 = vmatpush3.msra.mxu1 %v2213_v63  ;;  %2287 = vmatpush1.msra.mxu0 %v2208_v23 }
 0x395   :  { %5375 = vmatprep.subr.mxu1 %v2210_v34 }
 0x396   :  { %5376 = vmatpush3.msra.mxu1 %v2210_v34 }
 0x3ff   :  { %v1593_v52 = vpop.f32.mrf.mxu0 }
 0x400   :  { %v5291_v21 = vpop.f32.mrf.mxu1 }
 0x401   :  { %v1595_v3 = vpop.f32.mrf.mxu0 }
 0x402   :  { %v1785_v48 = vadd.f32 %v5291_v21, %v1595_v3  ;;  %v1706_v42 = vpop.f32.mrf.mxu1 }
 0x404   :  { %v1798_v56 = vadd.f32 %v4641_v1, %v1785_v48 }
 0x405   :  { %v1599_v17 = vpop.f32.mrf.mxu0 }
 0x406   :  { %v1806_v57 = vmax.f32 %v1798_v56, 0.0  ;;  %v5294_v58 = vpop.f32.mrf.mxu1 }
 0x407   :  { %v1601_v62 = vpop.f32.mrf.mxu0 }
 0x408   :  { %v6480_v5 = vadd.f32 %v1806_v57, %v6446_v51  ;;  %v1762_v14 = vadd.f32 %v1601_v62, %v1593_v52  ;;  %v1716_v59 = vpop.f32.mrf.mxu1 }
 0x40a   :  { %v1786_v50 = vadd.f32 %v1762_v14, %v1716_v59 }
 0x40b   :  { %v1605_v7 = vpop.f32.mrf.mxu0 }
 0x40c   :  { %v1799_v9 = vadd.f32 %v4641_v1, %v1786_v50  ;;  %v5297_v4 = vpop.f32.mrf.mxu1 }
 0x40d   :  { %v1607_v12 = vpop.f32.mrf.mxu0 }
 0x40e   :  { %v1807_v13 = vmax.f32 %v1799_v9, 0.0  ;;  %v1763_v15 = vadd.f32 %v1607_v12, %v1599_v17  ;;  %v1726_v26 = vpop.f32.mrf.mxu1 }
 0x410   :  { %v6483_v61 = vadd.f32 %v1807_v13, %v6370_v28  ;;  %v1787_v29 = vadd.f32 %v5294_v58, %v1763_v15 }
 0x411   :  { %v1611_v49 = vpop.f32.mrf.mxu0 }
 0x412   :  { %v1800_v60 = vadd.f32 %v4641_v1, %v1787_v29  ;;  %v5300_v19 = vpop.f32.mrf.mxu1 }
 0x413   :  { %v1613_v31 = vpop.f32.mrf.mxu0 }
 0x414   :  { %v1808_v32 = vmax.f32 %v1800_v60, 0.0  ;;  %v1764_v51 = vadd.f32 %v1613_v31, %v1605_v7  ;;  %v1736_v10 = vpop.f32.mrf.mxu1 }
 0x416   :  { %v1801_v43 = vadd.f32 %v4641_v1, %v1764_v51  ;;  %v1617_v25 = vpop.f32.mrf.mxu0  ;;  %v6486_v30 = vadd.f32 %v1808_v32, %v6380_v39 }
 0x418   :  { %v1809_v8 = vmax.f32 %v1801_v43, 0.0  ;;  %v1619_v35 = vpop.f32.mrf.mxu0 }
 0x419   :  { %v1789_v38 = vadd.f32 %v5297_v4, %v1619_v35 }
 0x41a   :  { %v6489_v33 = vadd.f32 %v1809_v8, %v6390_v55 }
 0x41b   :  { %v1802_v28 = vadd.f32 %v4641_v1, %v1789_v38  ;;  %v1623_v22 = vpop.f32.mrf.mxu0 }
 0x41d   :  { %v1810_v18 = vmax.f32 %v1802_v28, 0.0  ;;  %v1625_v27 = vpop.f32.mrf.mxu0 }
 0x41e   :  { %v1766_v44 = vadd.f32 %v1625_v27, %v1617_v25 }
 0x41f   :  { %v6492_v46 = vadd.f32 %v1810_v18, %v6406_v16 }
 0x420   :  { %v1790_v24 = vadd.f32 %v1766_v44, %v1736_v10  ;;  %v1629_v45 = vpop.f32.mrf.mxu0 }
 0x422   :  { %v1803_v39 = vadd.f32 %v4641_v1, %v1790_v24  ;;  %v1631_v47 = vpop.f32.mrf.mxu0 }
 0x423   :  { %v1767_v20 = vadd.f32 %v1631_v47, %v1623_v22 }
 0x424   :  { %v1811_v63 = vmax.f32 %v1803_v39, 0.0 }
 0x425   :  { %v1791_v41 = vadd.f32 %v5300_v19, %v1767_v20  ;;  %v1635_v23 = vpop.f32.mrf.mxu0 }
 0x426   :  { %v6495_v55 = vadd.f32 %v1811_v63, %v6419_v37 }
 0x427   :  { %v1804_v34 = vadd.f32 %v4641_v1, %v1791_v41  ;;  %v1637_v52 = vpop.f32.mrf.mxu0 }
 0x428   :  { %v1768_v21 = vadd.f32 %v1637_v52, %v1629_v45 }
 0x429   :  { %v1812_v3 = vmax.f32 %v1804_v34, 0.0 }
 0x42a   :  { %v1805_v48 = vadd.f32 %v4641_v1, %v1768_v21  ;;  %v1936_v42 = vpop.f32.mrf.mxu0 }
 0x42b   :  { %v6498_v16 = vadd.f32 %v1812_v3, %v6433_v54  ;;  %v5335_v62 = vpop.f32.mrf.mxu1  ;;  %v2098_v49 = vrot.slane %v1936_v42, 7  ;;  %v4642_v42 = vld [vmem:[#allocation14 + $0x4] ss:$0 sm:$0xff] }
 0x42c   :  { %v1813_v56 = vmax.f32 %v1805_v48, 0.0  ;;  %v1938_v17 = vpop.f32.mrf.mxu0  ;;  %v2146_v32 = vrot.slane %v5335_v62, 1 }
 0x42d   :  { %v6503_v37 = vpop.f32.mrf.mxu1 }
 0x42e   :  { %v6501_v57 = vadd.f32 %v1813_v56, %v6444_v40  ;;  %v1942_v58 = vpop.f32.mrf.mxu0  ;;  %v2145_v44 = vrot.slane %v6503_v37, 1 }
 0x42f   :  { %v5338_v9 = vpop.f32.mrf.mxu1  ;;  %v2099_v15 = vrot.slane %v1942_v58, 7 }
 0x430   :  { %v1944_v14 = vpop.f32.mrf.mxu0  ;;  %v2150_v8 = vrot.slane %v5338_v9, 1  ;;  %v2147_v9 = vsel %vm584_vm1, %v2145_v44, %v2146_v32 }
 0x431   :  { %v2059_v12 = vpop.f32.mrf.mxu1  ;;  %v2100_v51 = vsel %vm528_vm0, %v2098_v49, %v2099_v15 }
 0x432   :  { %v1948_v59 = vpop.f32.mrf.mxu0  ;;  %v2148_v43 = vrot.slane %v2059_v12, 1  ;;  %v2130_v18 = vadd.f32 %v2100_v51, %v1944_v14 }
 0x433   :  { %v5341_v54 = vpop.f32.mrf.mxu1  ;;  %v2101_v29 = vrot.slane %v1948_v59, 7 }
 0x434   :  { %v1950_v50 = vpop.f32.mrf.mxu0  ;;  %v2149_v10 = vsel %vm584_vm1, %v2146_v32, %v2148_v43  ;;  %v2151_v39 = vsel %vm584_vm1, %v2148_v43, %v2150_v8  ;;  %v2154_v23 = vrot.slane %v5341_v54, 1 }
 0x435   :  { %v2069_v60 = vpop.f32.mrf.mxu1  ;;  %v2102_v35 = vsel %vm528_vm0, %v2099_v15, %v2101_v29  ;;  %v2179_v3 = vadd.f32 %v2149_v10, %v2130_v18 }
 0x436   :  { %v1954_v7 = vpop.f32.mrf.mxu0  ;;  %v2152_v28 = vrot.slane %v2069_v60, 1  ;;  %v2131_v24 = vadd.f32 %v2102_v35, %v1950_v50 }
 0x437   :  { %v2103_v38 = vrot.slane %v1954_v7, 7  ;;  %v5344_v19 = vpop.f32.mrf.mxu1  ;;  %v2192_v15 = vadd.f32 %v4642_v42, %v2179_v3  ;;  %v2644_v3 = vld [vmem:[#allocation7 + $0x450] sm:$0xff] }
 0x438   :  { %v1956_v4 = vpop.f32.mrf.mxu0  ;;  %v2153_v34 = vsel %vm584_vm1, %v2150_v8, %v2152_v28  ;;  %v2180_v56 = vadd.f32 %v2151_v39, %v2131_v24  ;;  %v2158_v12 = vrot.slane %v5344_v19, 1 }
 0x439   :  { %v2104_v47 = vsel %vm528_vm0, %v2101_v29, %v2103_v38  ;;  %v2079_v63 = vpop.f32.mrf.mxu1  ;;  %v2173_v59 = vsel %vm613_vm2, %v2153_v34, 0.0  ;;  %v6530_v35 = vmax.f32 %v2192_v15, 0.0  ;;  %v2647_v34 = vld [vmem:[#allocation7 + $0x468] sm:$0xff]  ;;  %v2629_v15 = vld [vmem:[#allocation7 + $0x3d8] sm:$0xff] }
 0x43a   :  { %v1960_v1 = vpop.f32.mrf.mxu0  ;;  %v2132_v58 = vadd.f32 %v2104_v47, %v1956_v4  ;;  %v2156_v62 = vrot.slane %v2079_v63, 1  ;;  %v2193_v60 = vadd.f32 %v4642_v42, %v2180_v56  ;;  %v2169_v32 = vsel %vm584_vm1, %v2158_v12, %v2145_v44  ;;  %v2641_v56 = vld [vmem:[#allocation7 + $0x438] sm:$0xff] }
 0x43b   :  { %v2105_v31 = vrot.slane %v1960_v1, 7  ;;  %v2155_v1 = vsel %vm584_vm1, %v2152_v28, %v2154_v23  ;;  %v2177_v18 = vsel %vm617_vm5, %v2169_v32, 0.0  ;;  %v2617_v32 = vld [vmem:[#allocation7 + $0x378] sm:$0xff] }
 0x43c   :  { %v1962_v13 = vpop.f32.mrf.mxu0 }
 0x43d   :  { %v2106_v27 = vsel %vm528_vm0, %v2103_v38, %v2105_v31 }
 0x43e   :  { %v1966_v26 = vpop.f32.mrf.mxu0  ;;  %v2125_v52 = vsel %vm556_vm3, %v2106_v27, 0.0 }
 0x43f   :  { %v2107_v20 = vrot.slane %v1966_v26, 7  ;;  %v2133_v37 = vadd.f32 %v2125_v52, %v1962_v13  ;;  %v2181_v26 = vadd.f32 %v2173_v59, %v2132_v58  ;;  %v2649_v52 = vld [vmem:[#allocation7 + $0x478] sm:$0xff]  ;;  %v2643_v58 = vld [vmem:[#allocation7 + $0x448] sm:$0xff]  ;;  %v2640_v59 = vld [vmem:[#allocation7 + $0x430] sm:$0xff] }
 0x440   :  { %v1968_v40 = vpop.f32.mrf.mxu0  ;;  %5389 = vmatprep.subr.mxu1 %v2649_v52 }
 0x441   :  { %v2108_v50 = vsel %vm528_vm0, %v2105_v31, %v2107_v20  ;;  %v2182_v51 = vadd.f32 %v2155_v1, %v2133_v37  ;;  %v2159_v31 = vsel %vm584_vm1, %v2156_v62, %v2158_v12  ;;  %v2636_v37 = vld [vmem:[#allocation7 + $0x410] sm:$0xff]  ;;  %v2634_v12 = vld [vmem:[#allocation7 + $0x400] sm:$0xff] }
 0x442   :  { %v1972_v25 = vpop.f32.mrf.mxu0  ;;  %v2134_v29 = vadd.f32 %v2108_v50, %v1968_v40  ;;  %v2194_v40 = vadd.f32 %v4642_v42, %v2181_v26  ;;  %v2635_v50 = vld [vmem:[#allocation7 + $0x408] sm:$0xff]  ;;  %v2632_v1 = vld [vmem:[#allocation7 + $0x3f0] sm:$0xff] }
 0x443   :  { %v2109_v21 = vrot.slane %v1972_v25, 7  ;;  %v2195_v27 = vadd.f32 %v4642_v42, %v2182_v51  ;;  %v2627_v26 = vld [vmem:[#allocation7 + $0x3c8] sm:$0xff] }
 0x444   :  { %v1974_v22 = vpop.f32.mrf.mxu0  ;;  %v6541_v10 = vmax.f32 %v2194_v40, 0.0  ;;  %v2623_v51 = vld [vmem:[#allocation7 + $0x3a8] sm:$0xff]  ;;  %v2614_v40 = vld [vmem:[#allocation7 + $0x360] sm:$0xff] }
 0x445   :  { %v2110_v54 = vsel %vm528_vm0, %v2107_v20, %v2109_v21 }
 0x446   :  { %v1978_v45 = vpop.f32.mrf.mxu0  ;;  %v2135_v43 = vadd.f32 %v2110_v54, %v1974_v22  ;;  %v6536_v22 = vmax.f32 %v2193_v60, 0.0  ;;  %v2630_v54 = vld [vmem:[#allocation7 + $0x3e0] sm:$0xff]  ;;  %v2624_v60 = vld [vmem:[#allocation7 + $0x3b0] sm:$0xff] }
 0x447   :  { %v2089_v41 = vrot.slane %v1978_v45, 7  ;;  %v6544_v45 = vmax.f32 %v2195_v27, 0.0  ;;  %v2611_v27 = vld [vmem:[#allocation7 + $0x348] sm:$0xff] }
 0x448   :  { %v1980_v25 = vpop.f32.mrf.mxu0  ;;  %v2184_v28 = vadd.f32 %v2159_v31, %v2135_v43  ;;  %v2625_v43 = vld [vmem:[#allocation7 + $0x3b8] sm:$0xff]  ;;  %v2618_v31 = vld [vmem:[#allocation7 + $0x380] sm:$0xff] }
 0x449   :  { %v2120_v48 = vsel %vm528_vm0, %v2089_v41, %v2098_v49  ;;  %v2157_v49 = vsel %vm584_vm1, %v2154_v23, %v2156_v62  ;;  %v2648_v23 = vld [vmem:[#allocation7 + $0x470] sm:$0xff]  ;;  %v2639_v62 = vld [vmem:[#allocation7 + $0x428] sm:$0xff] }
 0x44a   :  { %v2121_v14 = vsel %vm552_vm4, %v2120_v48, 0.0  ;;  %v2183_v38 = vadd.f32 %v2157_v49, %v2134_v29  ;;  %v2197_v39 = vadd.f32 %v4642_v42, %v2184_v28  ;;  %2650 = vmatprep.subr.mxu0 %v2648_v23  ;;  %v2646_v48 = vld [vmem:[#allocation7 + $0x460] sm:$0xff]  ;;  %v2628_v49 = vld [vmem:[#allocation7 + $0x3d0] sm:$0xff] }
 0x44b   :  { %v2129_v7 = vadd.f32 %v2121_v14, %v1938_v17  ;;  %v2111_v17 = vsel %vm528_vm0, %v2109_v21, %v2089_v41  ;;  %v2645_v21 = vld [vmem:[#allocation7 + $0x458] sm:$0xff]  ;;  %v2638_v14 = vld [vmem:[#allocation7 + $0x420] sm:$0xff]  ;;  %v2616_v28 = vld [vmem:[#allocation7 + $0x370] sm:$0xff]  ;;  %vm7146_vm0 = vcmp.ge.s32.totalorder %v6180_v6, 4 }
 0x44c   :  { %v2136_v19 = vadd.f32 %v2111_v17, %v1980_v25  ;;  %v2196_v24 = vadd.f32 %v4642_v42, %v2183_v38  ;;  %v6552_v63 = vmax.f32 %v2197_v39, 0.0  ;;  %v2626_v29 = vld [vmem:[#allocation7 + $0x3c0] sm:$0xff]  ;;  %v2620_v25 = vld [vmem:[#allocation7 + $0x390] sm:$0xff]  ;;  %v2619_v38 = vld [vmem:[#allocation7 + $0x388] sm:$0xff] }
 0x44d   :  { %v2178_v4 = vadd.f32 %v2147_v9, %v2129_v7  ;;  %v2637_v7 = vld [vmem:[#allocation7 + $0x418] sm:$0xff]  ;;  %v2622_v17 = vld [vmem:[#allocation7 + $0x3a0] sm:$0xff]  ;;  %v2608_v39 = vld [vmem:[#allocation7 + $0x330] sm:$0xff] }
 0x44e   :  { %v2185_v44 = vadd.f32 %v2177_v18, %v2136_v19  ;;  %v6549_v47 = vmax.f32 %v2196_v24, 0.0  ;;  %v2633_v9 = vld [vmem:[#allocation7 + $0x3f8] sm:$0xff]  ;;  %v2615_v19 = vld [vmem:[#allocation7 + $0x368] sm:$0xff]  ;;  %v2612_v18 = vld [vmem:[#allocation7 + $0x350] sm:$0xff] }
 0x44f   :  { %v2191_v13 = vadd.f32 %v4642_v42, %v2178_v4  ;;  %v2631_v4 = vld [vmem:[#allocation7 + $0x3e8] sm:$0xff]  ;;  %v2609_v24 = vld [vmem:[#allocation7 + $0x338] sm:$0xff]  ;;  %v2606_v23 = vld [vmem:[#allocation7 + $0x320] sm:$0xff] }
 0x450   :  { %v2198_v20 = vadd.f32 %v4642_v42, %v2185_v44  ;;  %v2642_v42 = vld [vmem:[#allocation7 + $0x440] sm:$0xff]  ;;  %v2613_v44 = vld [vmem:[#allocation7 + $0x358] sm:$0xff] }
 0x451   :  { %v6528_v8 = vmax.f32 %v2191_v13, 0.0  ;;  %v2621_v13 = vld [vmem:[#allocation7 + $0x398] sm:$0xff] }
 0x452   :  { %v6557_v41 = vmax.f32 %v2198_v20, 0.0  ;;  %v2610_v20 = vld [vmem:[#allocation7 + $0x340] sm:$0xff] }
 0x453   :  { %2321 = vmatmul.mubr.f32.vlgmr.msra.gmra.mxu0 %v6528_v8  ;;  %5377 = vmatprep.mubr.f32.mxu1 %v6528_v8 }
 0x454   :  { %5378 = vmatmul.mubr.f32.vlgmr.msra.gmra.mxu1 %v6530_v35  ;;  %2326 = vmatprep.mubr.f32.mxu0 %v6059_v0 }
 0x455   :  { %5380 = vmatprep.mubr.f32.mxu1 %v6536_v22  ;;  %2651 = vmatpush1.msra.mxu0 %v2647_v34  ;;  %v2605_v34 = vld [vmem:[#allocation7 + $0x318] sm:$0xff] }
 0x456   :  { %2652 = vmatprep.subr.mxu0 %v2645_v21  ;;  %5390 = vmatpush3.msra.mxu1 %v2649_v52  ;;  %v2607_v52 = vld [vmem:[#allocation7 + $0x328] sm:$0xff] }
 0x457   :  { %2327 = vmatmul.mubr.f32.gmra.mxu0 %v6530_v35  ;;  %5391 = vmatprep.subr.mxu1 %v2646_v48  ;;  %v2603_v21 = vld [vmem:[#allocation7 + $0x308] sm:$0xff] }
 0x458   :  { %5381 = vmatmul.mubr.f32.gmra.mxu1 %v6541_v10  ;;  %2332 = vmatprep.mubr.f32.mxu0 %v6059_v0 }
 0x459   :  { %5383 = vmatprep.mubr.f32.mxu1 %v6544_v45  ;;  %2653 = vmatpush1.msra.mxu0 %v2644_v3  ;;  %v2602_v3 = vld [vmem:[#allocation7 + $0x300] sm:$0xff] }
 0x45a   :  { %2654 = vmatprep.subr.mxu0 %v2642_v42  ;;  %5392 = vmatpush3.msra.mxu1 %v2646_v48  ;;  %v2604_v48 = vld [vmem:[#allocation7 + $0x310] sm:$0xff] }
 0x45b   :  { %2333 = vmatmul.mubr.f32.gmra.mxu0 %v6536_v22  ;;  %5393 = vmatprep.subr.mxu1 %v2643_v58 }
 0x45c   :  { %5384 = vmatmul.mubr.f32.gmra.mxu1 %v6549_v47  ;;  %2338 = vmatprep.mubr.f32.mxu0 %v6059_v0 }
 0x45d   :  { %5386 = vmatprep.mubr.f32.mxu1 %v6552_v63  ;;  %2655 = vmatpush1.msra.mxu0 %v2641_v56 }
 0x45e   :  { %2656 = vmatprep.subr.mxu0 %v2639_v62  ;;  %5394 = vmatpush3.msra.mxu1 %v2643_v58 }
 0x45f   :  { %2339 = vmatmul.mubr.f32.gmra.mxu0 %v6541_v10  ;;  %5395 = vmatprep.subr.mxu1 %v2640_v59 }
 0x460   :  { %5387 = vmatmul.mubr.f32.gmra.mxu1 %v6557_v41  ;;  %2344 = vmatprep.mubr.f32.mxu0 %v6059_v0 }
 0x461   :  { %2657 = vmatpush1.msra.mxu0 %v2638_v14  ;;  %5396 = vmatpush3.msra.mxu1 %v2640_v59 }
 0x462   :  { %2658 = vmatprep.subr.mxu0 %v2636_v37  ;;  %5397 = vmatprep.subr.mxu1 %v2637_v7 }
 0x463   :  { %2345 = vmatmul.mubr.f32.gmra.mxu0 %v6544_v45  ;;  %5398 = vmatpush3.msra.mxu1 %v2637_v7 }
 0x464   :  { %2350 = vmatprep.mubr.f32.mxu0 %v6059_v0  ;;  %2659 = vmatpush1.msra.mxu0 %v2635_v50 }
 0x465   :  { %2660 = vmatprep.subr.mxu0 %v2633_v9  ;;  %5399 = vmatprep.subr.mxu1 %v2634_v12 }
 0x466   :  { %2661 = vmatpush1.msra.mxu0 %v2632_v1  ;;  %5400 = vmatpush3.msra.mxu1 %v2634_v12 }
 0x467   :  { %2351 = vmatmul.mubr.f32.gmra.mxu0 %v6549_v47  ;;  %2662 = vmatprep.subr.mxu0 %v2630_v54 }
 0x468   :  { %2356 = vmatprep.mubr.f32.mxu0 %v6059_v0  ;;  %2663 = vmatpush1.msra.mxu0 %v2629_v15 }
 0x469   :  { %5401 = vmatprep.subr.mxu1 %v2631_v4  ;;  %2664 = vmatprep.subr.mxu0 %v2627_v26 }
 0x46a   :  { %5402 = vmatpush3.msra.mxu1 %v2631_v4  ;;  %2665 = vmatpush1.msra.mxu0 %v2626_v29 }
 0x46b   :  { %2357 = vmatmul.mubr.f32.gmra.mxu0 %v6552_v63  ;;  %5403 = vmatprep.subr.mxu1 %v2628_v49 }
 0x46c   :  { %2362 = vmatprep.mubr.f32.mxu0 %v6059_v0  ;;  %2666 = vmatprep.subr.mxu0 %v2624_v60 }
 0x46d   :  { %5404 = vmatpush3.msra.mxu1 %v2628_v49  ;;  %2667 = vmatpush1.msra.mxu0 %v2623_v51 }
 0x46e   :  { %5405 = vmatprep.subr.mxu1 %v2625_v43  ;;  %2668 = vmatprep.subr.mxu0 %v2621_v13 }
 0x46f   :  { %2363 = vmatmul.mubr.f32.gmra.mxu0 %v6557_v41  ;;  %5406 = vmatpush3.msra.mxu1 %v2625_v43 }
 0x470   :  { %2714 = vmatprep.mubr.f32.mxu0 %v6059_v0  ;;  %2669 = vmatpush1.msra.mxu0 %v2620_v25 }
 0x471   :  { %5407 = vmatprep.subr.mxu1 %v2622_v17  ;;  %2670 = vmatprep.subr.mxu0 %v2618_v31 }
 0x472   :  { %5408 = vmatpush3.msra.mxu1 %v2622_v17  ;;  %2671 = vmatpush1.msra.mxu0 %v2617_v32 }
 0x473   :  { %5409 = vmatprep.subr.mxu1 %v2619_v38  ;;  %2672 = vmatprep.subr.mxu0 %v2615_v19 }
 0x474   :  { %5410 = vmatpush3.msra.mxu1 %v2619_v38  ;;  %2673 = vmatpush1.msra.mxu0 %v2614_v40 }
 0x475   :  { %5411 = vmatprep.subr.mxu1 %v2616_v28  ;;  %2674 = vmatprep.subr.mxu0 %v2612_v18 }
 0x476   :  { %5412 = vmatpush3.msra.mxu1 %v2616_v28  ;;  %2675 = vmatpush1.msra.mxu0 %v2611_v27 }
 0x477   :  { %5413 = vmatprep.subr.mxu1 %v2613_v44  ;;  %2676 = vmatprep.subr.mxu0 %v2609_v24 }
 0x478   :  { %5414 = vmatpush3.msra.mxu1 %v2613_v44  ;;  %2677 = vmatpush1.msra.mxu0 %v2608_v39 }
 0x479   :  { %5415 = vmatprep.subr.mxu1 %v2610_v20  ;;  %2678 = vmatprep.subr.mxu0 %v2606_v23 }
 0x47a   :  { %5416 = vmatpush3.msra.mxu1 %v2610_v20  ;;  %2679 = vmatpush1.msra.mxu0 %v2605_v34 }
 0x47b   :  { %5417 = vmatprep.subr.mxu1 %v2607_v52  ;;  %2680 = vmatprep.subr.mxu0 %v2603_v21 }
 0x47c   :  { %5418 = vmatpush3.msra.mxu1 %v2607_v52  ;;  %2681 = vmatpush1.msra.mxu0 %v2602_v3 }
 0x47d   :  { %5419 = vmatprep.subr.mxu1 %v2604_v48 }
 0x47e   :  { %5420 = vmatpush3.msra.mxu1 %v2604_v48 }
 0x513   :  { %v2322_v42 = vpop.f32.mrf.mxu0 }
 0x514   :  { %v5379_v58 = vpop.f32.mrf.mxu1  ;;  %v2484_v49 = vrot.slane %v2322_v42, 6 }
 0x515   :  { %v2324_v56 = vpop.f32.mrf.mxu0  ;;  %v2532_v32 = vrot.slane %v5379_v58, 2 }
 0x516   :  { %v6570_v59 = vpop.f32.mrf.mxu1 }
 0x517   :  { %v2328_v62 = vpop.f32.mrf.mxu0  ;;  %v2531_v3 = vrot.slane %v6570_v59, 2 }
 0x518   :  { %v5382_v7 = vpop.f32.mrf.mxu1  ;;  %v2485_v4 = vrot.slane %v2328_v62, 6  ;;  %v4643_v62 = vld [vmem:[#allocation14 + $0x5] ss:$0 sm:$0xff] }
 0x519   :  { %v2330_v14 = vpop.f32.mrf.mxu0  ;;  %v2536_v23 = vrot.slane %v5382_v7, 2 }
 0x51a   :  { %v2445_v12 = vpop.f32.mrf.mxu1  ;;  %v2486_v43 = vsel %vm932_vm6, %v2484_v49, %v2485_v4 }
 0x51b   :  { %v2334_v37 = vpop.f32.mrf.mxu0  ;;  %v2534_v13 = vrot.slane %v2445_v12, 2  ;;  %v2516_v40 = vadd.f32 %v2486_v43, %v2330_v14 }
 0x51c   :  { %v5385_v26 = vpop.f32.mrf.mxu1  ;;  %v2487_v60 = vrot.slane %v2334_v37, 6 }
 0x51d   :  { %v2336_v50 = vpop.f32.mrf.mxu0  ;;  %v2535_v18 = vsel %vm988_vm7, %v2532_v32, %v2534_v13  ;;  %v2537_v14 = vsel %vm988_vm7, %v2534_v13, %v2536_v23 }
 0x51e   :  { %v2455_v17 = vpop.f32.mrf.mxu1  ;;  %v2488_v38 = vsel %vm932_vm6, %v2485_v4, %v2487_v60  ;;  %v2565_v48 = vadd.f32 %v2535_v18, %v2516_v40 }
 0x51f   :  { %v2340_v9 = vpop.f32.mrf.mxu0  ;;  %v2517_v44 = vadd.f32 %v2488_v38, %v2336_v50  ;;  %v2538_v24 = vrot.slane %v2455_v17, 2  ;;  %v2540_v17 = vrot.slane %v5385_v26, 2 }
 0x520   :  { %v2489_v19 = vrot.slane %v2340_v9, 6  ;;  %v5388_v39 = vpop.f32.mrf.mxu1  ;;  %v2578_v43 = vadd.f32 %v4643_v62, %v2565_v48 }
 0x521   :  { %v2342_v1 = vpop.f32.mrf.mxu0  ;;  %v2566_v50 = vadd.f32 %v2537_v14, %v2517_v44  ;;  %v2539_v7 = vsel %vm988_vm7, %v2536_v23, %v2538_v24  ;;  %v2541_v40 = vsel %vm988_vm7, %v2538_v24, %v2540_v17 }
 0x522   :  { %v2490_v34 = vsel %vm932_vm6, %v2487_v60, %v2489_v19  ;;  %v2465_v12 = vpop.f32.mrf.mxu1  ;;  %v2533_v60 = vsel %vm988_vm7, %v2531_v3, %v2532_v32  ;;  %v6592_v26 = vmax.f32 %v2578_v43, 0.0  ;;  %v3040_v43 = vld [vmem:[#allocation7 + $0x5e0] sm:$0xff] }
 0x523   :  { %v2346_v54 = vpop.f32.mrf.mxu0  ;;  %v2518_v9 = vadd.f32 %v2490_v34, %v2342_v1  ;;  %v2559_v1 = vsel %vm1017_vm10, %v2539_v7, 0.0 }
 0x524   :  { %v2491_v25 = vrot.slane %v2346_v54, 6 }
 0x525   :  { %v2348_v15 = vpop.f32.mrf.mxu0 }
 0x526   :  { %v2492_v27 = vsel %vm932_vm6, %v2489_v19, %v2491_v25  ;;  %v2567_v19 = vadd.f32 %v2559_v1, %v2518_v9  ;;  %v3033_v1 = vld [vmem:[#allocation7 + $0x5a8] sm:$0xff] }
 0x527   :  { %v2352_v29 = vpop.f32.mrf.mxu0  ;;  %v2511_v42 = vsel %vm960_vm8, %v2492_v27, 0.0 }
 0x528   :  { %v2493_v52 = vrot.slane %v2352_v29, 6  ;;  %v2519_v4 = vadd.f32 %v2511_v42, %v2348_v15  ;;  %v2579_v15 = vadd.f32 %v4643_v62, %v2566_v50 }
 0x529   :  { %v2354_v51 = vpop.f32.mrf.mxu0 }
 0x52a   :  { %v2494_v59 = vsel %vm932_vm6, %v2491_v25, %v2493_v52  ;;  %v2568_v27 = vadd.f32 %v2541_v40, %v2519_v4  ;;  %v3041_v4 = vld [vmem:[#allocation7 + $0x5e8] sm:$0xff] }
 0x52b   :  { %v2358_v31 = vpop.f32.mrf.mxu0  ;;  %v2520_v18 = vadd.f32 %v2494_v59, %v2354_v51  ;;  %v2580_v51 = vadd.f32 %v4643_v62, %v2567_v19  ;;  %v3043_v59 = vld [vmem:[#allocation7 + $0x5f8] sm:$0xff]  ;;  %v3030_v19 = vld [vmem:[#allocation7 + $0x590] sm:$0xff]  ;;  %v3029_v40 = vld [vmem:[#allocation7 + $0x588] sm:$0xff] }
 0x52c   :  { %v2495_v58 = vrot.slane %v2358_v31, 6  ;;  %v2544_v31 = vrot.slane %v5388_v39, 2  ;;  %5433 = vmatprep.subr.mxu1 %v3043_v59 }
 0x52d   :  { %v2360_v28 = vpop.f32.mrf.mxu0 }
 0x52e   :  { %v2496_v13 = vsel %vm932_vm6, %v2493_v52, %v2495_v58  ;;  %v2555_v23 = vsel %vm988_vm7, %v2544_v31, %v2531_v3 }
 0x52f   :  { %v2364_v20 = vpop.f32.mrf.mxu0  ;;  %v2521_v25 = vadd.f32 %v2496_v13, %v2360_v28  ;;  %v6601_v28 = vmax.f32 %v2579_v15, 0.0  ;;  %v2563_v3 = vsel %vm1021_vm11, %v2555_v23, 0.0  ;;  %v3035_v13 = vld [vmem:[#allocation7 + $0x5b8] sm:$0xff]  ;;  %v3020_v23 = vld [vmem:[#allocation7 + $0x540] sm:$0xff] }
 0x530   :  { %v2475_v21 = vrot.slane %v2364_v20, 6  ;;  %v3027_v15 = vld [vmem:[#allocation7 + $0x578] sm:$0xff] }
 0x531   :  { %v2366_v44 = vpop.f32.mrf.mxu0 }
 0x532   :  { %v2506_v37 = vsel %vm932_vm6, %v2475_v21, %v2484_v49  ;;  %v2542_v49 = vrot.slane %v2465_v12, 2  ;;  %v2497_v32 = vsel %vm932_vm6, %v2495_v58, %v2475_v21  ;;  %v2581_v21 = vadd.f32 %v4643_v62, %v2568_v27  ;;  %v3026_v27 = vld [vmem:[#allocation7 + $0x570] sm:$0xff] }
 0x533   :  { %v2507_v54 = vsel %vm956_vm9, %v2506_v37, 0.0  ;;  %v2522_v24 = vadd.f32 %v2497_v32, %v2366_v44  ;;  %v6608_v58 = vmax.f32 %v2580_v51, 0.0  ;;  %v3023_v44 = vld [vmem:[#allocation7 + $0x558] sm:$0xff]  ;;  %v3025_v32 = vld [vmem:[#allocation7 + $0x568] sm:$0xff] }
 0x534   :  { %v2515_v29 = vadd.f32 %v2507_v54, %v2324_v56  ;;  %v2543_v39 = vsel %vm988_vm7, %v2540_v17, %v2542_v49  ;;  %v2545_v52 = vsel %vm988_vm7, %v2542_v49, %v2544_v31  ;;  %v6611_v37 = vmax.f32 %v2581_v21, 0.0  ;;  %v3036_v17 = vld [vmem:[#allocation7 + $0x5c0] sm:$0xff]  ;;  %v3037_v31 = vld [vmem:[#allocation7 + $0x5c8] sm:$0xff]  ;;  %v3019_v51 = vld [vmem:[#allocation7 + $0x538] sm:$0xff] }
 0x535   :  { %v2569_v34 = vadd.f32 %v2543_v39, %v2520_v18  ;;  %v2570_v48 = vadd.f32 %v2545_v52, %v2521_v25  ;;  %v2571_v42 = vadd.f32 %v2563_v3, %v2522_v24  ;;  %v3032_v49 = vld [vmem:[#allocation7 + $0x5a0] sm:$0xff]  ;;  %v3031_v18 = vld [vmem:[#allocation7 + $0x598] sm:$0xff]  ;;  %v3021_v39 = vld [vmem:[#allocation7 + $0x548] sm:$0xff] }
 0x536   :  { %v2564_v38 = vadd.f32 %v2533_v60, %v2515_v29  ;;  %v3039_v29 = vld [vmem:[#allocation7 + $0x5d8] sm:$0xff]  ;;  %v3038_v60 = vld [vmem:[#allocation7 + $0x5d0] sm:$0xff]  ;;  %v3028_v25 = vld [vmem:[#allocation7 + $0x580] sm:$0xff] }
 0x537   :  { %v2582_v14 = vadd.f32 %v4643_v62, %v2569_v34  ;;  %v2583_v50 = vadd.f32 %v4643_v62, %v2570_v48  ;;  %v2584_v7 = vadd.f32 %v4643_v62, %v2571_v42  ;;  %v3022_v34 = vld [vmem:[#allocation7 + $0x550] sm:$0xff]  ;;  %v3017_v24 = vld [vmem:[#allocation7 + $0x528] sm:$0xff]  ;;  %v3015_v48 = vld [vmem:[#allocation7 + $0x518] sm:$0xff] }
 0x538   :  { %v2577_v56 = vadd.f32 %v4643_v62, %v2564_v38  ;;  %v3042_v62 = vld [vmem:[#allocation7 + $0x5f0] sm:$0xff]  ;;  %v3016_v3 = vld [vmem:[#allocation7 + $0x520] sm:$0xff] }
 0x539   :  { %v6616_v9 = vmax.f32 %v2582_v14, 0.0  ;;  %v6619_v12 = vmax.f32 %v2583_v50, 0.0  ;;  %v6624_v54 = vmax.f32 %v2584_v7, 0.0  ;;  %3044 = vmatprep.subr.mxu0 %v3042_v62  ;;  %v3034_v38 = vld [vmem:[#allocation7 + $0x5b0] sm:$0xff]  ;;  %v3012_v42 = vld [vmem:[#allocation7 + $0x500] sm:$0xff]  ;;  %v3011_v14 = vld [vmem:[#allocation7 + $0x4f8] sm:$0xff] }
 0x53a   :  { %v6595_v20 = vmax.f32 %v2577_v56, 0.0  ;;  %v3024_v56 = vld [vmem:[#allocation7 + $0x560] sm:$0xff]  ;;  %v3018_v52 = vld [vmem:[#allocation7 + $0x530] sm:$0xff]  ;;  %v3013_v50 = vld [vmem:[#allocation7 + $0x508] sm:$0xff] }
 0x53b   :  { %v3014_v21 = vld [vmem:[#allocation7 + $0x510] sm:$0xff]  ;;  %v3009_v7 = vld [vmem:[#allocation7 + $0x4e8] sm:$0xff]  ;;  %v3008_v62 = vld [vmem:[#allocation7 + $0x4e0] sm:$0xff]  ;;  %v2599_v11 = vadd.f32 %v6619_v12, %v6552_v63 }
 0x53c   :  { %2715 = vmatmul.mubr.f32.vlgmr.msra.gmra.mxu0 %v6595_v20  ;;  %5421 = vmatprep.mubr.f32.mxu1 %v6595_v20 }
 0x53d   :  { %5422 = vmatmul.mubr.f32.vlgmr.msra.gmra.mxu1 %v6592_v26  ;;  %2720 = vmatprep.mubr.f32.mxu0 %v6059_v0 }
 0x53e   :  { %5424 = vmatprep.mubr.f32.mxu1 %v6601_v28  ;;  %3045 = vmatpush1.msra.mxu0 %v3041_v4  ;;  %v3010_v4 = vld [vmem:[#allocation7 + $0x4f0] sm:$0xff] }
 0x53f   :  { %3046 = vmatprep.subr.mxu0 %v3039_v29  ;;  %5434 = vmatpush3.msra.mxu1 %v3043_v59  ;;  %v3006_v59 = vld [vmem:[#allocation7 + $0x4d0] sm:$0xff]  ;;  %v3005_v29 = vld [vmem:[#allocation7 + $0x4c8] sm:$0xff] }
 0x540   :  { %2721 = vmatmul.mubr.f32.gmra.mxu0 %v6592_v26  ;;  %5435 = vmatprep.subr.mxu1 %v3040_v43 }
 0x541   :  { %5425 = vmatmul.mubr.f32.gmra.mxu1 %v6608_v58  ;;  %2726 = vmatprep.mubr.f32.mxu0 %v6059_v0 }
 0x542   :  { %5427 = vmatprep.mubr.f32.mxu1 %v6611_v37  ;;  %3047 = vmatpush1.msra.mxu0 %v3038_v60  ;;  %v3007_v60 = vld [vmem:[#allocation7 + $0x4d8] sm:$0xff] }
 0x543   :  { %3048 = vmatprep.subr.mxu0 %v3036_v17  ;;  %5436 = vmatpush3.msra.mxu1 %v3040_v43  ;;  %v3003_v43 = vld [vmem:[#allocation7 + $0x4b8] sm:$0xff]  ;;  %v3002_v17 = vld [vmem:[#allocation7 + $0x4b0] sm:$0xff] }
 0x544   :  { %2727 = vmatmul.mubr.f32.gmra.mxu0 %v6601_v28  ;;  %5437 = vmatprep.subr.mxu1 %v3037_v31 }
 0x545   :  { %5428 = vmatmul.mubr.f32.gmra.mxu1 %v6616_v9  ;;  %2732 = vmatprep.mubr.f32.mxu0 %v6059_v0 }
 0x546   :  { %5430 = vmatprep.mubr.f32.mxu1 %v6619_v12  ;;  %3049 = vmatpush1.msra.mxu0 %v3035_v13  ;;  %v3004_v13 = vld [vmem:[#allocation7 + $0x4c0] sm:$0xff] }
 0x547   :  { %3050 = vmatprep.subr.mxu0 %v3033_v1  ;;  %5438 = vmatpush3.msra.mxu1 %v3037_v31  ;;  %v3000_v31 = vld [vmem:[#allocation7 + $0x4a0] sm:$0xff]  ;;  %v2999_v1 = vld [vmem:[#allocation7 + $0x498] sm:$0xff] }
 0x548   :  { %2733 = vmatmul.mubr.f32.gmra.mxu0 %v6608_v58  ;;  %5439 = vmatprep.subr.mxu1 %v3034_v38 }
 0x549   :  { %5431 = vmatmul.mubr.f32.gmra.mxu1 %v6624_v54  ;;  %2738 = vmatprep.mubr.f32.mxu0 %v6059_v0 }
 0x54a   :  { %3051 = vmatpush1.msra.mxu0 %v3032_v49  ;;  %5440 = vmatpush3.msra.mxu1 %v3034_v38  ;;  %v3001_v49 = vld [vmem:[#allocation7 + $0x4a8] sm:$0xff] }
 0x54b   :  { %3052 = vmatprep.subr.mxu0 %v3030_v19  ;;  %5441 = vmatprep.subr.mxu1 %v3031_v18  ;;  %v2997_v38 = vld [vmem:[#allocation7 + $0x488] sm:$0xff]  ;;  %v2996_v19 = vld [vmem:[#allocation7 + $0x480] sm:$0xff] }
 0x54c   :  { %2739 = vmatmul.mubr.f32.gmra.mxu0 %v6611_v37  ;;  %5442 = vmatpush3.msra.mxu1 %v3031_v18  ;;  %v6637_v18 = vld [vmem:[#allocation8 + $0x78] sm:$0xff] }
 0x54d   :  { %2744 = vmatprep.mubr.f32.mxu0 %v6059_v0  ;;  %3053 = vmatpush1.msra.mxu0 %v3029_v40  ;;  %v2998_v40 = vld [vmem:[#allocation7 + $0x490] sm:$0xff] }
 0x54e   :  { %3054 = vmatprep.subr.mxu0 %v3027_v15  ;;  %5443 = vmatprep.subr.mxu1 %v3028_v25 }
 0x54f   :  { %3055 = vmatpush1.msra.mxu0 %v3026_v27  ;;  %5444 = vmatpush3.msra.mxu1 %v3028_v25 }
 0x550   :  { %2745 = vmatmul.mubr.f32.gmra.mxu0 %v6616_v9  ;;  %3056 = vmatprep.subr.mxu0 %v3024_v56 }
 0x551   :  { %2750 = vmatprep.mubr.f32.mxu0 %v6059_v0  ;;  %3057 = vmatpush1.msra.mxu0 %v3023_v44 }
 0x552   :  { %5445 = vmatprep.subr.mxu1 %v3025_v32  ;;  %3058 = vmatprep.subr.mxu0 %v3021_v39 }
 0x553   :  { %5446 = vmatpush3.msra.mxu1 %v3025_v32  ;;  %3059 = vmatpush1.msra.mxu0 %v3020_v23 }
 0x554   :  { %2751 = vmatmul.mubr.f32.gmra.mxu0 %v6619_v12  ;;  %5447 = vmatprep.subr.mxu1 %v3022_v34 }
 0x555   :  { %2756 = vmatprep.mubr.f32.mxu0 %v6059_v0  ;;  %3060 = vmatprep.subr.mxu0 %v3018_v52 }
 0x556   :  { %5448 = vmatpush3.msra.mxu1 %v3022_v34  ;;  %3061 = vmatpush1.msra.mxu0 %v3017_v24 }
 0x557   :  { %5449 = vmatprep.subr.mxu1 %v3019_v51  ;;  %3062 = vmatprep.subr.mxu0 %v3015_v48 }
 0x558   :  { %2757 = vmatmul.mubr.f32.gmra.mxu0 %v6624_v54  ;;  %5450 = vmatpush3.msra.mxu1 %v3019_v51 }
 0x559   :  { %3108 = vmatprep.mubr.f32.mxu0 %v6059_v0  ;;  %3063 = vmatpush1.msra.mxu0 %v3014_v21 }
 0x55a   :  { %5451 = vmatprep.subr.mxu1 %v3016_v3  ;;  %3064 = vmatprep.subr.mxu0 %v3012_v42 }
 0x55b   :  { %5452 = vmatpush3.msra.mxu1 %v3016_v3  ;;  %3065 = vmatpush1.msra.mxu0 %v3011_v14 }
 0x55c   :  { %5453 = vmatprep.subr.mxu1 %v3013_v50  ;;  %3066 = vmatprep.subr.mxu0 %v3009_v7  ;;  %v6656_v7 = vld [vmem:[#allocation14 + $0x6] ss:$0 sm:$0xff] }
 0x55d   :  { %5454 = vmatpush3.msra.mxu1 %v3013_v50  ;;  %3067 = vmatpush1.msra.mxu0 %v3008_v62 }
 0x55e   :  { %5455 = vmatprep.subr.mxu1 %v3010_v4  ;;  %3068 = vmatprep.subr.mxu0 %v3006_v59 }
 0x55f   :  { %5456 = vmatpush3.msra.mxu1 %v3010_v4  ;;  %3069 = vmatpush1.msra.mxu0 %v3005_v29 }
 0x560   :  { %5457 = vmatprep.subr.mxu1 %v3007_v60  ;;  %3070 = vmatprep.subr.mxu0 %v3003_v43 }
 0x561   :  { %5458 = vmatpush3.msra.mxu1 %v3007_v60  ;;  %3071 = vmatpush1.msra.mxu0 %v3002_v17 }
 0x562   :  { %5459 = vmatprep.subr.mxu1 %v3004_v13  ;;  %3072 = vmatprep.subr.mxu0 %v3000_v31 }
 0x563   :  { %5460 = vmatpush3.msra.mxu1 %v3004_v13  ;;  %3073 = vmatpush1.msra.mxu0 %v2999_v1 }
 0x564   :  { %5461 = vmatprep.subr.mxu1 %v3001_v49  ;;  %3074 = vmatprep.subr.mxu0 %v2997_v38 }
 0x565   :  { %5462 = vmatpush3.msra.mxu1 %v3001_v49  ;;  %3075 = vmatpush1.msra.mxu0 %v2996_v19 }
 0x566   :  { %5463 = vmatprep.subr.mxu1 %v2998_v40  ;;  %5477 = vmatprep.subr.mxu0 %v6637_v18 }
 0x567   :  { %5464 = vmatpush3.msra.mxu1 %v2998_v40 }
 0x5fc   :  { %v6640_v15 = vpop.f32.mrf.mxu0 }
 0x5fd   :  { %v6642_v27 = vpop.f32.mrf.mxu1  ;;  %v2878_v32 = vrot.slane %v6640_v15, 4 }
 0x5fe   :  { %v6644_v25 = vpop.f32.mrf.mxu0  ;;  %v2926_v51 = vrot.slane %v6642_v27, 4  ;;  %v2600_v27 = vadd.f32 %v6624_v54, %v6557_v41  ;;  %v3334_v41 = vld [vmem:[#allocation8 + $0x58] sm:$0xff]  ;;  %v3332_v54 = vld [vmem:[#allocation8 + $0x48] sm:$0xff] }
 0x5ff   :  { %v6646_v56 = vpop.f32.mrf.mxu1 }
 0x600   :  { %v2722_v44 = vpop.f32.mrf.mxu0 }
 0x601   :  { %v2879_v39 = vrot.slane %v2722_v44, 4  ;;  %v5426_v23 = vpop.f32.mrf.mxu1 }
 0x602   :  { %v2724_v34 = vpop.f32.mrf.mxu0  ;;  %v2930_v4 = vrot.slane %v5426_v23, 4 }
 0x603   :  { %v2880_v52 = vsel %vm1344_vm12, %v2878_v32, %v2879_v39  ;;  %v2839_v24 = vpop.f32.mrf.mxu1 }
 0x604   :  { %v2910_v48 = vadd.f32 %v2880_v52, %v2724_v34  ;;  %v2928_v21 = vrot.slane %v2839_v24, 4  ;;  %v2728_v3 = vpop.f32.mrf.mxu0 }
 0x605   :  { %v2881_v42 = vrot.slane %v2728_v3, 4  ;;  %v5429_v14 = vpop.f32.mrf.mxu1 }
 0x606   :  { %v2929_v50 = vsel %vm1344_vm12, %v2926_v51, %v2928_v21  ;;  %v2730_v62 = vpop.f32.mrf.mxu0  ;;  %v2931_v1 = vsel %vm1344_vm12, %v2928_v21, %v2930_v4 }
 0x607   :  { %v2959_v59 = vadd.f32 %v2929_v50, %v2910_v48  ;;  %v2882_v29 = vsel %vm1344_vm12, %v2879_v39, %v2881_v42  ;;  %v2849_v60 = vpop.f32.mrf.mxu1  ;;  %v2594_v39 = vadd.f32 %v6592_v26, %v6530_v35  ;;  %v2934_v26 = vrot.slane %v5429_v14, 4 }
 0x608   :  { %v2911_v43 = vadd.f32 %v2882_v29, %v2730_v62  ;;  %v2932_v17 = vrot.slane %v2849_v60, 4  ;;  %v2734_v13 = vpop.f32.mrf.mxu0 }
 0x609   :  { %v2972_v31 = vadd.f32 %v6656_v7, %v2959_v59  ;;  %v2883_v49 = vrot.slane %v2734_v13, 4  ;;  %v5432_v19 = vpop.f32.mrf.mxu1 }
 0x60a   :  { %v2960_v38 = vadd.f32 %v2931_v1, %v2911_v43  ;;  %v2736_v40 = vpop.f32.mrf.mxu0  ;;  %v2933_v44 = vsel %vm1344_vm12, %v2930_v4, %v2932_v17 }
 0x60b   :  { %v6662_v34 = vmax.f32 %v2972_v31, 0.0  ;;  %v2884_v23 = vsel %vm1344_vm12, %v2881_v42, %v2883_v49  ;;  %v2953_v21 = vsel %vm1428_vm13, %v2933_v44, 0.0  ;;  %v2859_v4 = vpop.f32.mrf.mxu1  ;;  %v2595_v42 = vadd.f32 %v6601_v28, %v6536_v22 }
 0x60c   :  { %v2912_v52 = vadd.f32 %v2884_v23, %v2736_v40  ;;  %v2740_v24 = vpop.f32.mrf.mxu0  ;;  %v2973_v48 = vadd.f32 %v6656_v7, %v2960_v38  ;;  %v2936_v31 = vrot.slane %v2859_v4, 4  ;;  %v2935_v40 = vsel %vm1344_vm12, %v2932_v17, %v2934_v26 }
 0x60d   :  { %v2885_v3 = vrot.slane %v2740_v24, 4  ;;  %v6671_v50 = vadd.f32 %v6662_v34, %v2594_v39  ;;  %v2596_v22 = vadd.f32 %v6608_v58, %v6541_v10  ;;  %v2938_v17 = vrot.slane %v5432_v19, 4 }
 0x60e   :  { %v2961_v62 = vadd.f32 %v2953_v21, %v2912_v52  ;;  %v2742_v59 = vpop.f32.mrf.mxu0  ;;  %v6673_v29 = vmax.f32 %v2973_v48, 0.0  ;;  %v2937_v52 = vsel %vm1344_vm12, %v2934_v26, %v2936_v31  ;;  %v2597_v10 = vadd.f32 %v6611_v37, %v6544_v45 }
 0x60f   :  { %v2886_v35 = vsel %vm1344_vm12, %v2883_v49, %v2885_v3  ;;  %v2925_v58 = vrot.slane %v6646_v56, 4  ;;  %v2939_v26 = vsel %vm1344_vm12, %v2936_v31, %v2938_v17  ;;  %v2598_v45 = vadd.f32 %v6616_v9, %v6549_v47 }
 0x610   :  { %v2905_v60 = vsel %vm7146_vm0, %v2886_v35, 0.0  ;;  %v2746_v2 = vpop.f32.mrf.mxu0  ;;  %v2974_v43 = vadd.f32 %v6656_v7, %v2961_v62  ;;  %v6682_v13 = vadd.f32 %v6673_v29, %v2595_v42 }
 0x611   :  { %v2913_v1 = vadd.f32 %v2905_v60, %v2742_v59  ;;  %v2887_v38 = vrot.slane %v2746_v2, 4  ;;  %v2927_v9 = vsel %vm1344_vm12, %v2925_v58, %v2926_v51 }
 0x612   :  { %v2748_v44 = vpop.f32.mrf.mxu0  ;;  %v6685_v23 = vmax.f32 %v2974_v43, 0.0 }
 0x613   :  { %v2962_v28 = vadd.f32 %v2935_v40, %v2913_v1  ;;  %v2888_v6 = vsel %vm1344_vm12, %v2885_v3, %v2887_v38  ;;  %v2949_v1 = vsel %vm1344_vm12, %v2938_v17, %v2925_v58  ;;  %v3327_v17 = vld [vmem:[#allocation8 + $0x20] sm:$0xff]  ;;  %v6775_v58 = vld [vmem:[#allocation2 + $0x10] sm:$0xff] }
 0x614   :  { %v2914_v14 = vadd.f32 %v2888_v6, %v2748_v44  ;;  %v2752_v49 = vpop.f32.mrf.mxu0  ;;  %v6691_v39 = vadd.f32 %v6685_v23, %v2596_v22  ;;  %v2957_v47 = vsel %vm1432_vm14, %v2949_v1, 0.0  ;;  %v3470_v1 = vld [vmem:[#allocation8 + $0xe0] sm:$0xff] }
 0x615   :  { %v2889_v24 = vrot.slane %v2752_v49, 4  ;;  %v2975_v48 = vadd.f32 %v6656_v7, %v2962_v28 }
 0x616   :  { %v2963_v21 = vadd.f32 %v2937_v52, %v2914_v14  ;;  %v2754_v62 = vpop.f32.mrf.mxu0  ;;  %v2593_v52 = vadd.f32 %v6595_v20, %v6528_v8  ;;  %v3335_v8 = vld [vmem:[#allocation8 + $0x60] sm:$0xff]  ;;  %v3333_v20 = vld [vmem:[#allocation8 + $0x50] sm:$0xff] }
 0x617   :  { %v2890_v4 = vsel %vm1344_vm12, %v2887_v38, %v2889_v24  ;;  %v6696_v59 = vmax.f32 %v2975_v48, 0.0  ;;  %v3328_v48 = vld [vmem:[#allocation8 + $0x28] sm:$0xff] }
 0x618   :  { %v2915_v3 = vadd.f32 %v2890_v4, %v2754_v62  ;;  %v2758_v42 = vpop.f32.mrf.mxu0  ;;  %v2976_v35 = vadd.f32 %v6656_v7, %v2963_v21  ;;  %v3325_v21 = vld [vmem:[#allocation8 + $0x10] sm:$0xff]  ;;  %v3324_v62 = vld [vmem:[#allocation8 + $0x8] sm:$0xff]  ;;  %v3323_v4 = vld [vmem:[#allocation8] sm:$0xff] }
 0x619   :  { %v2869_v60 = vrot.slane %v2758_v42, 4  ;;  %v6704_v19 = vadd.f32 %v6696_v59, %v2597_v10  ;;  %v6772_v10 = vld [vmem:[#allocation2 + $0x8] sm:$0xff] }
 0x61a   :  { %v2964_v2 = vadd.f32 %v2939_v26, %v2915_v3  ;;  %v2760_v43 = vpop.f32.mrf.mxu0  ;;  %v6707_v38 = vmax.f32 %v2976_v35, 0.0  ;;  %v6781_v3 = vld [vmem:[#allocation2 + $0x20] sm:$0xff]  ;;  %v6784_v42 = vld [vmem:[#allocation2 + $0x28] sm:$0xff]  ;;  %v6787_v35 = vld [vmem:[#allocation2 + $0x30] sm:$0xff] }
 0x61b   :  { %v2900_v37 = vsel %vm1344_vm12, %v2869_v60, %v2878_v32  ;;  %v2891_v56 = vsel %vm1344_vm12, %v2889_v24, %v2869_v60  ;;  %v3337_v24 = vld [vmem:[#allocation8 + $0x70] sm:$0xff]  ;;  %v6790_v26 = vld [vmem:[#allocation2 + $0x38] sm:$0xff] }
 0x61c   :  { %v2901_v31 = vsel %vm1368_vm15, %v2900_v37, 0.0  ;;  %v2916_v40 = vadd.f32 %v2891_v56, %v2760_v43  ;;  %v2977_v44 = vadd.f32 %v6656_v7, %v2964_v2  ;;  %v6719_v22 = vadd.f32 %v6707_v38, %v2598_v45  ;;  %v3473_v60 = vld [vmem:[#allocation8 + $0xf8] sm:$0xff]  ;;  %v3472_v2 = vld [vmem:[#allocation8 + $0xf0] sm:$0xff]  ;;  %v3471_v43 = vld [vmem:[#allocation8 + $0xe8] sm:$0xff] }
 0x61d   :  { %v2909_v28 = vadd.f32 %v2901_v31, %v6644_v25  ;;  %5521 = vmatprep.subr.mxu1 %v3473_v60  ;;  %v3468_v45 = vld [vmem:[#allocation8 + $0xd0] sm:$0xff]  ;;  %v3467_v37 = vld [vmem:[#allocation8 + $0xc8] sm:$0xff]  ;;  %v3466_v56 = vld [vmem:[#allocation8 + $0xc0] sm:$0xff] }
 0x61e   :  { %v2965_v15 = vadd.f32 %v2957_v47, %v2916_v40  ;;  %v6727_v32 = vmax.f32 %v2977_v44, 0.0  ;;  %v3465_v31 = vld [vmem:[#allocation8 + $0xb8] sm:$0xff]  ;;  %v3464_v40 = vld [vmem:[#allocation8 + $0xb0] sm:$0xff]  ;;  %v3463_v44 = vld [vmem:[#allocation8 + $0xa8] sm:$0xff] }
 0x61f   :  { %v2958_v6 = vadd.f32 %v2927_v9, %v2909_v28  ;;  %v3462_v28 = vld [vmem:[#allocation8 + $0xa0] sm:$0xff]  ;;  %v3461_v47 = vld [vmem:[#allocation8 + $0x98] sm:$0xff]  ;;  %v3460_v9 = vld [vmem:[#allocation8 + $0x90] sm:$0xff] }
 0x620   :  { %v2978_v14 = vadd.f32 %v6656_v7, %v2965_v15  ;;  %v6733_v49 = vadd.f32 %v6727_v32, %v2599_v11  ;;  %v3459_v15 = vld [vmem:[#allocation8 + $0x88] sm:$0xff]  ;;  %v3616_v11 = vld [vmem:[#allocation8 + $0x178] sm:$0xff] }
 0x621   :  { %v2971_v25 = vadd.f32 %v6656_v7, %v2958_v6  ;;  %v3336_v7 = vld [vmem:[#allocation8 + $0x68] sm:$0xff]  ;;  %v3615_v6 = vld [vmem:[#allocation8 + $0x170] sm:$0xff] }
 0x622   :  { %v6736_v36 = vmax.f32 %v2978_v14, 0.0  ;;  %v3614_v14 = vld [vmem:[#allocation8 + $0x168] sm:$0xff] }
 0x623   :  { %v2979_v51 = vmax.f32 %v2971_v25, 0.0  ;;  %v3613_v25 = vld [vmem:[#allocation8 + $0x160] sm:$0xff] }
 0x624   :  { %v6743_v63 = vadd.f32 %v6736_v36, %v2600_v27  ;;  %v3611_v27 = vld [vmem:[#allocation8 + $0x150] sm:$0xff] }
 0x625   :  { %3109 = vmatmul.mubr.f32.vlgmr.msra.gmra.mxu0 %v2979_v51  ;;  %5465 = vmatprep.mubr.f32.mxu1 %v2979_v51  ;;  %v6745_v12 = vadd.f32 %v2979_v51, %v2593_v52  ;;  %v3610_v51 = vld [vmem:[#allocation8 + $0x148] sm:$0xff]  ;;  %v3609_v52 = vld [vmem:[#allocation8 + $0x140] sm:$0xff] }
 0x626   :  { %5478 = vmatpush3.msra.mxu0 %v6637_v18  ;;  %5466 = vmatmul.mubr.f32.vlgmr.msra.gmra.mxu1 %v6662_v34  ;;  %v3331_v18 = vld [vmem:[#allocation8 + $0x40] sm:$0xff] }
 0x627   :  { %5479 = vmatprep.subr.mxu0 %v3337_v24  ;;  %5468 = vmatprep.mubr.f32.mxu1 %v6673_v29 }
 0x628   :  { %5480 = vmatpush3.msra.mxu0 %v3337_v24  ;;  %3114 = vmatprep.mubr.f32.mxu0 %v6059_v0  ;;  %v3608_v24 = vld [vmem:[#allocation8 + $0x138] sm:$0xff] }
 0x629   :  { %5481 = vmatprep.subr.mxu0 %v3336_v7  ;;  %3115 = vmatmul.mubr.f32.gmra.mxu0 %v6662_v34  ;;  %v3330_v34 = vld [vmem:[#allocation8 + $0x38] sm:$0xff] }
 0x62a   :  { %5482 = vmatpush3.msra.mxu0 %v3336_v7  ;;  %5469 = vmatmul.mubr.f32.gmra.mxu1 %v6685_v23  ;;  %v3607_v7 = vld [vmem:[#allocation8 + $0x130] sm:$0xff] }
 0x62b   :  { %5483 = vmatprep.subr.mxu0 %v3335_v8  ;;  %5471 = vmatprep.mubr.f32.mxu1 %v6696_v59 }
 0x62c   :  { %5484 = vmatpush3.msra.mxu0 %v3335_v8  ;;  %3120 = vmatprep.mubr.f32.mxu0 %v6059_v0  ;;  %v3606_v8 = vld [vmem:[#allocation8 + $0x128] sm:$0xff] }
 0x62d   :  { %5485 = vmatprep.subr.mxu0 %v3334_v41  ;;  %3121 = vmatmul.mubr.f32.gmra.mxu0 %v6673_v29  ;;  %v3329_v29 = vld [vmem:[#allocation8 + $0x30] sm:$0xff] }
 0x62e   :  { %5486 = vmatpush3.msra.mxu0 %v3334_v41  ;;  %5472 = vmatmul.mubr.f32.gmra.mxu1 %v6707_v38  ;;  %v3605_v41 = vld [vmem:[#allocation8 + $0x120] sm:$0xff] }
 0x62f   :  { %5487 = vmatprep.subr.mxu0 %v3333_v20  ;;  %5474 = vmatprep.mubr.f32.mxu1 %v6727_v32 }
 0x630   :  { %5488 = vmatpush3.msra.mxu0 %v3333_v20  ;;  %3126 = vmatprep.mubr.f32.mxu0 %v6059_v0  ;;  %v3604_v20 = vld [vmem:[#allocation8 + $0x118] sm:$0xff] }
 0x631   :  { %5489 = vmatprep.subr.mxu0 %v3332_v54  ;;  %3127 = vmatmul.mubr.f32.gmra.mxu0 %v6685_v23  ;;  %v3326_v23 = vld [vmem:[#allocation8 + $0x18] sm:$0xff] }
 0x632   :  { %5490 = vmatpush3.msra.mxu0 %v3332_v54  ;;  %5475 = vmatmul.mubr.f32.gmra.mxu1 %v6736_v36 }
 0x633   :  { %5491 = vmatprep.subr.mxu0 %v3331_v18  ;;  %3132 = vmatprep.mubr.f32.mxu0 %v6059_v0 }
 0x634   :  { %5492 = vmatpush3.msra.mxu0 %v3331_v18  ;;  %5522 = vmatpush3.msra.mxu1 %v3473_v60 }
 0x635   :  { %5493 = vmatprep.subr.mxu0 %v3330_v34  ;;  %3133 = vmatmul.mubr.f32.gmra.mxu0 %v6696_v59  ;;  %v6769_v59 = vld [vmem:[#allocation2] sm:$0xff] }
 0x636   :  { %5494 = vmatpush3.msra.mxu0 %v3330_v34  ;;  %3138 = vmatprep.mubr.f32.mxu0 %v6059_v0 }
 0x637   :  { %5495 = vmatprep.subr.mxu0 %v3329_v29  ;;  %5523 = vmatprep.subr.mxu1 %v3472_v2 }
 0x638   :  { %5496 = vmatpush3.msra.mxu0 %v3329_v29  ;;  %5524 = vmatpush3.msra.mxu1 %v3472_v2  ;;  %v4645_v29 = vld [vmem:[#allocation14 + $0x7] ss:$0 sm:$0xff] }
 0x639   :  { %5497 = vmatprep.subr.mxu0 %v3328_v48  ;;  %3139 = vmatmul.mubr.f32.gmra.mxu0 %v6707_v38  ;;  %v3469_v38 = vld [vmem:[#allocation8 + $0xd8] sm:$0xff] }
 0x63a   :  { %5498 = vmatpush3.msra.mxu0 %v3328_v48  ;;  %3144 = vmatprep.mubr.f32.mxu0 %v6059_v0 }
 0x63b   :  { %5499 = vmatprep.subr.mxu0 %v3327_v17  ;;  %5525 = vmatprep.subr.mxu1 %v3471_v43 }
 0x63c   :  { %5500 = vmatpush3.msra.mxu0 %v3327_v17  ;;  %5526 = vmatpush3.msra.mxu1 %v3471_v43 }
 0x63d   :  { %5501 = vmatprep.subr.mxu0 %v3326_v23  ;;  %3145 = vmatmul.mubr.f32.gmra.mxu0 %v6727_v32  ;;  %v3458_v32 = vld [vmem:[#allocation8 + $0x80] sm:$0xff] }
 0x63e   :  { %5502 = vmatpush3.msra.mxu0 %v3326_v23  ;;  %3150 = vmatprep.mubr.f32.mxu0 %v6059_v0  ;;  %v6778_v0 = vld [vmem:[#allocation2 + $0x18] sm:$0xff] }
 0x63f   :  { %5503 = vmatprep.subr.mxu0 %v3325_v21  ;;  %5527 = vmatprep.subr.mxu1 %v3470_v1 }
 0x640   :  { %5504 = vmatpush3.msra.mxu0 %v3325_v21  ;;  %5528 = vmatpush3.msra.mxu1 %v3470_v1 }
 0x641   :  { %5505 = vmatprep.subr.mxu0 %v3324_v62  ;;  %3151 = vmatmul.mubr.f32.gmra.mxu0 %v6736_v36  ;;  %v3612_v36 = vld [vmem:[#allocation8 + $0x158] sm:$0xff] }
 0x642   :  { %5506 = vmatpush3.msra.mxu0 %v3324_v62  ;;  %5509 = vmatprep.mubr.f32.mxu0 %v6769_v59 }
 0x643   :  { %5507 = vmatprep.subr.mxu0 %v3323_v4  ;;  %5529 = vmatprep.subr.mxu1 %v3469_v38 }
 0x644   :  { %5508 = vmatpush3.msra.mxu0 %v3323_v4  ;;  %5530 = vmatpush3.msra.mxu1 %v3469_v38 }
 0x645   :  { %5510 = vmatmul.mubr.f32.vlgmr.msra.gmra.mxu0 %v6772_v10  ;;  %5531 = vmatprep.subr.mxu1 %v3468_v45 }
 0x646   :  { %5512 = vmatprep.mubr.f32.mxu0 %v6775_v58  ;;  %5532 = vmatpush3.msra.mxu1 %v3468_v45 }
 0x647   :  { %5533 = vmatprep.subr.mxu1 %v3467_v37  ;;  %5565 = vmatprep.subr.mxu0 %v3616_v11 }
 0x648   :  { %5534 = vmatpush3.msra.mxu1 %v3467_v37  ;;  %5566 = vmatpush3.msra.mxu0 %v3616_v11 }
 0x649   :  { %5513 = vmatmul.mubr.f32.gmra.mxu0 %v6778_v0  ;;  %5535 = vmatprep.subr.mxu1 %v3466_v56 }
 0x64a   :  { %5515 = vmatprep.mubr.f32.mxu0 %v6781_v3  ;;  %5536 = vmatpush3.msra.mxu1 %v3466_v56 }
 0x64b   :  { %5537 = vmatprep.subr.mxu1 %v3465_v31  ;;  %5567 = vmatprep.subr.mxu0 %v3615_v6 }
 0x64c   :  { %5538 = vmatpush3.msra.mxu1 %v3465_v31  ;;  %5568 = vmatpush3.msra.mxu0 %v3615_v6 }
 0x64d   :  { %5516 = vmatmul.mubr.f32.gmra.mxu0 %v6784_v42  ;;  %5539 = vmatprep.subr.mxu1 %v3464_v40 }
 0x64e   :  { %5518 = vmatprep.mubr.f32.mxu0 %v6787_v35  ;;  %5540 = vmatpush3.msra.mxu1 %v3464_v40 }
 0x64f   :  { %5541 = vmatprep.subr.mxu1 %v3463_v44  ;;  %5569 = vmatprep.subr.mxu0 %v3614_v14 }
 0x650   :  { %5542 = vmatpush3.msra.mxu1 %v3463_v44  ;;  %5570 = vmatpush3.msra.mxu0 %v3614_v14 }
 0x651   :  { %5519 = vmatmul.mubr.f32.gmra.mxu0 %v6790_v26  ;;  %5543 = vmatprep.subr.mxu1 %v3462_v28 }
 0x652   :  { %5544 = vmatpush3.msra.mxu1 %v3462_v28  ;;  %5571 = vmatprep.subr.mxu0 %v3613_v25 }
 0x653   :  { %5545 = vmatprep.subr.mxu1 %v3461_v47  ;;  %5572 = vmatpush3.msra.mxu0 %v3613_v25 }
 0x654   :  { %5546 = vmatpush3.msra.mxu1 %v3461_v47  ;;  %5573 = vmatprep.subr.mxu0 %v3612_v36 }
 0x655   :  { %5547 = vmatprep.subr.mxu1 %v3460_v9  ;;  %5574 = vmatpush3.msra.mxu0 %v3612_v36 }
 0x656   :  { %5548 = vmatpush3.msra.mxu1 %v3460_v9  ;;  %5575 = vmatprep.subr.mxu0 %v3611_v27 }
 0x657   :  { %5549 = vmatprep.subr.mxu1 %v3459_v15  ;;  %5576 = vmatpush3.msra.mxu0 %v3611_v27 }
 0x658   :  { %5550 = vmatpush3.msra.mxu1 %v3459_v15  ;;  %5577 = vmatprep.subr.mxu0 %v3610_v51 }
 0x659   :  { %5551 = vmatprep.subr.mxu1 %v3458_v32  ;;  %5578 = vmatpush3.msra.mxu0 %v3610_v51 }
 0x65a   :  { %5552 = vmatpush3.msra.mxu1 %v3458_v32  ;;  %5579 = vmatprep.subr.mxu0 %v3609_v52 }
 0x65b   :  { %5580 = vmatpush3.msra.mxu0 %v3609_v52 }
 0x65c   :  { %5581 = vmatprep.subr.mxu0 %v3608_v24 }
 0x65d   :  { %5582 = vmatpush3.msra.mxu0 %v3608_v24 }
 0x65e   :  { %5583 = vmatprep.subr.mxu0 %v3607_v7 }
 0x65f   :  { %5584 = vmatpush3.msra.mxu0 %v3607_v7 }
 0x660   :  { %5585 = vmatprep.subr.mxu0 %v3606_v8 }
 0x661   :  { %5586 = vmatpush3.msra.mxu0 %v3606_v8 }
 0x662   :  { %5587 = vmatprep.subr.mxu0 %v3605_v41 }
 0x663   :  { %5588 = vmatpush3.msra.mxu0 %v3605_v41 }
 0x664   :  { %5589 = vmatprep.subr.mxu0 %v3604_v20 }
 0x665   :  { %5590 = vmatpush3.msra.mxu0 %v3604_v20 }
 0x6e5   :  { %v3110_v54 = vpop.f32.mrf.mxu0 }
 0x6e6   :  { %v5467_v18 = vpop.f32.mrf.mxu1 }
 0x6e7   :  { %v3112_v34 = vpop.f32.mrf.mxu0 }
 0x6e8   :  { %v3286_v48 = vadd.f32 %v5467_v18, %v3112_v34  ;;  %v3223_v17 = vpop.f32.mrf.mxu1 }
 0x6e9   :  { %v3116_v23 = vpop.f32.mrf.mxu0 }
 0x6ea   :  { %v3299_v21 = vadd.f32 %v4645_v29, %v3286_v48  ;;  %v5470_v62 = vpop.f32.mrf.mxu1 }
 0x6eb   :  { %v3118_v4 = vpop.f32.mrf.mxu0 }
 0x6ec   :  { %v3307_v60 = vmax.f32 %v3299_v21, 0.0  ;;  %v3271_v2 = vadd.f32 %v3118_v4, %v3110_v54  ;;  %v3233_v43 = vpop.f32.mrf.mxu1 }
 0x6ed   :  { %v3122_v1 = vpop.f32.mrf.mxu0 }
 0x6ee   :  { %v3287_v38 = vadd.f32 %v3271_v2, %v3233_v43  ;;  %v5473_v45 = vpop.f32.mrf.mxu1  ;;  %v6794_v37 = vadd.f32 %v3307_v60, %v6745_v12 }
 0x6ef   :  { %v3124_v56 = vpop.f32.mrf.mxu0 }
 0x6f0   :  { %v3300_v31 = vadd.f32 %v4645_v29, %v3287_v38  ;;  %v3272_v40 = vadd.f32 %v3124_v56, %v3116_v23  ;;  %v3243_v44 = vpop.f32.mrf.mxu1 }
 0x6f1   :  { %v3128_v28 = vpop.f32.mrf.mxu0 }
 0x6f2   :  { %v3308_v47 = vmax.f32 %v3300_v31, 0.0  ;;  %v3288_v9 = vadd.f32 %v5470_v62, %v3272_v40  ;;  %v5476_v24 = vpop.f32.mrf.mxu1 }
 0x6f3   :  { %v3130_v15 = vpop.f32.mrf.mxu0 }
 0x6f4   :  { %v3301_v32 = vadd.f32 %v4645_v29, %v3288_v9  ;;  %v3273_v11 = vadd.f32 %v3130_v15, %v3122_v1  ;;  %v6797_v6 = vadd.f32 %v3308_v47, %v6671_v50  ;;  %v3253_v50 = vpop.f32.mrf.mxu1 }
 0x6f5   :  { %v3134_v14 = vpop.f32.mrf.mxu0 }
 0x6f6   :  { %v3309_v25 = vmax.f32 %v3301_v32, 0.0  ;;  %v3302_v36 = vadd.f32 %v4645_v29, %v3273_v11 }
 0x6f7   :  { %v3136_v27 = vpop.f32.mrf.mxu0 }
 0x6f8   :  { %v3310_v51 = vmax.f32 %v3302_v36, 0.0  ;;  %v3290_v12 = vadd.f32 %v5473_v45, %v3136_v27  ;;  %v6800_v52 = vadd.f32 %v3309_v25, %v6682_v13 }
 0x6f9   :  { %v3140_v7 = vpop.f32.mrf.mxu0 }
 0x6fa   :  { %v3303_v8 = vadd.f32 %v4645_v29, %v3290_v12  ;;  %v6803_v41 = vadd.f32 %v3310_v51, %v6691_v39  ;;  %v4646_v39 = vld [vmem:[#allocation14 + $0x8] ss:$0 sm:$0xff] }
 0x6fb   :  { %v3142_v20 = vpop.f32.mrf.mxu0 }
 0x6fc   :  { %v3311_v54 = vmax.f32 %v3303_v8, 0.0  ;;  %v3275_v18 = vadd.f32 %v3142_v20, %v3134_v14 }
 0x6fd   :  { %v3146_v34 = vpop.f32.mrf.mxu0 }
 0x6fe   :  { %v3291_v48 = vadd.f32 %v3275_v18, %v3253_v50  ;;  %v6806_v17 = vadd.f32 %v3311_v54, %v6704_v19 }
 0x6ff   :  { %v3148_v23 = vpop.f32.mrf.mxu0 }
 0x700   :  { %v3304_v21 = vadd.f32 %v4645_v29, %v3291_v48  ;;  %v3276_v62 = vadd.f32 %v3148_v23, %v3140_v7  ;;  %v3602_v48 = vld [vmem:[#allocation8 + $0x108] sm:$0xff]  ;;  %v3601_v23 = vld [vmem:[#allocation8 + $0x100] sm:$0xff] }
 0x701   :  { %v3152_v13 = vpop.f32.mrf.mxu0 }
 0x702   :  { %v3312_v4 = vmax.f32 %v3304_v21, 0.0  ;;  %v3292_v60 = vadd.f32 %v5476_v24, %v3276_v62  ;;  %v3901_v21 = vld [vmem:[#allocation11 + $0x78] sm:$0xff]  ;;  %v3758_v13 = vld [vmem:[#allocation8 + $0x1f0] sm:$0xff] }
 0x703   :  { %v3154_v2 = vpop.f32.mrf.mxu0  ;;  %v3759_v62 = vld [vmem:[#allocation8 + $0x1f8] sm:$0xff] }
 0x704   :  { %v3305_v43 = vadd.f32 %v4645_v29, %v3292_v60  ;;  %v3277_v1 = vadd.f32 %v3154_v2, %v3146_v34  ;;  %v6809_v38 = vadd.f32 %v3312_v4, %v6719_v22  ;;  %v3603_v34 = vld [vmem:[#allocation8 + $0x110] sm:$0xff]  ;;  %5609 = vmatprep.subr.mxu1 %v3759_v62  ;;  %v3757_v4 = vld [vmem:[#allocation8 + $0x1e8] sm:$0xff]  ;;  %v3756_v60 = vld [vmem:[#allocation8 + $0x1e0] sm:$0xff] }
 0x705   :  { %v5511_v45 = vpop.f32.mrf.mxu0  ;;  %5591 = vmatprep.subr.mxu0 %v3603_v34  ;;  %v3755_v2 = vld [vmem:[#allocation8 + $0x1d8] sm:$0xff] }
 0x706   :  { %v3313_v56 = vmax.f32 %v3305_v43, 0.0  ;;  %v3306_v31 = vadd.f32 %v4645_v29, %v3277_v1  ;;  %v6811_v40 = vadd.f32 %v5511_v45, %v4646_v39  ;;  %5592 = vmatpush3.msra.mxu0 %v3603_v34  ;;  %v3754_v43 = vld [vmem:[#allocation8 + $0x1d0] sm:$0xff]  ;;  %v3753_v1 = vld [vmem:[#allocation8 + $0x1c8] sm:$0xff]  ;;  %v3751_v45 = vld [vmem:[#allocation8 + $0x1b8] sm:$0xff] }
 0x707   :  { %v3410_v19 = vpop.f32.mrf.mxu0  ;;  %5593 = vmatprep.subr.mxu0 %v3602_v48 }
 0x708   :  { %v3314_v44 = vmax.f32 %v3306_v31, 0.0  ;;  %v6813_v28 = vadd.f32 %v4646_v39, %v3410_v19  ;;  %v6816_v47 = vadd.f32 %v3313_v56, %v6733_v49  ;;  %v3450_v11 = vmax.f32 %v6811_v40, 0.0  ;;  %5594 = vmatpush3.msra.mxu0 %v3602_v48  ;;  %v3750_v56 = vld [vmem:[#allocation8 + $0x1b0] sm:$0xff]  ;;  %v3749_v31 = vld [vmem:[#allocation8 + $0x1a8] sm:$0xff]  ;;  %v3748_v19 = vld [vmem:[#allocation8 + $0x1a0] sm:$0xff] }
 0x709   :  { %v5514_v9 = vpop.f32.mrf.mxu0  ;;  %5595 = vmatprep.subr.mxu0 %v3601_v23 }
 0x70a   :  { %v3449_v15 = vmax.f32 %v6813_v28, 0.0  ;;  %v6819_v32 = vadd.f32 %v5514_v9, %v4646_v39  ;;  %v6822_v22 = vadd.f32 %v3314_v44, %v6743_v63  ;;  %5596 = vmatpush3.msra.mxu0 %v3601_v23  ;;  %v3747_v44 = vld [vmem:[#allocation8 + $0x198] sm:$0xff]  ;;  %v4647_v9 = vld [vmem:[#allocation14 + $0x9] ss:$0 sm:$0xff] }
 0x70b   :  { %v3420_v29 = vpop.f32.mrf.mxu0  ;;  %5653 = vmatprep.subr.mxu0 %v3901_v21 }
 0x70c   :  { %v6825_v14 = vadd.f32 %v4646_v39, %v3420_v29  ;;  %5553 = vmatprep.mubr.f32.mxu1 %v3449_v15  ;;  %v3452_v25 = vmax.f32 %v6819_v32, 0.0 }
 0x70d   :  { %v5517_v49 = vpop.f32.mrf.mxu0  ;;  %5554 = vmatmul.mubr.f32.vlgmr.msra.gmra.mxu1 %v3450_v11 }
 0x70e   :  { %v3451_v36 = vmax.f32 %v6825_v14, 0.0  ;;  %v6833_v27 = vadd.f32 %v5517_v49, %v4646_v39  ;;  %5610 = vmatpush3.msra.mxu1 %v3759_v62 }
 0x70f   :  { %v3430_v63 = vpop.f32.mrf.mxu0  ;;  %5611 = vmatprep.subr.mxu1 %v3758_v13 }
 0x710   :  { %v6835_v51 = vadd.f32 %v4646_v39, %v3430_v63  ;;  %5556 = vmatprep.mubr.f32.mxu1 %v3451_v36  ;;  %v3454_v12 = vmax.f32 %v6833_v27, 0.0  ;;  %5612 = vmatpush3.msra.mxu1 %v3758_v13 }
 0x711   :  { %v5520_v24 = vpop.f32.mrf.mxu0  ;;  %5557 = vmatmul.mubr.f32.gmra.mxu1 %v3452_v25  ;;  %5613 = vmatprep.subr.mxu1 %v3757_v4 }
 0x712   :  { %v3453_v7 = vmax.f32 %v6835_v51, 0.0  ;;  %v6843_v8 = vadd.f32 %v5520_v24, %v4646_v39  ;;  %5614 = vmatpush3.msra.mxu1 %v3757_v4  ;;  %v3900_v4 = vld [vmem:[#allocation11 + $0x70] sm:$0xff] }
 0x713   :  { %v3440_v20 = vpop.f32.mrf.mxu0  ;;  %5615 = vmatprep.subr.mxu1 %v3756_v60 }
 0x714   :  { %v6845_v54 = vadd.f32 %v4646_v39, %v3440_v20  ;;  %5559 = vmatprep.mubr.f32.mxu1 %v3453_v7  ;;  %v7144_v18 = vmax.f32 %v6843_v8, 0.0  ;;  %5616 = vmatpush3.msra.mxu1 %v3756_v60  ;;  %v3752_v39 = vld [vmem:[#allocation8 + $0x1c0] sm:$0xff] }
 0x715   :  { %5560 = vmatmul.mubr.f32.gmra.mxu1 %v3454_v12  ;;  %5617 = vmatprep.subr.mxu1 %v3755_v2 }
 0x716   :  { %v7142_v50 = vmax.f32 %v6845_v54, 0.0  ;;  %5618 = vmatpush3.msra.mxu1 %v3755_v2 }
 0x717   :  { %5619 = vmatprep.subr.mxu1 %v3754_v43 }
 0x718   :  { %5562 = vmatprep.mubr.f32.mxu1 %v7142_v50  ;;  %5620 = vmatpush3.msra.mxu1 %v3754_v43  ;;  %v3899_v43 = vld [vmem:[#allocation11 + $0x68] sm:$0xff]  ;;  %v3886_v50 = vld [vmem:[#allocation11] sm:$0xff] }
 0x719   :  { %5563 = vmatmul.mubr.f32.gmra.mxu1 %v7144_v18  ;;  %5621 = vmatprep.subr.mxu1 %v3753_v1  ;;  %v4196_v18 = vld [vmem:[#allocation10 + $0xa8] sm:$0xff] }
 0x71a   :  { %5622 = vmatpush3.msra.mxu1 %v3753_v1 }
 0x71b   :  { %5623 = vmatprep.subr.mxu1 %v3752_v39 }
 0x71c   :  { %5624 = vmatpush3.msra.mxu1 %v3752_v39 }
 0x71d   :  { %5625 = vmatprep.subr.mxu1 %v3751_v45 }
 0x71e   :  { %5626 = vmatpush3.msra.mxu1 %v3751_v45 }
 0x71f   :  { %5627 = vmatprep.subr.mxu1 %v3750_v56 }
 0x720   :  { %5628 = vmatpush3.msra.mxu1 %v3750_v56 }
 0x721   :  { %5629 = vmatprep.subr.mxu1 %v3749_v31 }
 0x722   :  { %5630 = vmatpush3.msra.mxu1 %v3749_v31  ;;  %v3898_v31 = vld [vmem:[#allocation11 + $0x60] sm:$0xff] }
 0x723   :  { %5631 = vmatprep.subr.mxu1 %v3748_v19 }
 0x724   :  { %5632 = vmatpush3.msra.mxu1 %v3748_v19 }
 0x725   :  { %5633 = vmatprep.subr.mxu1 %v3747_v44 }
 0x726   :  { %5634 = vmatpush3.msra.mxu1 %v3747_v44  ;;  %v3897_v44 = vld [vmem:[#allocation11 + $0x58] sm:$0xff] }
 0x7cd   :  { %v5555_v29 = vpop.f32.mrf.mxu1 }
 0x7ce   :  { %v6857_v49 = vadd.f32 %v5555_v29, %v4647_v9 }
 0x7cf   :  { %v3545_v63 = vpop.f32.mrf.mxu1 }
 0x7d0   :  { %v6859_v24 = vadd.f32 %v4647_v9, %v3545_v63  ;;  %v3585_v48 = vmax.f32 %v6857_v49, 0.0 }
 0x7d1   :  { %v5558_v20 = vpop.f32.mrf.mxu1 }
 0x7d2   :  { %v3584_v34 = vmax.f32 %v6859_v24, 0.0  ;;  %v6863_v23 = vadd.f32 %v5558_v20, %v4647_v9 }
 0x7d3   :  { %v3555_v62 = vpop.f32.mrf.mxu1 }
 0x7d4   :  { %v6865_v13 = vadd.f32 %v4647_v9, %v3555_v62  ;;  %5597 = vmatprep.mubr.f32.mxu0 %v3584_v34  ;;  %v3587_v1 = vmax.f32 %v6863_v23, 0.0 }
 0x7d5   :  { %v5561_v60 = vpop.f32.mrf.mxu1  ;;  %5598 = vmatmul.mubr.f32.vlgmr.msra.gmra.mxu0 %v3585_v48 }
 0x7d6   :  { %v3586_v2 = vmax.f32 %v6865_v13, 0.0  ;;  %5654 = vmatpush3.msra.mxu0 %v3901_v21  ;;  %v6873_v39 = vadd.f32 %v5561_v60, %v4647_v9 }
 0x7d7   :  { %5655 = vmatprep.subr.mxu0 %v3900_v4  ;;  %v3565_v45 = vpop.f32.mrf.mxu1 }
 0x7d8   :  { %v6875_v56 = vadd.f32 %v4647_v9, %v3565_v45  ;;  %5656 = vmatpush3.msra.mxu0 %v3900_v4  ;;  %5600 = vmatprep.mubr.f32.mxu0 %v3586_v2  ;;  %v3589_v29 = vmax.f32 %v6873_v39, 0.0  ;;  %v3896_v4 = vld [vmem:[#allocation11 + $0x50] sm:$0xff] }
 0x7d9   :  { %5657 = vmatprep.subr.mxu0 %v3899_v43  ;;  %v5564_v19 = vpop.f32.mrf.mxu1  ;;  %5601 = vmatmul.mubr.f32.gmra.mxu0 %v3587_v1 }
 0x7da   :  { %v7145_v21 = vmax.f32 %v6875_v56, 0.0  ;;  %5658 = vmatpush3.msra.mxu0 %v3899_v43  ;;  %v6883_v63 = vadd.f32 %v5564_v19, %v4647_v9  ;;  %v3895_v43 = vld [vmem:[#allocation11 + $0x48] sm:$0xff]  ;;  %v3892_v19 = vld [vmem:[#allocation11 + $0x30] sm:$0xff]  ;;  %v3597_v14 = vadd.f32 %v3589_v29, %v3454_v12 }
 0x7db   :  { %5659 = vmatprep.subr.mxu0 %v3898_v31  ;;  %v3575_v20 = vpop.f32.mrf.mxu1 }
 0x7dc   :  { %v6885_v62 = vadd.f32 %v4647_v9, %v3575_v20  ;;  %5660 = vmatpush3.msra.mxu0 %v3898_v31  ;;  %5603 = vmatprep.mubr.f32.mxu0 %v7145_v21  ;;  %v7143_v45 = vmax.f32 %v6883_v63, 0.0  ;;  %v3894_v9 = vld [vmem:[#allocation11 + $0x40] sm:$0xff]  ;;  %v3893_v31 = vld [vmem:[#allocation11 + $0x38] sm:$0xff]  ;;  %v7149_v51 = vmax.f32 %v6883_v63, 0.0  ;;  %v4050_v63 = vld [vmem:[#allocation13 + $0x48] sm:$0xff] }
 0x7dd   :  { %5661 = vmatprep.subr.mxu0 %v3897_v44  ;;  %5604 = vmatmul.mubr.f32.gmra.mxu0 %v3589_v29  ;;  %v3890_v20 = vld [vmem:[#allocation11 + $0x20] sm:$0xff]  ;;  %v4052_v29 = vld [vmem:[#allocation13 + $0x58] sm:$0xff] }
 0x7de   :  { %v7141_v60 = vmax.f32 %v6885_v62, 0.0  ;;  %5662 = vmatpush3.msra.mxu0 %v3897_v44  ;;  %v3891_v44 = vld [vmem:[#allocation11 + $0x28] sm:$0xff]  ;;  %v4179_v21 = vld [vmem:[#allocation10 + $0x20] sm:$0xff] }
 0x7df   :  { %5663 = vmatprep.subr.mxu0 %v3896_v4 }
 0x7e0   :  { %5664 = vmatpush3.msra.mxu0 %v3896_v4  ;;  %5606 = vmatprep.mubr.f32.mxu0 %v7141_v60  ;;  %v3889_v4 = vld [vmem:[#allocation11 + $0x18] sm:$0xff]  ;;  %v3888_v60 = vld [vmem:[#allocation11 + $0x10] sm:$0xff] }
 0x7e1   :  { %5665 = vmatprep.subr.mxu0 %v3895_v43  ;;  %5607 = vmatmul.mubr.f32.gmra.mxu0 %v7143_v45  ;;  %v4186_v45 = vld [vmem:[#allocation10 + $0x58] sm:$0xff] }
 0x7e2   :  { %5666 = vmatpush3.msra.mxu0 %v3895_v43  ;;  %5685 = vmatprep.mubr.f32.mxu0 %v6769_v59  ;;  %v3887_v43 = vld [vmem:[#allocation11 + $0x8] sm:$0xff] }
 0x7e3   :  { %5667 = vmatprep.subr.mxu0 %v3894_v9 }
 0x7e4   :  { %5668 = vmatpush3.msra.mxu0 %v3894_v9  ;;  %v4206_v9 = vld [vmem:[#allocation10 + $0xf8] sm:$0xff] }
 0x7e5   :  { %5669 = vmatprep.subr.mxu0 %v3893_v31 }
 0x7e6   :  { %5670 = vmatpush3.msra.mxu0 %v3893_v31  ;;  %v4190_v31 = vld [vmem:[#allocation10 + $0x78] sm:$0xff] }
 0x7e7   :  { %5671 = vmatprep.subr.mxu0 %v3892_v19 }
 0x7e8   :  { %5672 = vmatpush3.msra.mxu0 %v3892_v19  ;;  %v4205_v19 = vld [vmem:[#allocation10 + $0xf0] sm:$0xff] }
 0x7e9   :  { %5673 = vmatprep.subr.mxu0 %v3891_v44 }
 0x7ea   :  { %5674 = vmatpush3.msra.mxu0 %v3891_v44  ;;  %v4189_v44 = vld [vmem:[#allocation10 + $0x70] sm:$0xff] }
 0x7eb   :  { %5675 = vmatprep.subr.mxu0 %v3890_v20 }
 0x7ec   :  { %5676 = vmatpush3.msra.mxu0 %v3890_v20  ;;  %v4204_v20 = vld [vmem:[#allocation10 + $0xe8] sm:$0xff] }
 0x7ed   :  { %5677 = vmatprep.subr.mxu0 %v3889_v4 }
 0x7ee   :  { %5678 = vmatpush3.msra.mxu0 %v3889_v4  ;;  %v4188_v4 = vld [vmem:[#allocation10 + $0x68] sm:$0xff] }
 0x7ef   :  { %5679 = vmatprep.subr.mxu0 %v3888_v60 }
 0x7f0   :  { %5680 = vmatpush3.msra.mxu0 %v3888_v60  ;;  %v4203_v60 = vld [vmem:[#allocation10 + $0xe0] sm:$0xff] }
 0x7f1   :  { %5681 = vmatprep.subr.mxu0 %v3887_v43 }
 0x7f2   :  { %5682 = vmatpush3.msra.mxu0 %v3887_v43  ;;  %v4187_v43 = vld [vmem:[#allocation10 + $0x60] sm:$0xff] }
 0x7f3   :  { %5683 = vmatprep.subr.mxu0 %v3886_v50 }
 0x7f4   :  { %5684 = vmatpush3.msra.mxu0 %v3886_v50  ;;  %v4202_v50 = vld [vmem:[#allocation10 + $0xd8] sm:$0xff] }
 0x7f5   :  { %5686 = vmatmul.mubr.f32.vlgmr.msra.gmra.mxu0 %v6772_v10  ;;  %4989 = vmatprep.subr.mxu0 %v4206_v9  ;;  %v4201_v9 = vld [vmem:[#allocation10 + $0xd0] sm:$0xff] }
 0x7f6   :  { %4990 = vmatpush3.msra.mxu0 %v4190_v31  ;;  %5688 = vmatprep.mubr.f32.mxu0 %v6775_v58  ;;  %v4185_v31 = vld [vmem:[#allocation10 + $0x50] sm:$0xff] }
 0x7f7   :  { %4991 = vmatprep.subr.mxu0 %v4205_v19  ;;  %v4200_v19 = vld [vmem:[#allocation10 + $0xc8] sm:$0xff] }
 0x7f8   :  { %4992 = vmatpush3.msra.mxu0 %v4189_v44  ;;  %v4184_v44 = vld [vmem:[#allocation10 + $0x48] sm:$0xff] }
 0x7f9   :  { %5689 = vmatmul.mubr.f32.gmra.mxu0 %v6778_v0  ;;  %4993 = vmatprep.subr.mxu0 %v4204_v20  ;;  %v4199_v20 = vld [vmem:[#allocation10 + $0xc0] sm:$0xff] }
 0x7fa   :  { %4994 = vmatpush3.msra.mxu0 %v4188_v4  ;;  %5691 = vmatprep.mubr.f32.mxu0 %v6781_v3  ;;  %v4183_v4 = vld [vmem:[#allocation10 + $0x40] sm:$0xff] }
 0x7fb   :  { %4995 = vmatprep.subr.mxu0 %v4203_v60  ;;  %v4198_v60 = vld [vmem:[#allocation10 + $0xb8] sm:$0xff] }
 0x7fc   :  { %4996 = vmatpush3.msra.mxu0 %v4187_v43  ;;  %v4182_v43 = vld [vmem:[#allocation10 + $0x38] sm:$0xff] }
 0x7fd   :  { %5692 = vmatmul.mubr.f32.gmra.mxu0 %v6784_v42  ;;  %4997 = vmatprep.subr.mxu0 %v4202_v50  ;;  %v4197_v50 = vld [vmem:[#allocation10 + $0xb0] sm:$0xff] }
 0x7fe   :  { %4998 = vmatpush3.msra.mxu0 %v4186_v45  ;;  %5694 = vmatprep.mubr.f32.mxu0 %v6787_v35  ;;  %v4181_v45 = vld [vmem:[#allocation10 + $0x30] sm:$0xff] }
 0x7ff   :  { %4999 = vmatprep.subr.mxu0 %v4201_v9  ;;  %v4180_v9 = vld [vmem:[#allocation10 + $0x28] sm:$0xff] }
 0x800   :  { %5000 = vmatpush3.msra.mxu0 %v4185_v31  ;;  %v4195_v31 = vld [vmem:[#allocation10 + $0xa0] sm:$0xff] }
 0x801   :  { %5695 = vmatmul.mubr.f32.gmra.mxu0 %v6790_v26  ;;  %5001 = vmatprep.subr.mxu0 %v4200_v19  ;;  %v4194_v19 = vld [vmem:[#allocation10 + $0x98] sm:$0xff] }
 0x802   :  { %5002 = vmatpush3.msra.mxu0 %v4184_v44  ;;  %4324 = vmatprep.mubr.f32.mxu0 %v6794_v37  ;;  %v4178_v44 = vld [vmem:[#allocation10 + $0x18] sm:$0xff]  ;;  %v4193_v37 = vld [vmem:[#allocation10 + $0x90] sm:$0xff] }
 0x803   :  { %5003 = vmatprep.subr.mxu0 %v4199_v20  ;;  %v4177_v20 = vld [vmem:[#allocation10 + $0x10] sm:$0xff] }
 0x804   :  { %5004 = vmatpush3.msra.mxu0 %v4183_v4  ;;  %v4192_v4 = vld [vmem:[#allocation10 + $0x88] sm:$0xff] }
 0x805   :  { %5005 = vmatprep.subr.mxu0 %v4198_v60  ;;  %v4176_v60 = vld [vmem:[#allocation10 + $0x8] sm:$0xff] }
 0x806   :  { %5006 = vmatpush3.msra.mxu0 %v4182_v43  ;;  %v4191_v43 = vld [vmem:[#allocation10 + $0x80] sm:$0xff] }
 0x807   :  { %5007 = vmatprep.subr.mxu0 %v4197_v50  ;;  %v4175_v50 = vld [vmem:[#allocation10] sm:$0xff] }
 0x808   :  { %5008 = vmatpush3.msra.mxu0 %v4181_v45  ;;  %v3744_v45 = vld [vmem:[#allocation8 + $0x180] sm:$0xff] }
 0x809   :  { %5009 = vmatprep.subr.mxu0 %v4196_v18  ;;  %v3746_v18 = vld [vmem:[#allocation8 + $0x190] sm:$0xff] }
 0x80a   :  { %5010 = vmatpush3.msra.mxu0 %v4180_v9  ;;  %5635 = vmatprep.subr.mxu1 %v3746_v18  ;;  %v4056_v9 = vld [vmem:[#allocation13 + $0x78] sm:$0xff] }
 0x80b   :  { %5011 = vmatprep.subr.mxu0 %v4195_v31  ;;  %5636 = vmatpush3.msra.mxu1 %v3746_v18 }
 0x80c   :  { %5012 = vmatpush3.msra.mxu0 %v4179_v21  ;;  %v3745_v21 = vld [vmem:[#allocation8 + $0x188] sm:$0xff] }
 0x80d   :  { %5013 = vmatprep.subr.mxu0 %v4194_v19  ;;  %5637 = vmatprep.subr.mxu1 %v3745_v21 }
 0x80e   :  { %5014 = vmatpush3.msra.mxu0 %v4178_v44  ;;  %5638 = vmatpush3.msra.mxu1 %v3745_v21  ;;  %v7147_v44 = vmax.f32 %v6875_v56, 0.0 }
 0x80f   :  { %5015 = vmatprep.subr.mxu0 %v4193_v37  ;;  %5639 = vmatprep.subr.mxu1 %v3744_v45 }
 0x810   :  { %5016 = vmatpush3.msra.mxu0 %v4177_v20  ;;  %5640 = vmatpush3.msra.mxu1 %v3744_v45  ;;  %v3596_v37 = vadd.f32 %v7147_v44, %v3453_v7  ;;  %v7150_v45 = vmax.f32 %v6845_v54, 0.0  ;;  %v4048_v54 = vld [vmem:[#allocation13 + $0x38] sm:$0xff]  ;;  %v4232_v44 = vld [vmem:[#allocation10 + $0x1c8] sm:$0xff] }
 0x811   :  { %5017 = vmatprep.subr.mxu0 %v4192_v4  ;;  %5697 = vmatprep.subr.mxu1 %v4056_v9 }
 0x812   :  { %5018 = vmatpush3.msra.mxu0 %v4176_v60 }
 0x813   :  { %5019 = vmatprep.subr.mxu0 %v4191_v43 }
 0x814   :  { %5020 = vmatpush3.msra.mxu0 %v4175_v50  ;;  %v7148_v50 = vmax.f32 %v6843_v8, 0.0 }
 0x815   :  { %4325 = vmatmul.mubr.f32.vlgmr.msra.gmra.mxu0 %v6480_v5  ;;  %v4020_v5 = vadd.f32 %v6772_v10, %v6769_v59  ;;  %v3592_v59 = vadd.f32 %v3584_v34, %v3449_v15  ;;  %v4055_v15 = vld [vmem:[#allocation13 + $0x70] sm:$0xff] }
 0x816   :  { %4329 = vmatprep.mubr.f32.mxu0 %v6797_v6  ;;  %v4648_v6 = vld [vmem:[#allocation14 + $0xa] ss:$0 sm:$0xff]  ;;  %v3599_v56 = vadd.f32 %v7149_v51, %v7148_v50  ;;  %v4227_v51 = vld [vmem:[#allocation10 + $0x1a0] sm:$0xff] }
 0x817   :  { %v4212_v50 = vld [vmem:[#allocation10 + $0x128] sm:$0xff] }
 0x819   :  { %4330 = vmatmul.mubr.f32.gmra.mxu0 %v6483_v61  ;;  %v4021_v61 = vadd.f32 %v6775_v58, %v4020_v5  ;;  %v4031_v58 = vadd.f32 %v6784_v42, %v6781_v3  ;;  %v3594_v3 = vadd.f32 %v3586_v2, %v3451_v36 }
 0x81a   :  { %4334 = vmatprep.mubr.f32.mxu0 %v6800_v52 }
 0x81b   :  { %v4032_v34 = vadd.f32 %v6787_v35, %v4031_v58  ;;  %v4053_v35 = vld [vmem:[#allocation13 + $0x60] sm:$0xff]  ;;  %v4042_v58 = vld [vmem:[#allocation13 + $0x8] sm:$0xff] }
 0x81d   :  { %4335 = vmatmul.mubr.f32.gmra.mxu0 %v6486_v30  ;;  %v4022_v30 = vadd.f32 %v6778_v0, %v4021_v61  ;;  %v4033_v27 = vadd.f32 %v6790_v26, %v4032_v34  ;;  %v4051_v26 = vld [vmem:[#allocation13 + $0x50] sm:$0xff]  ;;  %v4220_v34 = vld [vmem:[#allocation10 + $0x168] sm:$0xff] }
 0x81e   :  { %4339 = vmatprep.mubr.f32.mxu0 %v6803_v41 }
 0x821   :  { %4340 = vmatmul.mubr.f32.gmra.mxu0 %v6489_v33  ;;  %v4023_v33 = vrot.slane %v4022_v30, 4 }
 0x822   :  { %4344 = vmatprep.mubr.f32.mxu0 %v6806_v17 }
 0x825   :  { %4345 = vmatmul.mubr.f32.gmra.mxu0 %v6492_v46  ;;  %v4024_v46 = vadd.f32 %v4023_v33, %v4022_v30  ;;  %v4034_v33 = vrot.slane %v4033_v27, 4 }
 0x826   :  { %4349 = vmatprep.mubr.f32.mxu0 %v6809_v38 }
 0x827   :  { %v4025_v41 = vrot.slane %v4024_v46, 2 }
 0x829   :  { %4350 = vmatmul.mubr.f32.gmra.mxu0 %v6495_v55  ;;  %v4026_v31 = vadd.f32 %v4025_v41, %v4024_v46 }
 0x82a   :  { %4354 = vmatprep.mubr.f32.mxu0 %v6816_v47 }
 0x82d   :  { %4355 = vmatmul.mubr.f32.gmra.mxu0 %v6498_v16  ;;  %v3593_v16 = vadd.f32 %v3585_v48, %v3450_v11  ;;  %v3595_v11 = vadd.f32 %v3587_v1, %v3452_v25  ;;  %v4054_v25 = vld [vmem:[#allocation13 + $0x68] sm:$0xff]  ;;  %v4027_v1 = vrot.slane %v4026_v31, 1 }
 0x82e   :  { %4359 = vmatprep.mubr.f32.mxu0 %v6822_v22 }
 0x82f   :  { %v4028_v60 = vadd.f32 %v4027_v1, %v4026_v31  ;;  %v4041_v31 = vld [vmem:[#allocation13] sm:$0xff] }
 0x831   :  { %4360 = vmatmul.mubr.f32.gmra.mxu0 %v6501_v57  ;;  %v4030_v30 = vmul.f32 0.03125, %v4028_v60  ;;  %v4213_v60 = vld [vmem:[#allocation10 + $0x130] sm:$0xff] }
 0x895   :  { %v5599_v52 = vpop.f32.mrf.mxu0 }
 0x896   :  { %v3694_v55 = vadd.f32 %v5599_v52, %v4648_v6  ;;  %v4047_v52 = vld [vmem:[#allocation13 + $0x30] sm:$0xff] }
 0x897   :  { %v3688_v17 = vpop.f32.mrf.mxu0 }
 0x898   :  { %v3728_v57 = vmax.f32 %v3694_v55, 0.0  ;;  %v3689_v38 = vadd.f32 %v4648_v6, %v3688_v17  ;;  %v4046_v55 = vld [vmem:[#allocation13 + $0x28] sm:$0xff]  ;;  %v4045_v17 = vld [vmem:[#allocation13 + $0x20] sm:$0xff] }
 0x899   :  { %v5602_v10 = vpop.f32.mrf.mxu0 }
 0x89a   :  { %v6935_v0 = vadd.f32 %v3728_v57, %v3593_v16  ;;  %v3727_v47 = vmax.f32 %v3689_v38, 0.0  ;;  %v3704_v22 = vadd.f32 %v5602_v10, %v4648_v6  ;;  %v4044_v16 = vld [vmem:[#allocation13 + $0x18] sm:$0xff]  ;;  %v4043_v38 = vld [vmem:[#allocation13 + $0x10] sm:$0xff]  ;;  %v6977_v10 = vld [vmem:[#allocation14 + $0xd] ss:$0 sm:$0xff] }
 0x89b   :  { %v3698_v40 = vpop.f32.mrf.mxu0 }
 0x89c   :  { %v6941_v49 = vadd.f32 %v3727_v47, %v3592_v59  ;;  %v3730_v28 = vmax.f32 %v3704_v22, 0.0  ;;  %v3699_v24 = vadd.f32 %v4648_v6, %v3698_v40  ;;  %5641 = vmatprep.mubr.f32.mxu1 %v3727_v47 }
 0x89d   :  { %v5605_v42 = vpop.f32.mrf.mxu0  ;;  %5642 = vmatmul.mubr.f32.vlgmr.msra.gmra.mxu1 %v3728_v57 }
 0x89e   :  { %v6948_v48 = vadd.f32 %v3730_v28, %v3595_v11  ;;  %v3729_v32 = vmax.f32 %v3699_v24, 0.0  ;;  %v3714_v23 = vadd.f32 %v5605_v42, %v4648_v6  ;;  %5698 = vmatpush3.msra.mxu1 %v4056_v9  ;;  %v7151_v9 = vmax.f32 %v6885_v62, 0.0  ;;  %v4238_v11 = vld [vmem:[#allocation10 + $0x1f8] sm:$0xff]  ;;  %v4237_v24 = vld [vmem:[#allocation10 + $0x1f0] sm:$0xff]  ;;  %v4236_v42 = vld [vmem:[#allocation10 + $0x1e8] sm:$0xff] }
 0x89f   :  { %5699 = vmatprep.subr.mxu1 %v4055_v15  ;;  %v3708_v19 = vpop.f32.mrf.mxu0  ;;  %v4035_v62 = vadd.f32 %v4034_v33, %v4033_v27  ;;  %v4215_v27 = vld [vmem:[#allocation10 + $0x140] sm:$0xff]  ;;  %v6987_v33 = vld [vmem:[#allocation10 + $0x270] sm:$0xff] }
 0x8a0   :  { %v6954_v13 = vadd.f32 %v3729_v32, %v3594_v3  ;;  %v3732_v36 = vmax.f32 %v3714_v23, 0.0  ;;  %v3709_v2 = vadd.f32 %v4648_v6, %v3708_v19  ;;  %5700 = vmatpush3.msra.mxu1 %v4055_v15  ;;  %5644 = vmatprep.mubr.f32.mxu1 %v3729_v32  ;;  %v3598_v5 = vadd.f32 %v7151_v9, %v7150_v45  ;;  %v4221_v15 = vld [vmem:[#allocation10 + $0x170] sm:$0xff]  ;;  %v4235_v32 = vld [vmem:[#allocation10 + $0x1e0] sm:$0xff]  ;;  %v4234_v19 = vld [vmem:[#allocation10 + $0x1d8] sm:$0xff] }
 0x8a1   :  { %5701 = vmatprep.subr.mxu1 %v4054_v25  ;;  %v5608_v20 = vpop.f32.mrf.mxu0  ;;  %5645 = vmatmul.mubr.f32.gmra.mxu1 %v3730_v28  ;;  %v4036_v41 = vrot.slane %v4035_v62, 2  ;;  %v4222_v28 = vld [vmem:[#allocation10 + $0x178] sm:$0xff]  ;;  %v4209_v45 = vld [vmem:[#allocation10 + $0x110] sm:$0xff]  ;;  %v4224_v9 = vld [vmem:[#allocation10 + $0x188] sm:$0xff] }
 0x8a2   :  { %v6961_v4 = vadd.f32 %v3732_v36, %v3597_v14  ;;  %v3731_v12 = vmax.f32 %v3709_v2, 0.0  ;;  %v3724_v39 = vadd.f32 %v5608_v20, %v4648_v6  ;;  %5702 = vmatpush3.msra.mxu1 %v4054_v25  ;;  %v4219_v25 = vld [vmem:[#allocation10 + $0x160] sm:$0xff]  ;;  %v4218_v14 = vld [vmem:[#allocation10 + $0x158] sm:$0xff]  ;;  %v4217_v2 = vld [vmem:[#allocation10 + $0x150] sm:$0xff] }
 0x8a3   :  { %5703 = vmatprep.subr.mxu1 %v4053_v35  ;;  %v3718_v43 = vpop.f32.mrf.mxu0  ;;  %v4037_v57 = vadd.f32 %v4036_v41, %v4035_v62  ;;  %v4231_v20 = vld [vmem:[#allocation10 + $0x1c0] sm:$0xff]  ;;  %v7000_v62 = vld [vmem:[#allocation10 + $0x258] sm:$0xff] }
 0x8a4   :  { %v6967_v7 = vadd.f32 %v3731_v12, %v3596_v37  ;;  %v3734_v18 = vmax.f32 %v3724_v39, 0.0  ;;  %v3719_v21 = vadd.f32 %v4648_v6, %v3718_v43  ;;  %5704 = vmatpush3.msra.mxu1 %v4053_v35  ;;  %5647 = vmatprep.mubr.f32.mxu1 %v3731_v12  ;;  %v4049_v6 = vld [vmem:[#allocation13 + $0x40] sm:$0xff]  ;;  %v4216_v37 = vld [vmem:[#allocation10 + $0x148] sm:$0xff]  ;;  %v4230_v12 = vld [vmem:[#allocation10 + $0x1b8] sm:$0xff] }
 0x8a5   :  { %5705 = vmatprep.subr.mxu1 %v4052_v29  ;;  %5648 = vmatmul.mubr.f32.gmra.mxu1 %v3732_v36  ;;  %v4038_v47 = vrot.slane %v4037_v57, 1  ;;  %v4233_v36 = vld [vmem:[#allocation10 + $0x1d0] sm:$0xff]  ;;  %v4214_v39 = vld [vmem:[#allocation10 + $0x138] sm:$0xff]  ;;  %v4228_v43 = vld [vmem:[#allocation10 + $0x1a8] sm:$0xff] }
 0x8a6   :  { %v6973_v61 = vadd.f32 %v3734_v18, %v3599_v56  ;;  %v3733_v8 = vmax.f32 %v3719_v21, 0.0  ;;  %5706 = vmatpush3.msra.mxu1 %v4052_v29  ;;  %v4229_v29 = vld [vmem:[#allocation10 + $0x1b0] sm:$0xff]  ;;  %v4211_v56 = vld [vmem:[#allocation10 + $0x120] sm:$0xff]  ;;  %v4210_v21 = vld [vmem:[#allocation10 + $0x118] sm:$0xff] }
 0x8a7   :  { %5707 = vmatprep.subr.mxu1 %v4051_v26  ;;  %v4039_v40 = vadd.f32 %v4038_v47, %v4037_v57  ;;  %v7012_v41 = vld [vmem:[#allocation10 + $0x240] sm:$0xff]  ;;  %v7022_v57 = vld [vmem:[#allocation10 + $0x228] sm:$0xff] }
 0x8a8   :  { %v6975_v46 = vadd.f32 %v3733_v8, %v3598_v5  ;;  %5708 = vmatpush3.msra.mxu1 %v4051_v26  ;;  %5650 = vmatprep.mubr.f32.mxu1 %v3733_v8  ;;  %v4225_v26 = vld [vmem:[#allocation10 + $0x190] sm:$0xff]  ;;  %v4208_v5 = vld [vmem:[#allocation10 + $0x108] sm:$0xff]  ;;  %v4223_v8 = vld [vmem:[#allocation10 + $0x180] sm:$0xff] }
 0x8a9   :  { %5709 = vmatprep.subr.mxu1 %v4050_v63  ;;  %5651 = vmatmul.mubr.f32.gmra.mxu1 %v3734_v18  ;;  %v4040_v3 = vmul.f32 0.03125, %v4039_v40  ;;  %v4226_v18 = vld [vmem:[#allocation10 + $0x198] sm:$0xff]  ;;  %v7040_v47 = vld [vmem:[#allocation10 + $0x208] sm:$0xff] }
 0x8aa   :  { %5710 = vmatpush3.msra.mxu1 %v4050_v63  ;;  %5729 = vmatprep.mubr.f32.mxu1 %v4030_v30  ;;  %v6983_v63 = vld [vmem:[#allocation10 + $0x278] sm:$0xff] }
 0x8ab   :  { %5711 = vmatprep.subr.mxu1 %v4049_v6  ;;  %5741 = vmatprep.subr.mxu0 %v6983_v63 }
 0x8ac   :  { %5712 = vmatpush3.msra.mxu1 %v4049_v6  ;;  %5742 = vmatpush3.msra.mxu0 %v6983_v63  ;;  %v6992_v6 = vld [vmem:[#allocation10 + $0x268] sm:$0xff] }
 0x8ad   :  { %5713 = vmatprep.subr.mxu1 %v4048_v54  ;;  %5743 = vmatprep.subr.mxu0 %v6987_v33 }
 0x8ae   :  { %5714 = vmatpush3.msra.mxu1 %v4048_v54  ;;  %5744 = vmatpush3.msra.mxu0 %v6987_v33  ;;  %v6996_v54 = vld [vmem:[#allocation10 + $0x260] sm:$0xff] }
 0x8af   :  { %5715 = vmatprep.subr.mxu1 %v4047_v52  ;;  %5745 = vmatprep.subr.mxu0 %v6992_v6 }
 0x8b0   :  { %5716 = vmatpush3.msra.mxu1 %v4047_v52  ;;  %5746 = vmatpush3.msra.mxu0 %v6992_v6  ;;  %v7004_v52 = vld [vmem:[#allocation10 + $0x250] sm:$0xff] }
 0x8b1   :  { %5717 = vmatprep.subr.mxu1 %v4046_v55  ;;  %5747 = vmatprep.subr.mxu0 %v6996_v54 }
 0x8b2   :  { %5718 = vmatpush3.msra.mxu1 %v4046_v55  ;;  %5748 = vmatpush3.msra.mxu0 %v6996_v54  ;;  %v7008_v55 = vld [vmem:[#allocation10 + $0x248] sm:$0xff] }
 0x8b3   :  { %5719 = vmatprep.subr.mxu1 %v4045_v17  ;;  %5749 = vmatprep.subr.mxu0 %v7000_v62 }
 0x8b4   :  { %5720 = vmatpush3.msra.mxu1 %v4045_v17  ;;  %5750 = vmatpush3.msra.mxu0 %v7000_v62  ;;  %v7014_v17 = vld [vmem:[#allocation10 + $0x238] sm:$0xff] }
 0x8b5   :  { %5721 = vmatprep.subr.mxu1 %v4044_v16  ;;  %v5687_v59 = vpop.f32.mrf.mxu0  ;;  %5751 = vmatprep.subr.mxu0 %v7004_v52 }
 0x8b6   :  { %5722 = vmatpush3.msra.mxu1 %v4044_v16  ;;  %v6980_v22 = vadd.f32 %v5687_v59, %v6977_v10  ;;  %5752 = vmatpush3.msra.mxu0 %v7004_v52  ;;  %v7020_v16 = vld [vmem:[#allocation10 + $0x230] sm:$0xff]  ;;  %v7032_v59 = vld [vmem:[#allocation10 + $0x218] sm:$0xff] }
 0x8b7   :  { %5723 = vmatprep.subr.mxu1 %v4043_v38  ;;  %v3973_v23 = vpop.f32.mrf.mxu0  ;;  %5753 = vmatprep.subr.mxu0 %v7008_v55 }
 0x8b8   :  { %5724 = vmatpush3.msra.mxu1 %v4043_v38  ;;  %v3974_v1 = vadd.f32 %v6977_v10, %v3973_v23  ;;  %5754 = vmatpush3.msra.mxu0 %v7008_v55  ;;  %v7028_v38 = vld [vmem:[#allocation10 + $0x220] sm:$0xff]  ;;  %v4013_v23 = vmax.f32 %v6980_v22, 0.0 }
 0x8b9   :  { %5725 = vmatprep.subr.mxu1 %v4042_v58  ;;  %5755 = vmatprep.subr.mxu0 %v7012_v41 }
 0x8ba   :  { %5726 = vmatpush3.msra.mxu1 %v4042_v58  ;;  %v4012_v35 = vmax.f32 %v3974_v1, 0.0  ;;  %5756 = vmatpush3.msra.mxu0 %v7012_v41  ;;  %v7036_v58 = vld [vmem:[#allocation10 + $0x210] sm:$0xff] }
 0x8bb   :  { %5727 = vmatprep.subr.mxu1 %v4041_v31  ;;  %5757 = vmatprep.subr.mxu0 %v7014_v17 }
 0x8bc   :  { %5728 = vmatpush3.msra.mxu1 %v4041_v31  ;;  %5758 = vmatpush3.msra.mxu0 %v7014_v17  ;;  %v7044_v31 = vld [vmem:[#allocation10 + $0x200] sm:$0xff] }
 0x8bd   :  { %5730 = vmatmul.mubr.f32.vlgmr.msra.gmra.mxu1 %v4030_v30  ;;  %5045 = vmatprep.subr.mxu1 %v4238_v11  ;;  %v7048_v11 = vld [vmem:[#allocation14 + $0xb] ss:$0 sm:$0xff] }
 0x8be   :  { %5732 = vmatprep.mubr.f32.mxu1 %v4030_v30  ;;  %5046 = vmatpush3.msra.mxu1 %v4222_v28  ;;  %v5690_v28 = vpop.f32.mrf.mxu0 }
 0x8bf   :  { %5047 = vmatprep.subr.mxu1 %v4237_v24  ;;  %5759 = vmatprep.subr.mxu0 %v7020_v16 }
 0x8c0   :  { %5048 = vmatpush3.msra.mxu1 %v4221_v15  ;;  %5760 = vmatpush3.msra.mxu0 %v7020_v16 }
 0x8c1   :  { %5733 = vmatmul.mubr.f32.gmra.mxu1 %v4030_v30  ;;  %5049 = vmatprep.subr.mxu1 %v4236_v42  ;;  %v4207_v30 = vld [vmem:[#allocation10 + $0x100] sm:$0xff] }
 0x8c2   :  { %5735 = vmatprep.mubr.f32.mxu1 %v4040_v3  ;;  %5050 = vmatpush3.msra.mxu1 %v4220_v34  ;;  %v3983_v34 = vpop.f32.mrf.mxu0 }
 0x8c3   :  { %5051 = vmatprep.subr.mxu1 %v4235_v32  ;;  %5761 = vmatprep.subr.mxu0 %v7022_v57 }
 0x8c4   :  { %5052 = vmatpush3.msra.mxu1 %v4219_v25  ;;  %5762 = vmatpush3.msra.mxu0 %v7022_v57  ;;  %v3984_v25 = vadd.f32 %v6977_v10, %v3983_v34 }
 0x8c5   :  { %5736 = vmatmul.mubr.f32.gmra.mxu1 %v4040_v3  ;;  %5053 = vmatprep.subr.mxu1 %v4234_v19 }
 0x8c6   :  { %5738 = vmatprep.mubr.f32.mxu1 %v4040_v3  ;;  %5054 = vmatpush3.msra.mxu1 %v4218_v14 }
 0x8c7   :  { %5055 = vmatprep.subr.mxu1 %v4233_v36  ;;  %5763 = vmatprep.subr.mxu0 %v7028_v38 }
 0x8c8   :  { %5056 = vmatpush3.msra.mxu1 %v4217_v2  ;;  %5764 = vmatpush3.msra.mxu0 %v7028_v38 }
 0x8c9   :  { %5739 = vmatmul.mubr.f32.gmra.mxu1 %v4040_v3  ;;  %5057 = vmatprep.subr.mxu1 %v4232_v44  ;;  %v3989_v44 = vadd.f32 %v5690_v28, %v6977_v10 }
 0x8ca   :  { %5058 = vmatpush3.msra.mxu1 %v4216_v37  ;;  %4429 = vmatprep.mubr.f32.mxu1 %v4012_v35  ;;  %v5693_v35 = vpop.f32.mrf.mxu0  ;;  %v4014_v37 = vmax.f32 %v3984_v25, 0.0 }
 0x8cb   :  { %5059 = vmatprep.subr.mxu1 %v4231_v20  ;;  %5765 = vmatprep.subr.mxu0 %v7032_v59 }
 0x8cc   :  { %5060 = vmatpush3.msra.mxu1 %v4215_v27  ;;  %5766 = vmatpush3.msra.mxu0 %v7032_v59 }
 0x8cd   :  { %5061 = vmatprep.subr.mxu1 %v4230_v12  ;;  %5767 = vmatprep.subr.mxu0 %v7036_v58 }
 0x8ce   :  { %5062 = vmatpush3.msra.mxu1 %v4214_v39  ;;  %5768 = vmatpush3.msra.mxu0 %v7036_v58  ;;  %v4015_v39 = vmax.f32 %v3989_v44, 0.0 }
 0x8cf   :  { %5063 = vmatprep.subr.mxu1 %v4229_v29  ;;  %5769 = vmatprep.subr.mxu0 %v7040_v47 }
 0x8d0   :  { %5064 = vmatpush3.msra.mxu1 %v4213_v60  ;;  %5770 = vmatpush3.msra.mxu0 %v7040_v47 }
 0x8d1   :  { %5065 = vmatprep.subr.mxu1 %v4228_v43  ;;  %5771 = vmatprep.subr.mxu0 %v7044_v31 }
 0x8d2   :  { %5066 = vmatpush3.msra.mxu1 %v4212_v50  ;;  %5772 = vmatpush3.msra.mxu0 %v7044_v31 }
 0x8d3   :  { %5067 = vmatprep.subr.mxu1 %v4227_v51 }
 0x8d4   :  { %5068 = vmatpush3.msra.mxu1 %v4211_v56  ;;  %v3999_v56 = vadd.f32 %v5693_v35, %v6977_v10 }
 0x8d5   :  { %5069 = vmatprep.subr.mxu1 %v4226_v18 }
 0x8d6   :  { %5070 = vmatpush3.msra.mxu1 %v4210_v21 }
 0x8d7   :  { %5071 = vmatprep.subr.mxu1 %v4225_v26 }
 0x8d8   :  { %5072 = vmatpush3.msra.mxu1 %v4209_v45 }
 0x8d9   :  { %5073 = vmatprep.subr.mxu1 %v4224_v9 }
 0x8da   :  { %5074 = vmatpush3.msra.mxu1 %v4208_v5  ;;  %v4017_v5 = vmax.f32 %v3999_v56, 0.0 }
 0x8db   :  { %5075 = vmatprep.subr.mxu1 %v4223_v8 }
 0x8dc   :  { %5076 = vmatpush3.msra.mxu1 %v4207_v30 }
 0x8dd   :  { %5785 = vmatprep.subr.mxu1 %v6983_v63 }
 0x95d   :  { %v5643_v40 = vpop.f32.mrf.mxu1 }
 0x95e   :  { %v3837_v15 = vadd.f32 %v5643_v40, %v7048_v11 }
 0x95f   :  { %v3831_v24 = vpop.f32.mrf.mxu1 }
 0x960   :  { %v3832_v3 = vadd.f32 %v7048_v11, %v3831_v24  ;;  %v3871_v19 = vmax.f32 %v3837_v15, 0.0 }
 0x961   :  { %v5646_v42 = vpop.f32.mrf.mxu1 }
 0x962   :  { %v3870_v32 = vmax.f32 %v3832_v3, 0.0  ;;  %v3879_v20 = vadd.f32 %v3871_v19, %v6935_v0  ;;  %v3847_v22 = vadd.f32 %v5646_v42, %v7048_v11 }
 0x963   :  { %v3841_v1 = vpop.f32.mrf.mxu1 }
 0x964   :  { %v3878_v14 = vadd.f32 %v3870_v32, %v6941_v49  ;;  %v3842_v36 = vadd.f32 %v7048_v11, %v3841_v1  ;;  %v3993_v49 = vpop.f32.mrf.mxu0  ;;  %v3873_v60 = vmax.f32 %v3847_v22, 0.0 }
 0x965   :  { %v5649_v2 = vpop.f32.mrf.mxu1  ;;  %v3994_v29 = vadd.f32 %v6977_v10, %v3993_v49 }
 0x966   :  { %4430 = vmatmul.mubr.f32.vlgmr.msra.gmra.mxu1 %v3878_v14  ;;  %v3872_v27 = vmax.f32 %v3842_v36, 0.0  ;;  %v5696_v51 = vpop.f32.mrf.mxu0  ;;  %v3881_v21 = vadd.f32 %v3873_v60, %v6948_v48 }
 0x967   :  { %4434 = vmatprep.mubr.f32.mxu1 %v4013_v23  ;;  %5801 = vmatpush3.msra.mxu1 %v6983_v63  ;;  %v3851_v12 = vpop.f32.mrf.mxu1  ;;  %v4016_v18 = vmax.f32 %v3994_v29, 0.0 }
 0x968   :  { %5786 = vmatprep.subr.mxu1 %v6987_v33  ;;  %v3880_v0 = vadd.f32 %v3872_v27, %v6954_v13  ;;  %v3852_v43 = vadd.f32 %v7048_v11, %v3851_v12  ;;  %v3857_v13 = vadd.f32 %v5649_v2, %v7048_v11  ;;  %v4003_v9 = vpop.f32.mrf.mxu0 }
 0x969   :  { %5802 = vmatpush3.msra.mxu1 %v6987_v33  ;;  %v5652_v50 = vpop.f32.mrf.mxu1  ;;  %v4004_v8 = vadd.f32 %v6977_v10, %v4003_v9  ;;  %v4009_v33 = vadd.f32 %v5696_v51, %v6977_v10 }
 0x96a   :  { %4435 = vmatmul.mubr.f32.gmra.mxu1 %v3879_v20  ;;  %5787 = vmatprep.subr.mxu1 %v6992_v6  ;;  %v3874_v26 = vmax.f32 %v3852_v43, 0.0  ;;  %v3875_v63 = vmax.f32 %v3857_v13, 0.0 }
 0x96b   :  { %4439 = vmatprep.mubr.f32.mxu1 %v4014_v37  ;;  %5803 = vmatpush3.msra.mxu1 %v6992_v6  ;;  %v3861_v45 = vpop.f32.mrf.mxu1  ;;  %v4018_v6 = vmax.f32 %v4004_v8, 0.0  ;;  %v4575_v8 = vld [vmem:[#allocation14 + $0xf] sm:$0x1] }
 0x96c   :  { %5788 = vmatprep.subr.mxu1 %v6996_v54  ;;  %v3882_v48 = vadd.f32 %v3874_v26, %v6967_v7  ;;  %v3862_v30 = vadd.f32 %v7048_v11, %v3861_v45 }
 0x96d   :  { %5804 = vmatpush3.msra.mxu1 %v6996_v54  ;;  %v3883_v54 = vadd.f32 %v3875_v63, %v6961_v4 }
 0x96e   :  { %4440 = vmatmul.mubr.f32.gmra.mxu1 %v3880_v0  ;;  %5789 = vmatprep.subr.mxu1 %v7000_v62  ;;  %v3876_v7 = vmax.f32 %v3862_v30, 0.0 }
 0x96f   :  { %4444 = vmatprep.mubr.f32.mxu1 %v4015_v39  ;;  %5805 = vmatpush3.msra.mxu1 %v7000_v62  ;;  %v3867_v62 = vadd.f32 %v5652_v50, %v7048_v11 }
 0x970   :  { %5790 = vmatprep.subr.mxu1 %v7004_v52 }
 0x971   :  { %5806 = vmatpush3.msra.mxu1 %v7004_v52  ;;  %v4019_v52 = vmax.f32 %v4009_v33, 0.0  ;;  %v3877_v10 = vmax.f32 %v3867_v62, 0.0 }
 0x972   :  { %4445 = vmatmul.mubr.f32.gmra.mxu1 %v3881_v21  ;;  %5791 = vmatprep.subr.mxu1 %v7008_v55 }
 0x973   :  { %4449 = vmatprep.mubr.f32.mxu1 %v4016_v18  ;;  %5807 = vmatpush3.msra.mxu1 %v7008_v55  ;;  %v3884_v55 = vadd.f32 %v3876_v7, %v6975_v46  ;;  %v3885_v40 = vadd.f32 %v3877_v10, %v6973_v61 }
 0x974   :  { %5792 = vmatprep.subr.mxu1 %v7012_v41 }
 0x975   :  { %5808 = vmatpush3.msra.mxu1 %v7012_v41  ;;  %v4651_v41 = vld [vmem:[#allocation14 + $0xe] ss:$0 sm:$0xff] }
 0x976   :  { %4450 = vmatmul.mubr.f32.gmra.mxu1 %v3882_v48  ;;  %5793 = vmatprep.subr.mxu1 %v7014_v17  ;;  %v4578_v48 = vsub.s32 0, %v6171_v53 }
 0x977   :  { %4454 = vmatprep.mubr.f32.mxu1 %v4017_v5  ;;  %5809 = vmatpush3.msra.mxu1 %v7014_v17 }
 0x978   :  { %5794 = vmatprep.subr.mxu1 %v7020_v16 }
 0x979   :  { %5810 = vmatpush3.msra.mxu1 %v7020_v16 }
 0x97a   :  { %4455 = vmatmul.mubr.f32.gmra.mxu1 %v3883_v54  ;;  %5795 = vmatprep.subr.mxu1 %v7022_v57 }
 0x97b   :  { %4459 = vmatprep.mubr.f32.mxu1 %v4018_v6  ;;  %5811 = vmatpush3.msra.mxu1 %v7022_v57  ;;  %v4588_v6 = vsub.f32 1.0, %v4575_v8 }
 0x97c   :  { %5796 = vmatprep.subr.mxu1 %v7028_v38 }
 0x97d   :  { %v5731_v4 = vpop.f32.mrf.mxu1  ;;  %5812 = vmatpush3.msra.mxu1 %v7028_v38 }
 0x97e   :  { %4460 = vmatmul.mubr.f32.gmra.mxu1 %v3884_v55  ;;  %5797 = vmatprep.subr.mxu1 %v7032_v59  ;;  %v4134_v17 = vadd.f32 %v5731_v4, %v4651_v41 }
 0x97f   :  { %v4128_v16 = vpop.f32.mrf.mxu1  ;;  %4464 = vmatprep.mubr.f32.mxu1 %v4019_v52  ;;  %5813 = vmatpush3.msra.mxu1 %v7032_v59  ;;  %v4652_v52 = vld [vmem:[#allocation14 + $0xc] ss:$0 sm:$0xff] }
 0x980   :  { %v4129_v57 = vadd.f32 %v4651_v41, %v4128_v16  ;;  %5798 = vmatprep.subr.mxu1 %v7036_v58  ;;  %v4168_v38 = vmax.f32 %v4134_v17, 0.0  ;;  %v7105_v17 = vrot.slane %v4588_v6, %v4578_v48 }
 0x981   :  { %v5734_v46 = vpop.f32.mrf.mxu1  ;;  %5814 = vmatpush3.msra.mxu1 %v7036_v58 }
 0x982   :  { %v4167_v11 = vmax.f32 %v4129_v57, 0.0  ;;  %4465 = vmatmul.mubr.f32.gmra.mxu1 %v3885_v40  ;;  %5799 = vmatprep.subr.mxu1 %v7040_v47  ;;  %v4144_v28 = vadd.f32 %v5734_v46, %v4651_v41 }
 0x983   :  { %v4138_v24 = vpop.f32.mrf.mxu1  ;;  %5815 = vmatpush3.msra.mxu1 %v7040_v47 }
 0x984   :  { %v4139_v15 = vadd.f32 %v4651_v41, %v4138_v24  ;;  %5773 = vmatprep.mubr.f32.mxu0 %v4167_v11  ;;  %5800 = vmatprep.subr.mxu1 %v7044_v31  ;;  %v4170_v3 = vmax.f32 %v4144_v28, 0.0 }
 0x985   :  { %v5737_v61 = vpop.f32.mrf.mxu1  ;;  %5774 = vmatmul.mubr.f32.vlgmr.msra.gmra.mxu0 %v4168_v38  ;;  %5816 = vmatpush3.msra.mxu1 %v7044_v31  ;;  %v5021_v31 = vpop.f32.mrf.mxu0  ;;  %v7107_v38 = vrot.slane %v4575_v8, %v4578_v48  ;;  %v5851_v8 = vld [vmem:[#allocation2 + $0x28] sm:$0xff] }
 0x986   :  { %v4169_v59 = vmax.f32 %v4139_v15, 0.0  ;;  %v4154_v58 = vadd.f32 %v5737_v61, %v4651_v41 }
 0x987   :  { %v4148_v42 = vpop.f32.mrf.mxu1  ;;  %v5022_v2 = vpop.f32.mrf.mxu0 }
 0x988   :  { %v4149_v34 = vadd.f32 %v4651_v41, %v4148_v42  ;;  %5776 = vmatprep.mubr.f32.mxu0 %v4169_v59  ;;  %v4172_v25 = vmax.f32 %v4154_v58, 0.0  ;;  %v5023_v62 = vadd.f32 %v5022_v2, %v5021_v31 }
 0x989   :  { %v5740_v32 = vpop.f32.mrf.mxu1  ;;  %5777 = vmatmul.mubr.f32.gmra.mxu0 %v4170_v3  ;;  %v5024_v35 = vpop.f32.mrf.mxu0  ;;  %v5847_v3 = vld [vmem:[#allocation2 + $0x8] sm:$0xff] }
 0x98a   :  { %v4171_v23 = vmax.f32 %v4149_v34, 0.0  ;;  %v4164_v1 = vadd.f32 %v5740_v32, %v4651_v41  ;;  %v4327_v57 = vadd.f32 %v5023_v62, %v4652_v52  ;;  %v4594_v58 = vmul.f32 %v5847_v3, %v7105_v17 }
 0x98b   :  { %v4158_v47 = vpop.f32.mrf.mxu1  ;;  %v5025_v44 = vpop.f32.mrf.mxu0 }
 0x98c   :  { %v4159_v19 = vadd.f32 %v4651_v41, %v4158_v47  ;;  %5779 = vmatprep.mubr.f32.mxu1 %v4171_v23  ;;  %v4174_v36 = vmax.f32 %v4164_v1, 0.0  ;;  %v5026_v30 = vadd.f32 %v5025_v44, %v5024_v35 }
 0x98d   :  { %5780 = vmatmul.mubr.f32.vlgmr.msra.gmra.mxu1 %v4172_v25  ;;  %v5027_v37 = vpop.f32.mrf.mxu0 }
 0x98e   :  { %v4173_v14 = vmax.f32 %v4159_v19, 0.0  ;;  %v4332_v41 = vadd.f32 %v5026_v30, %v4652_v52  ;;  %v5848_v19 = vld [vmem:[#allocation2] sm:$0xff] }
 0x98f   :  { %v5028_v20 = vpop.f32.mrf.mxu0 }
 0x990   :  { %5782 = vmatprep.mubr.f32.mxu1 %v4173_v14  ;;  %v5029_v16 = vadd.f32 %v5028_v20, %v5027_v37  ;;  %v4593_v14 = vmul.f32 %v5848_v19, %v7105_v17  ;;  %v5849_v20 = vld [vmem:[#allocation2 + $0x18] sm:$0xff] }
 0x991   :  { %5783 = vmatmul.mubr.f32.gmra.mxu1 %v4174_v36  ;;  %v5030_v22 = vpop.f32.mrf.mxu0 }
 0x992   :  { %v4337_v34 = vadd.f32 %v5029_v16, %v4652_v52 }
 0x993   :  { %v5031_v27 = vpop.f32.mrf.mxu0 }
 0x994   :  { %v5032_v10 = vadd.f32 %v5031_v27, %v5030_v22  ;;  %v4596_v22 = vmul.f32 %v5849_v20, %v7105_v17 }
 0x995   :  { %v5033_v49 = vpop.f32.mrf.mxu0 }
 0x996   :  { %v4342_v53 = vadd.f32 %v5032_v10, %v4652_v52 }
 0x997   :  { %v5034_v60 = vpop.f32.mrf.mxu0 }
 0x998   :  { %v5035_v32 = vadd.f32 %v5034_v60, %v5033_v49 }
 0x999   :  { %v5036_v50 = vpop.f32.mrf.mxu0 }
 0x99b   :  { %v5037_v18 = vpop.f32.mrf.mxu0 }
 0x99c   :  { %v5038_v28 = vadd.f32 %v5037_v18, %v5036_v50 }
 0x99d   :  { %v5039_v26 = vpop.f32.mrf.mxu0 }
 0x99e   :  { %v4352_v31 = vadd.f32 %v5038_v28, %v4652_v52 }
 0x99f   :  { %v5040_v5 = vpop.f32.mrf.mxu0 }
 0x9a0   :  { %v5041_v60 = vadd.f32 %v5040_v5, %v5039_v26 }
 0x9a1   :  { %v5042_v54 = vpop.f32.mrf.mxu0 }
 0x9a3   :  { %v5043_v40 = vpop.f32.mrf.mxu0 }
 0x9a4   :  { %v5044_v2 = vadd.f32 %v5043_v40, %v5042_v54  ;;  %v4357_v54 = vadd.f32 %v5041_v60, %v4652_v52 }
 0xa26   :  { %v5077_v12 = vpop.f32.mrf.mxu1 }
 0xa28   :  { %v5078_v39 = vpop.f32.mrf.mxu1 }
 0xa29   :  { %v5079_v4 = vadd.f32 %v5078_v39, %v5077_v12 }
 0xa2a   :  { %v5080_v29 = vpop.f32.mrf.mxu1 }
 0xa2b   :  { %v4432_v42 = vadd.f32 %v5079_v4, %v4327_v57 }
 0xa2c   :  { %v5081_v0 = vpop.f32.mrf.mxu1 }
 0xa2d   :  { %v5082_v7 = vadd.f32 %v5081_v0, %v5080_v29  ;;  %v4347_v29 = vadd.f32 %v5035_v32, %v4652_v52 }
 0xa2e   :  { %v5083_v43 = vpop.f32.mrf.mxu1 }
 0xa2f   :  { %v4437_v11 = vadd.f32 %v5082_v7, %v4332_v41  ;;  %v5852_v7 = vld [vmem:[#allocation2 + $0x20] sm:$0xff] }
 0xa30   :  { %v5084_v51 = vpop.f32.mrf.mxu1  ;;  %v4597_v10 = vmul.f32 %v5852_v7, %v7105_v17 }
 0xa31   :  { %v5085_v61 = vadd.f32 %v5084_v51, %v5083_v43  ;;  %v5850_v43 = vld [vmem:[#allocation2 + $0x10] sm:$0xff] }
 0xa32   :  { %v5086_v56 = vpop.f32.mrf.mxu1  ;;  %v4595_v50 = vmul.f32 %v5850_v43, %v7105_v17 }
 0xa33   :  { %v4442_v39 = vadd.f32 %v5085_v61, %v4337_v34 }
 0xa34   :  { %v5087_v21 = vpop.f32.mrf.mxu1 }
 0xa35   :  { %v5088_v46 = vadd.f32 %v5087_v21, %v5086_v56 }
 0xa36   :  { %v5089_v13 = vpop.f32.mrf.mxu1 }
 0xa37   :  { %v4447_v36 = vadd.f32 %v5088_v46, %v4342_v53  ;;  %v5853_v46 = vld [vmem:[#allocation2 + $0x38] sm:$0xff] }
 0xa38   :  { %v5090_v45 = vpop.f32.mrf.mxu1 }
 0xa39   :  { %v5091_v35 = vadd.f32 %v5090_v45, %v5089_v13  ;;  %v4362_v45 = vadd.f32 %v5044_v2, %v4652_v52 }
 0xa3a   :  { %v5092_v9 = vpop.f32.mrf.mxu1 }
 0xa3b   :  { %v4452_v48 = vadd.f32 %v5091_v35, %v4347_v29 }
 0xa3c   :  { %v5093_v63 = vpop.f32.mrf.mxu1 }
 0xa3d   :  { %v5094_v23 = vadd.f32 %v5093_v63, %v5092_v9  ;;  %v4598_v63 = vmul.f32 %v5851_v8, %v7105_v17 }
 0xa3e   :  { %v5095_v33 = vpop.f32.mrf.mxu1 }
 0xa3f   :  { %v4457_v51 = vadd.f32 %v5094_v23, %v4352_v31 }
 0xa40   :  { %v5096_v55 = vpop.f32.mrf.mxu1 }
 0xa41   :  { %v5097_v30 = vadd.f32 %v5096_v55, %v5095_v33  ;;  %v4600_v33 = vmul.f32 %v5853_v46, %v7105_v17 }
 0xa42   :  { %v5098_v24 = vpop.f32.mrf.mxu1 }
 0xa43   :  { %v4462_v52 = vadd.f32 %v5097_v30, %v4357_v54 }
 0xa44   :  { %v5099_v44 = vpop.f32.mrf.mxu1 }
 0xa45   :  { %v5775_v15 = vpop.f32.mrf.mxu0  ;;  %v5100_v56 = vadd.f32 %v5099_v44, %v5098_v24 }
 0xa46   :  { %v4542_v59 = vadd.f32 %v5775_v15, %v4437_v11 }
 0xa47   :  { %v4536_v25 = vpop.f32.mrf.mxu0  ;;  %v4467_v40 = vadd.f32 %v5100_v56, %v4362_v45 }
 0xa48   :  { %v4581_v1 = vmul.f32 %v7107_v38, %v4542_v59  ;;  %v4537_v47 = vadd.f32 %v4536_v25, %v4432_v42  ;;  %v5854_v59 = vld [vmem:[#allocation2 + $0x30] sm:$0xff] }
 0xa49   :  { %v5778_v37 = vpop.f32.mrf.mxu0  ;;  %v4599_v3 = vmul.f32 %v5854_v59, %v7105_v17 }
 0xa4a   :  { %v4602_v27 = vadd.f32 %v4594_v58, %v4581_v1  ;;  %v4580_v12 = vmul.f32 %v7107_v38, %v4537_v47  ;;  %v4552_v49 = vadd.f32 %v5778_v37, %v4447_v36 }
 0xa4b   :  { %v4546_v0 = vpop.f32.mrf.mxu0 }
 0xa4c   :  { %4610 = vst [vmem:[#allocation16 + $0x8] sm:$0xff] %v4602_v27  ;;  %v4601_v18 = vadd.f32 %v4593_v14, %v4580_v12  ;;  %v4583_v21 = vmul.f32 %v7107_v38, %v4552_v49  ;;  %v4547_v13 = vadd.f32 %v4546_v0, %v4442_v39 }
 0xa4d   :  { %v5781_v9 = vpop.f32.mrf.mxu1 }
 0xa4e   :  { %4609 = vst [vmem:[#allocation16] sm:$0xff] %v4601_v18  ;;  %v4604_v26 = vadd.f32 %v4596_v22, %v4583_v21  ;;  %v4582_v5 = vmul.f32 %v7107_v38, %v4547_v13  ;;  %v4562_v6 = vadd.f32 %v5781_v9, %v4457_v51 }
 0xa4f   :  { %v4556_v62 = vpop.f32.mrf.mxu1 }
 0xa50   :  { %4612 = vst [vmem:[#allocation16 + $0x18] sm:$0xff] %v4604_v26  ;;  %v4603_v41 = vadd.f32 %v4595_v50, %v4582_v5  ;;  %v4585_v4 = vmul.f32 %v7107_v38, %v4562_v6  ;;  %v4557_v16 = vadd.f32 %v4556_v62, %v4452_v48 }
 0xa51   :  { %v5784_v57 = vpop.f32.mrf.mxu1 }
 0xa52   :  { %4611 = vst [vmem:[#allocation16 + $0x10] sm:$0xff] %v4603_v41  ;;  %v4606_v55 = vadd.f32 %v4598_v63, %v4585_v4  ;;  %v4584_v11 = vmul.f32 %v7107_v38, %v4557_v16  ;;  %v4572_v53 = vadd.f32 %v5784_v57, %v4467_v40 }
 0xa53   :  { %v4566_v28 = vpop.f32.mrf.mxu1 }
 0xa54   :  { %4614 = vst [vmem:[#allocation16 + $0x28] sm:$0xff] %v4606_v55  ;;  %v4605_v24 = vadd.f32 %v4597_v10, %v4584_v11  ;;  %v4587_v15 = vmul.f32 %v7107_v38, %v4572_v53  ;;  %v4567_v61 = vadd.f32 %v4566_v28, %v4462_v52 }
 0xa56   :  { %4613 = vst [vmem:[#allocation16 + $0x20] sm:$0xff] %v4605_v24  ;;  %v4608_v58 = vadd.f32 %v4600_v33, %v4587_v15  ;;  %v4586_v42 = vmul.f32 %v7107_v38, %v4567_v61 }
 0xa58   :  { %4616 = vst [vmem:[#allocation16 + $0x38] sm:$0xff] %v4608_v58  ;;  %v4607_v34 = vadd.f32 %v4599_v3, %v4586_v42 }
 0xa5a   :  { %4615 = vst [vmem:[#allocation16 + $0x30] sm:$0xff] %v4607_v34 }
 0xa5b   :  { %6026 = shalt.err (!%p6023_p2)
}
 0xa5c   :  { %4628 = dma.vmem_to_hbm [thread:$0]  %s4623_s7, 1024, %s7139_s8, [#allocation4], %s6052_s17, %s6052_s17, %s6053_s18  }
 0xa5d   :  { %6045 = dma.done.wait [#allocation4], 1024  }
 0xa5e   :  { %6046 = vsyncadd [#allocation4], 4294966272 }
 0xa5f   :  { %4632 = vsyncpa [#allocation3], 1 }
 0xa60   :  { %4633 = vsyncpa [#allocation6], 1 }
 0xa61   :  { %4634 = vsyncpa [#allocation9], 1 }
 0xa62   :  { %4635 = vsyncpa [#allocation12], 1 }
 0xa63   :  { %4636 = vsyncpa [#allocation15], 1 }
 0xa64   :  { %4637 = vsyncpa [#allocation4], 1 }

</bundles_post_ra>
